<compile_context>
chip_gen: v5e
topology: v5e:2x2
jax: 0.10.0
libtpu: 0.0.40
codegen_flags: <defaults>
</compile_context>

<pallas_src>
import math
import numpy as np
import jax
import jax.numpy as jnp
from jax import lax
from jax.experimental import pallas as pl
from jax.experimental.pallas import tpu as pltpu

# ---------------- synthetic small config (mirrors cfg.* shapes) ----------------
B = 2
IMG_F = 24                     # cfg.img_len_feature
TXT_F = 8                      # cfg.text_len_feature
FUSION_F = IMG_F + TXT_F       # 32
C_PAD = FUSION_F               # both branches consume the same 32-channel fused input
D_MODEL = 32                   # cfg.img_out_features
NUM_HEADS = 4                  # cfg.num_heads
HEAD_DIM = D_MODEL // NUM_HEADS
DIM_FF = 64                    # cfg.dim_feedforward
NUM_CLASSES = 5                # cfg.num_classes
C_OUT = 8                      # padded classifier width (site uses 5 lanes, roi uses 1)
LONG_LEN = 8                   # cfg.long_memory_length // cfg.long_memory_sampling_rate
WORK_LEN = 8                   # cfg.work_memory_length
T_TOTAL = LONG_LEN + WORK_LEN
NUM_QUERIES = 8                # cfg.enc_module = [[8, 1, True]]
NUM_ENC = 2                    # [fusion encoder, img encoder]
NEG_INF = -1e30
LN_EPS = 1e-5


# ============================ fully fused VAC_longText kernel ============================

def _vac_fused_kernel(x_ref, wt_ref, bt_ref, wc_ref, bc_ref,
                      pe_ref, wfh_ref, bfh_ref, q_ref, wat_ref, bat_ref,
                      wff1_ref, bff1_ref, wff2_ref, bff2_ref, lng_ref, lnb_ref,
                      wcls_ref, bcls_ref, out_ref, feat_sc):
    """One grid step = one full encoder branch (+TCA for branch 0) + classifier head.

    Activations stay batch-first (B, L, D); this is mathematically identical to the
    reference's seq-first (L, B, D) layout since every op is per-(batch, position) except
    attention / positional encoding, which are handled explicitly below.

    Packed weight indexing (leading dim of each ref, after the branch axis is squeezed):
      wat/bat : 16 = 2 layers x [self(q,k,v,o), cross(q,k,v,o)]
      wff*    : 2 layers (enc layer, dec layer)
      lng/lnb : [L0.norm1, L0.norm2, L0.norm3, enc_final, L1.norm1, L1.norm2, L1.norm3, dec_final]
      wfh/bfh : [feature_head_long, feature_head_work]
    """
    e = pl.program_id(0)
    fusion = x_ref[...]          # (B, T_TOTAL, FUSION_F) == cat(img_features, text_features)
    scale = 1.0 / math.sqrt(HEAD_DIM)

    # ---------------- branch-specific input features (TCA fused in) ----------------
    # Branch 0 (fusion encoder): Temporal_Channel_Attention of the fused features.
    # Branch 1 (img encoder): img channels only — text lanes masked to zero (the feature
    # head weights for those lanes are also zero, matching the original Linear(24, 32)).
    @pl.when(e == 0)
    def _():
        # Reference permutes to (T, C, B): Conv1d / AvgPool1d (k=3, s=1, p=1) run along the
        # BATCH axis, so the shifts below are along the leading B axis.
        zero = jnp.zeros_like(fusion[:1])
        f_prev = jnp.concatenate([zero, fusion[:-1]], axis=0)    # x at b-1 (zero padded)
        f_next = jnp.concatenate([fusion[1:], zero], axis=0)     # x at b+1 (zero padded)
        wt = wt_ref[...]                                         # (3, C): Conv1d(C, 1, k=3) taps
        t_logit = (jnp.sum(f_prev * wt[0][None, None, :], axis=-1)
                   + jnp.sum(fusion * wt[1][None, None, :], axis=-1)
                   + jnp.sum(f_next * wt[2][None, None, :], axis=-1)) + bt_ref[0, 0]
        t_att = 1.0 / (1.0 + jnp.exp(-t_logit))                  # sigmoid (EUP), (B, T)
        # AvgPool1d(k=3, s=1, p=1), count_include_pad=True -> always divide by 3
        pool = (f_prev + fusion + f_next) * (1.0 / 3.0)
        c_logit = jnp.dot(pool.reshape(B * T_TOTAL, FUSION_F), wc_ref[...],
                          preferred_element_type=jnp.float32) + bc_ref[...]
        c_att = (1.0 / (1.0 + jnp.exp(-c_logit))).reshape(B, T_TOTAL, FUSION_F)
        feat_sc[...] = fusion * t_att[..., None] * c_att

    @pl.when(e != 0)
    def _():
        lane = lax.broadcasted_iota(jnp.int32, (B, T_TOTAL, C_PAD), 2)
        feat_sc[...] = jnp.where(lane < IMG_F, fusion, 0.0)      # keep img channels only

    x = feat_sc[...]             # (B, T_TOTAL, C_PAD)
    pe = pe_ref[...]             # (T_TOTAL, D_MODEL)

    # ---------------- shared building blocks ----------------
    def layer_norm(z, idx):                      # z: (B, L, D)
        mu = jnp.mean(z, axis=-1, keepdims=True)
        var = jnp.mean(jnp.square(z - mu), axis=-1, keepdims=True)
        return (z - mu) * lax.rsqrt(var + LN_EPS) * lng_ref[idx] + lnb_ref[idx]

    def linear2(x2, w, b):                       # x2: (M, K)
        return jnp.dot(x2, w, preferred_element_type=jnp.float32) + b

    def mha(q_bld, kv_bld, base, mask):          # q: (B, Lq, D), kv: (B, Lk, D)
        Bn, Lq, _ = q_bld.shape
        Lk = kv_bld.shape[1]
        # nn.MultiheadAttention: q is scaled after the in-projection (incl. bias)
        qp = (linear2(q_bld.reshape(Bn * Lq, D_MODEL), wat_ref[base + 0], bat_ref[base + 0])
              * scale).reshape(Bn, Lq, D_MODEL)
        kp = linear2(kv_bld.reshape(Bn * Lk, D_MODEL), wat_ref[base + 1],
                     bat_ref[base + 1]).reshape(Bn, Lk, D_MODEL)
        vp = linear2(kv_bld.reshape(Bn * Lk, D_MODEL), wat_ref[base + 2],
                     bat_ref[base + 2]).reshape(Bn, Lk, D_MODEL)
        heads = []
        for h in range(NUM_HEADS):               # static unroll; batched matmuls per head
            sl = slice(h * HEAD_DIM, (h + 1) * HEAD_DIM)
            s = jnp.einsum('bqd,bkd->bqk', qp[:, :, sl], kp[:, :, sl],
                           preferred_element_type=jnp.float32)
            if mask is not None:                 # static gate: no zero-mask add when None
                s = s + mask[None]
            s = s - jnp.max(s, axis=-1, keepdims=True)
            ex = jnp.exp(s)
            p = ex / jnp.sum(ex, axis=-1, keepdims=True)
            heads.append(jnp.einsum('bqk,bkd->bqd', p, vp[:, :, sl],
                                    preferred_element_type=jnp.float32))
        o = jnp.concatenate(heads, axis=-1)      # (B, Lq, D)
        return linear2(o.reshape(Bn * Lq, D_MODEL), wat_ref[base + 3],
                       bat_ref[base + 3]).reshape(Bn, Lq, D_MODEL)

    def decoder_layer(tgt, mem, lidx, mask):     # post-norm TransformerDecoderLayer, dropout=id
        ab, nb = 8 * lidx, 4 * lidx
        tgt = layer_norm(tgt + mha(tgt, tgt, ab, mask), nb + 0)        # self-attn
        tgt = layer_norm(tgt + mha(tgt, mem, ab + 4, None), nb + 1)    # cross-attn
        Bn, L, _ = tgt.shape
        h = jnp.maximum(linear2(tgt.reshape(Bn * L, D_MODEL),
                                wff1_ref[lidx], bff1_ref[lidx]), 0.0)  # relu activation
        h = linear2(h, wff2_ref[lidx], bff2_ref[lidx]).reshape(Bn, L, D_MODEL)
        return layer_norm(tgt + h, nb + 2)

    # ---- long-memory branch: feature_head_long (+ReLU) + PE, enc decoder over queries ----
    lm = jnp.maximum(linear2(x[:, :LONG_LEN, :].reshape(B * LONG_LEN, C_PAD),
                             wfh_ref[0], bfh_ref[0]), 0.0).reshape(B, LONG_LEN, D_MODEL)
    lm = lm + pe[:LONG_LEN][None]
    queries = jnp.broadcast_to(q_ref[...][None], (B, NUM_QUERIES, D_MODEL))
    memory = layer_norm(decoder_layer(queries, lm, 0, None), 3)

    # ---- work-memory branch: feature_head_work (+ReLU) + PE(offset), causal dec decoder ----
    wm = jnp.maximum(linear2(x[:, LONG_LEN:, :].reshape(B * WORK_LEN, C_PAD),
                             wfh_ref[1], bfh_ref[1]), 0.0).reshape(B, WORK_LEN, D_MODEL)
    wm = wm + pe[LONG_LEN:T_TOTAL][None]
    rows = lax.broadcasted_iota(jnp.int32, (WORK_LEN, WORK_LEN), 0)
    cols = lax.broadcasted_iota(jnp.int32, (WORK_LEN, WORK_LEN), 1)
    causal = jnp.where(rows >= cols, 0.0, NEG_INF).astype(jnp.float32)
    out = layer_norm(decoder_layer(wm, memory, 1, causal), 7)

    # ---- fused classifier epilogue (site / roi heads packed into padded C_OUT lanes) ----
    cls = linear2(out.reshape(B * WORK_LEN, D_MODEL), wcls_ref[...], bcls_ref[...])
    out_ref[...] = cls.reshape(B, WORK_LEN, C_OUT)


def vac_longtext(params, img_features, text_features):
    """VAC_longText.forward, modal='multitask'. Returns (site_score, roi_score)."""
    fusion = jnp.concatenate([img_features, text_features], axis=-1)    # (B, T, FUSION_F)
    p = params["enc"]
    t = params["tca"]
    out = pl.pallas_call(
        _vac_fused_kernel,
        out_shape=jax.ShapeDtypeStruct((NUM_ENC, B, WORK_LEN, C_OUT), jnp.float32),
        grid=(NUM_ENC,),
        in_specs=[
            pl.BlockSpec((B, T_TOTAL, FUSION_F), lambda e: (0, 0, 0)),         # fused features
            pl.BlockSpec((3, FUSION_F), lambda e: (0, 0)),                      # TCA conv taps
            pl.BlockSpec(memory_space=pltpu.MemorySpace.SMEM),                  # TCA scalar bias
            pl.BlockSpec((FUSION_F, FUSION_F), lambda e: (0, 0)),               # TCA 1x1 conv w
            pl.BlockSpec((1, FUSION_F), lambda e: (0, 0)),                      # TCA 1x1 conv b
            pl.BlockSpec((T_TOTAL, D_MODEL), lambda e: (0, 0)),                 # pe (shared)
            pl.BlockSpec((None, 2, C_PAD, D_MODEL), lambda e: (e, 0, 0, 0)),    # wfh
            pl.BlockSpec((None, 2, D_MODEL), lambda e: (e, 0, 0)),              # bfh
            pl.BlockSpec((None, NUM_QUERIES, D_MODEL), lambda e: (e, 0, 0)),    # enc queries
            pl.BlockSpec((None, 16, D_MODEL, D_MODEL), lambda e: (e, 0, 0, 0)), # wat
            pl.BlockSpec((None, 16, D_MODEL), lambda e: (e, 0, 0)),             # bat
            pl.BlockSpec((None, 2, D_MODEL, DIM_FF), lambda e: (e, 0, 0, 0)),   # wff1
            pl.BlockSpec((None, 2, DIM_FF), lambda e: (e, 0, 0)),               # bff1
            pl.BlockSpec((None, 2, DIM_FF, D_MODEL), lambda e: (e, 0, 0, 0)),   # wff2
            pl.BlockSpec((None, 2, D_MODEL), lambda e: (e, 0, 0)),              # bff2
            pl.BlockSpec((None, 8, D_MODEL), lambda e: (e, 0, 0)),              # ln gamma
            pl.BlockSpec((None, 8, D_MODEL), lambda e: (e, 0, 0)),              # ln beta
            pl.BlockSpec((None, D_MODEL, C_OUT), lambda e: (e, 0, 0)),          # wcls
            pl.BlockSpec((None, 1, C_OUT), lambda e: (e, 0, 0)),                # bcls
        ],
        out_specs=pl.BlockSpec((None, B, WORK_LEN, C_OUT), lambda e: (e, 0, 0, 0)),
        scratch_shapes=[pltpu.VMEM((B, T_TOTAL, C_PAD), jnp.float32)],          # branch features
        compiler_params=pltpu.CompilerParams(
            dimension_semantics=("parallel",)),   # independent branches -> 2 TCs on v7x
    )(fusion, t["wt"], t["bt"], t["wc"], t["bc"],
      params["pe"][:T_TOTAL], p["wfh"], p["bfh"], p["q"], p["wat"], p["bat"],
      p["wff1"], p["bff1"], p["wff2"], p["bff2"], p["lng"], p["lnb"],
      p["wcls"], p["bcls"])
    site_score = out[0, :, :, :NUM_CLASSES]    # == classifier_site(TCA_embeds).transpose(0, 1)
    roi_score = out[1, :, :, :1]               # == classifier_roi(img_embeds).transpose(0, 1)
    return site_score, roi_score


# ============================ deterministic parameter init ============================

class _KeyGen:
    def __init__(self, seed):
        self._key = jax.random.PRNGKey(seed)

    def __call__(self):
        self._key, sub = jax.random.split(self._key)
        return sub


def positional_encoding(max_len, d_model):
    pe = np.zeros((max_len, d_model), np.float32)
    position = np.arange(max_len, dtype=np.float32)[:, None]
    div_term = np.exp(np.arange(0, d_model, 2, dtype=np.float32)
                      * (-math.log(10000.0) / d_model))
    pe[:, 0::2] = np.sin(position * div_term)
    pe[:, 1::2] = np.cos(position * div_term)
    return jnp.asarray(pe)


def make_params(seed=0):
    kg = _KeyGen(seed)

    def w(shape, scale=0.05):
        return jax.random.normal(kg(), shape, jnp.float32) * scale

    # TODO(synk): VAC_encoder.__init__ loads BERT text features from a .npy into text_dict;
    # forward() never uses it, so it is intentionally omitted here.

    def encoder_pack(c_in):
        wfh = w((2, C_PAD, D_MODEL))
        if c_in < C_PAD:
            wfh = wfh.at[:, c_in:, :].set(0.0)   # padded input channels contribute nothing
        return dict(
            wfh=wfh, bfh=w((2, D_MODEL), 0.02),
            q=w((NUM_QUERIES, D_MODEL)),
            wat=w((16, D_MODEL, D_MODEL)), bat=w((16, D_MODEL), 0.02),
            wff1=w((2, D_MODEL, DIM_FF)), bff1=w((2, DIM_FF), 0.02),
            wff2=w((2, DIM_FF, D_MODEL)), bff2=w((2, D_MODEL), 0.02),
            lng=1.0 + w((8, D_MODEL), 0.02), lnb=w((8, D_MODEL), 0.02),
        )

    fusion_enc = encoder_pack(FUSION_F)
    img_enc = encoder_pack(IMG_F)
    enc = {k: jnp.stack([fusion_enc[k], img_enc[k]]) for k in fusion_enc}

    # classifier heads (site: NUM_CLASSES, roi: 1), zero-padded to C_OUT output lanes
    w_site = jnp.zeros((D_MODEL, C_OUT), jnp.float32).at[:, :NUM_CLASSES].set(
        w((D_MODEL, NUM_CLASSES)))
    b_site = jnp.zeros((1, C_OUT), jnp.float32).at[:, :NUM_CLASSES].set(
        w((1, NUM_CLASSES), 0.02))
    w_roi = jnp.zeros((D_MODEL, C_OUT), jnp.float32).at[:, :1].set(w((D_MODEL, 1)))
    b_roi = jnp.zeros((1, C_OUT), jnp.float32).at[:, :1].set(w((1, 1), 0.02))
    enc["wcls"] = jnp.stack([w_site, w_roi])
    enc["bcls"] = jnp.stack([b_site, b_roi])

    return dict(
        tca=dict(wt=w((3, FUSION_F)), bt=w((1, 1), 0.02),
                 wc=w((FUSION_F, FUSION_F)), bc=w((1, FUSION_F), 0.02)),
        enc=enc,
        pe=positional_encoding(128, D_MODEL),
    )


# ============================ main ============================

if __name__ == "__main__":
    params = make_params(0)
    k1, k2 = jax.random.split(jax.random.PRNGKey(0))
    img_features = jax.random.normal(k1, (B, T_TOTAL, IMG_F), jnp.float32)
    text_features = jax.random.normal(k2, (B, T_TOTAL, TXT_F), jnp.float32)

    fwd = jax.jit(vac_longtext)
    site_score, roi_score = fwd(params, img_features, text_features)
    jax.block_until_ready((site_score, roi_score))

    assert site_score.shape == (B, WORK_LEN, NUM_CLASSES)
    assert roi_score.shape == (B, WORK_LEN, 1)
    assert bool(jnp.all(jnp.isfinite(site_score))) and bool(jnp.all(jnp.isfinite(roi_score)))
    print("KERNEL_OK")
</pallas_src>

<mosaic_0001>
module attributes {stable_mosaic.version = 11 : i64} {
  func.func @_vac_fused_kernel(%arg0: i32, %arg1: memref<2x16x32xf32, #tpu.memory_space<vmem>>, %arg2: memref<3x32xf32, #tpu.memory_space<vmem>>, %arg3: memref<1x1xf32, #tpu.memory_space<smem>>, %arg4: memref<32x32xf32, #tpu.memory_space<vmem>>, %arg5: memref<1x32xf32, #tpu.memory_space<vmem>>, %arg6: memref<16x32xf32, #tpu.memory_space<vmem>>, %arg7: memref<1x2x32x32xf32, #tpu.memory_space<vmem>>, %arg8: memref<1x2x32xf32, #tpu.memory_space<vmem>>, %arg9: memref<1x8x32xf32, #tpu.memory_space<vmem>>, %arg10: memref<1x16x32x32xf32, #tpu.memory_space<vmem>>, %arg11: memref<1x16x32xf32, #tpu.memory_space<vmem>>, %arg12: memref<1x2x32x64xf32, #tpu.memory_space<vmem>>, %arg13: memref<1x2x64xf32, #tpu.memory_space<vmem>>, %arg14: memref<1x2x64x32xf32, #tpu.memory_space<vmem>>, %arg15: memref<1x2x32xf32, #tpu.memory_space<vmem>>, %arg16: memref<1x8x32xf32, #tpu.memory_space<vmem>>, %arg17: memref<1x8x32xf32, #tpu.memory_space<vmem>>, %arg18: memref<1x32x8xf32, #tpu.memory_space<vmem>>, %arg19: memref<1x1x8xf32, #tpu.memory_space<vmem>>, %arg20: memref<1x2x8x8xf32, #tpu.memory_space<vmem>>, %arg21: memref<2x16x32xf32, #tpu.memory_space<vmem>>) attributes {dimension_semantics = [#tpu.dimension_semantics<parallel>], iteration_bounds = array<i64: 2>, scalar_prefetch = 0 : i64, scratch_operands = 1 : i64, tpu.core_type = #tpu.core_type<tc>, window_params = [{pipeline_mode = #tpu.pipeline_mode<synchronous>, transform_indices = @transform_0, window_bounds = array<i64: 2, 16, 32>}, {pipeline_mode = #tpu.pipeline_mode<synchronous>, transform_indices = @transform_1, window_bounds = array<i64: 3, 32>}, {transform_indices = @transform_2, window_bounds = array<i64: 1, 1>}, {pipeline_mode = #tpu.pipeline_mode<synchronous>, transform_indices = @transform_3, window_bounds = array<i64: 32, 32>}, {pipeline_mode = #tpu.pipeline_mode<synchronous>, transform_indices = @transform_4, window_bounds = array<i64: 1, 32>}, {pipeline_mode = #tpu.pipeline_mode<synchronous>, transform_indices = @transform_5, window_bounds = array<i64: 16, 32>}, {transform_indices = @transform_6, window_bounds = array<i64: 1, 2, 32, 32>}, {transform_indices = @transform_7, window_bounds = array<i64: 1, 2, 32>}, {transform_indices = @transform_8, window_bounds = array<i64: 1, 8, 32>}, {transform_indices = @transform_9, window_bounds = array<i64: 1, 16, 32, 32>}, {transform_indices = @transform_10, window_bounds = array<i64: 1, 16, 32>}, {transform_indices = @transform_11, window_bounds = array<i64: 1, 2, 32, 64>}, {transform_indices = @transform_12, window_bounds = array<i64: 1, 2, 64>}, {transform_indices = @transform_13, window_bounds = array<i64: 1, 2, 64, 32>}, {transform_indices = @transform_14, window_bounds = array<i64: 1, 2, 32>}, {transform_indices = @transform_15, window_bounds = array<i64: 1, 8, 32>}, {transform_indices = @transform_16, window_bounds = array<i64: 1, 8, 32>}, {transform_indices = @transform_17, window_bounds = array<i64: 1, 32, 8>}, {transform_indices = @transform_18, window_bounds = array<i64: 1, 1, 8>}, {transform_indices = @transform_19, window_bounds = array<i64: 1, 2, 8, 8>}]} {
    %c0 = arith.constant 0 : index
    %c0_0 = arith.constant 0 : index
    %c0_1 = arith.constant 0 : index
    %0 = vector.load %arg1[%c0, %c0_0, %c0_1] : memref<2x16x32xf32, #tpu.memory_space<vmem>>, vector<2x16x32xf32>
    %c0_i32 = arith.constant 0 : i32
    %1 = arith.cmpi eq, %arg0, %c0_i32 : i32
    %2 = arith.extui %1 : i1 to i32
    %c0_i32_2 = arith.constant 0 : i32
    %3 = arith.cmpi ne, %2, %c0_i32_2 : i32
    scf.if %3 {
      %cst_346 = arith.constant 0.000000e+00 : f32
      %744 = vector.broadcast %cst_346 : f32 to vector<1x16x32xf32>
      %745 = vector.extract_strided_slice %0 {offsets = [0, 0, 0], sizes = [1, 16, 32], strides = [1, 1, 1]} : vector<2x16x32xf32> to vector<1x16x32xf32>
      %746 = tpu.concatenate %744, %745 in 0 : vector<1x16x32xf32>, vector<1x16x32xf32> -> vector<2x16x32xf32>
      %747 = vector.extract_strided_slice %0 {offsets = [1, 0, 0], sizes = [1, 16, 32], strides = [1, 1, 1]} : vector<2x16x32xf32> to vector<1x16x32xf32>
      %748 = tpu.concatenate %747, %744 in 0 : vector<1x16x32xf32>, vector<1x16x32xf32> -> vector<2x16x32xf32>
      %c0_347 = arith.constant 0 : index
      %c0_348 = arith.constant 0 : index
      %749 = vector.load %arg2[%c0_347, %c0_348] : memref<3x32xf32, #tpu.memory_space<vmem>>, vector<3x32xf32>
      %750 = vector.extract_strided_slice %749 {offsets = [0, 0], sizes = [1, 32], strides = [1, 1]} : vector<3x32xf32> to vector<1x32xf32>
      %751 = vector.shape_cast %750 : vector<1x32xf32> to vector<32xf32>
      %752 = vector.shape_cast %751 : vector<32xf32> to vector<1x1x32xf32>
      %753 = vector.broadcast %752 : vector<1x1x32xf32> to vector<2x16x32xf32>
      %754 = arith.mulf %746, %753 : vector<2x16x32xf32>
      %cst_349 = arith.constant dense<0.000000e+00> : vector<2x16xf32>
      %755 = vector.multi_reduction <add>, %754, %cst_349 [2] : vector<2x16x32xf32> to vector<2x16xf32>
      %756 = vector.extract_strided_slice %749 {offsets = [1, 0], sizes = [1, 32], strides = [1, 1]} : vector<3x32xf32> to vector<1x32xf32>
      %757 = vector.shape_cast %756 : vector<1x32xf32> to vector<32xf32>
      %758 = vector.shape_cast %757 : vector<32xf32> to vector<1x1x32xf32>
      %759 = vector.broadcast %758 : vector<1x1x32xf32> to vector<2x16x32xf32>
      %760 = arith.mulf %0, %759 : vector<2x16x32xf32>
      %cst_350 = arith.constant dense<0.000000e+00> : vector<2x16xf32>
      %761 = vector.multi_reduction <add>, %760, %cst_350 [2] : vector<2x16x32xf32> to vector<2x16xf32>
      %762 = arith.addf %755, %761 : vector<2x16xf32>
      %763 = vector.extract_strided_slice %749 {offsets = [2, 0], sizes = [1, 32], strides = [1, 1]} : vector<3x32xf32> to vector<1x32xf32>
      %764 = vector.shape_cast %763 : vector<1x32xf32> to vector<32xf32>
      %765 = vector.shape_cast %764 : vector<32xf32> to vector<1x1x32xf32>
      %766 = vector.broadcast %765 : vector<1x1x32xf32> to vector<2x16x32xf32>
      %767 = arith.mulf %748, %766 : vector<2x16x32xf32>
      %cst_351 = arith.constant dense<0.000000e+00> : vector<2x16xf32>
      %768 = vector.multi_reduction <add>, %767, %cst_351 [2] : vector<2x16x32xf32> to vector<2x16xf32>
      %769 = arith.addf %762, %768 : vector<2x16xf32>
      %c0_352 = arith.constant 0 : index
      %c0_353 = arith.constant 0 : index
      %770 = memref.load %arg3[%c0_352, %c0_353] : memref<1x1xf32, #tpu.memory_space<smem>>
      %771 = vector.broadcast %770 : f32 to vector<2x16xf32>
      %772 = arith.addf %769, %771 : vector<2x16xf32>
      %cst_354 = arith.constant 0.000000e+00 : f32
      %773 = vector.broadcast %cst_354 : f32 to vector<2x16xf32>
      %774 = arith.subf %773, %772 : vector<2x16xf32>
      %775 = math.exp %774 : vector<2x16xf32>
      %cst_355 = arith.constant 1.000000e+00 : f32
      %776 = vector.broadcast %cst_355 : f32 to vector<2x16xf32>
      %777 = arith.addf %776, %775 : vector<2x16xf32>
      %cst_356 = arith.constant 1.000000e+00 : f32
      %778 = vector.broadcast %cst_356 : f32 to vector<2x16xf32>
      %779 = arith.divf %778, %777 : vector<2x16xf32>
      %780 = arith.addf %746, %0 : vector<2x16x32xf32>
      %781 = arith.addf %780, %748 : vector<2x16x32xf32>
      %cst_357 = arith.constant 0.333333343 : f32
      %782 = vector.broadcast %cst_357 : f32 to vector<2x16x32xf32>
      %783 = arith.mulf %781, %782 : vector<2x16x32xf32>
      %784 = vector.shape_cast %783 : vector<2x16x32xf32> to vector<32x32xf32>
      %c0_358 = arith.constant 0 : index
      %c0_359 = arith.constant 0 : index
      %785 = vector.load %arg4[%c0_358, %c0_359] : memref<32x32xf32, #tpu.memory_space<vmem>>, vector<32x32xf32>
      %cst_360 = arith.constant dense<0.000000e+00> : vector<32x32xf32>
      %786 = tpu.matmul %784, %785, %cst_360 {dimension_numbers = #tpu.dot_dimension_numbers<[1], [0], [0], [1], [0, 0, 1, 1], [], []>} : vector<32x32xf32>, vector<32x32xf32>, vector<32x32xf32> -> vector<32x32xf32>
      %c0_361 = arith.constant 0 : index
      %c0_362 = arith.constant 0 : index
      %787 = vector.load %arg5[%c0_361, %c0_362] : memref<1x32xf32, #tpu.memory_space<vmem>>, vector<1x32xf32>
      %788 = vector.broadcast %787 : vector<1x32xf32> to vector<32x32xf32>
      %789 = arith.addf %786, %788 : vector<32x32xf32>
      %cst_363 = arith.constant 0.000000e+00 : f32
      %790 = vector.broadcast %cst_363 : f32 to vector<32x32xf32>
      %791 = arith.subf %790, %789 : vector<32x32xf32>
      %792 = math.exp %791 : vector<32x32xf32>
      %cst_364 = arith.constant 1.000000e+00 : f32
      %793 = vector.broadcast %cst_364 : f32 to vector<32x32xf32>
      %794 = arith.addf %793, %792 : vector<32x32xf32>
      %cst_365 = arith.constant 1.000000e+00 : f32
      %795 = vector.broadcast %cst_365 : f32 to vector<32x32xf32>
      %796 = arith.divf %795, %794 : vector<32x32xf32>
      %797 = vector.shape_cast %796 : vector<32x32xf32> to vector<2x16x32xf32>
      %798 = vector.shape_cast %779 : vector<2x16xf32> to vector<2x16x1xf32>
      %799 = vector.broadcast %798 : vector<2x16x1xf32> to vector<2x16x32xf32>
      %800 = arith.mulf %0, %799 : vector<2x16x32xf32>
      %801 = arith.mulf %800, %797 : vector<2x16x32xf32>
      %c0_366 = arith.constant 0 : index
      %c0_367 = arith.constant 0 : index
      %c0_368 = arith.constant 0 : index
      %802 = vector.load %arg21[%c0_366, %c0_367, %c0_368] : memref<2x16x32xf32, #tpu.memory_space<vmem>>, vector<2x16x32xf32>
      tpu.vector_store %arg21[%c0_366, %c0_367, %c0_368], %801 {strides = array<i32>} : memref<2x16x32xf32, #tpu.memory_space<vmem>>, vector<2x16x32xf32>,
    } else {
    }
    %c0_i32_3 = arith.constant 0 : i32
    %4 = arith.cmpi ne, %arg0, %c0_i32_3 : i32
    %5 = arith.extui %4 : i1 to i32
    %c0_i32_4 = arith.constant 0 : i32
    %6 = arith.cmpi ne, %5, %c0_i32_4 : i32
    scf.if %6 {
      %744 = tpu.iota {dimensions = array<i32: 2>} : vector<2x16x32xi32>
      %c24_i32 = arith.constant 24 : i32
      %745 = vector.broadcast %c24_i32 : i32 to vector<2x16x32xi32>
      %746 = arith.cmpi slt, %744, %745 : vector<2x16x32xi32>
      %cst_346 = arith.constant 0.000000e+00 : f32
      %747 = vector.broadcast %cst_346 : f32 to vector<2x16x32xf32>
      %748 = arith.select %746, %0, %747 : vector<2x16x32xi1>, vector<2x16x32xf32>
      %c0_347 = arith.constant 0 : index
      %c0_348 = arith.constant 0 : index
      %c0_349 = arith.constant 0 : index
      %749 = vector.load %arg21[%c0_347, %c0_348, %c0_349] : memref<2x16x32xf32, #tpu.memory_space<vmem>>, vector<2x16x32xf32>
      tpu.vector_store %arg21[%c0_347, %c0_348, %c0_349], %748 {strides = array<i32>} : memref<2x16x32xf32, #tpu.memory_space<vmem>>, vector<2x16x32xf32>,
    } else {
    }
    %c0_5 = arith.constant 0 : index
    %c0_6 = arith.constant 0 : index
    %c0_7 = arith.constant 0 : index
    %7 = vector.load %arg21[%c0_5, %c0_6, %c0_7] : memref<2x16x32xf32, #tpu.memory_space<vmem>>, vector<2x16x32xf32>
    %c0_8 = arith.constant 0 : index
    %c0_9 = arith.constant 0 : index
    %8 = vector.load %arg6[%c0_8, %c0_9] : memref<16x32xf32, #tpu.memory_space<vmem>>, vector<16x32xf32>
    %9 = vector.extract_strided_slice %7 {offsets = [0, 0, 0], sizes = [2, 8, 32], strides = [1, 1, 1]} : vector<2x16x32xf32> to vector<2x8x32xf32>
    %10 = vector.shape_cast %9 : vector<2x8x32xf32> to vector<16x32xf32>
    %c0_10 = arith.constant 0 : index
    %c0_11 = arith.constant 0 : index
    %c0_12 = arith.constant 0 : index
    %c0_13 = arith.constant 0 : index
    %11 = vector.load %arg7[%c0_10, %c0_11, %c0_12, %c0_13] : memref<1x2x32x32xf32, #tpu.memory_space<vmem>>, vector<1x1x32x32xf32>
    %12 = vector.shape_cast %11 : vector<1x1x32x32xf32> to vector<32x32xf32>
    %c0_14 = arith.constant 0 : index
    %c0_15 = arith.constant 0 : index
    %c0_16 = arith.constant 0 : index
    %13 = vector.load %arg8[%c0_14, %c0_15, %c0_16] : memref<1x2x32xf32, #tpu.memory_space<vmem>>, vector<1x1x32xf32>
    %14 = vector.shape_cast %13 : vector<1x1x32xf32> to vector<32xf32>
    %cst = arith.constant dense<0.000000e+00> : vector<16x32xf32>
    %15 = tpu.matmul %10, %12, %cst {dimension_numbers = #tpu.dot_dimension_numbers<[1], [0], [0], [1], [0, 0, 1, 1], [], []>} : vector<16x32xf32>, vector<32x32xf32>, vector<16x32xf32> -> vector<16x32xf32>
    %16 = vector.shape_cast %14 : vector<32xf32> to vector<1x32xf32>
    %17 = vector.broadcast %16 : vector<1x32xf32> to vector<16x32xf32>
    %18 = arith.addf %15, %17 : vector<16x32xf32>
    %cst_17 = arith.constant 0.000000e+00 : f32
    %19 = vector.broadcast %cst_17 : f32 to vector<16x32xf32>
    %20 = arith.maximumf %18, %19 : vector<16x32xf32>
    %21 = vector.shape_cast %20 : vector<16x32xf32> to vector<2x8x32xf32>
    %22 = vector.extract_strided_slice %8 {offsets = [0, 0], sizes = [8, 32], strides = [1, 1]} : vector<16x32xf32> to vector<8x32xf32>
    %23 = vector.shape_cast %22 : vector<8x32xf32> to vector<1x8x32xf32>
    %24 = vector.broadcast %23 : vector<1x8x32xf32> to vector<2x8x32xf32>
    %25 = arith.addf %21, %24 : vector<2x8x32xf32>
    %c0_18 = arith.constant 0 : index
    %c0_19 = arith.constant 0 : index
    %c0_20 = arith.constant 0 : index
    %26 = vector.load %arg9[%c0_18, %c0_19, %c0_20] : memref<1x8x32xf32, #tpu.memory_space<vmem>>, vector<1x8x32xf32>
    %27 = vector.shape_cast %26 : vector<1x8x32xf32> to vector<8x32xf32>
    %28 = vector.shape_cast %27 : vector<8x32xf32> to vector<1x8x32xf32>
    %29 = vector.shape_cast %28 : vector<1x8x32xf32> to vector<1x8x32xf32>
    %30 = vector.broadcast %29 : vector<1x8x32xf32> to vector<2x8x32xf32>
    %31 = vector.shape_cast %30 : vector<2x8x32xf32> to vector<16x32xf32>
    %c0_21 = arith.constant 0 : index
    %c0_22 = arith.constant 0 : index
    %c0_23 = arith.constant 0 : index
    %c0_24 = arith.constant 0 : index
    %32 = vector.load %arg10[%c0_21, %c0_22, %c0_23, %c0_24] : memref<1x16x32x32xf32, #tpu.memory_space<vmem>>, vector<1x1x32x32xf32>
    %33 = vector.shape_cast %32 : vector<1x1x32x32xf32> to vector<32x32xf32>
    %c0_25 = arith.constant 0 : index
    %c0_26 = arith.constant 0 : index
    %c0_27 = arith.constant 0 : index
    %34 = vector.load %arg11[%c0_25, %c0_26, %c0_27] : memref<1x16x32xf32, #tpu.memory_space<vmem>>, vector<1x1x32xf32>
    %35 = vector.shape_cast %34 : vector<1x1x32xf32> to vector<32xf32>
    %cst_28 = arith.constant dense<0.000000e+00> : vector<16x32xf32>
    %36 = tpu.matmul %31, %33, %cst_28 {dimension_numbers = #tpu.dot_dimension_numbers<[1], [0], [0], [1], [0, 0, 1, 1], [], []>} : vector<16x32xf32>, vector<32x32xf32>, vector<16x32xf32> -> vector<16x32xf32>
    %37 = vector.shape_cast %35 : vector<32xf32> to vector<1x32xf32>
    %38 = vector.broadcast %37 : vector<1x32xf32> to vector<16x32xf32>
    %39 = arith.addf %36, %38 : vector<16x32xf32>
    %cst_29 = arith.constant 0.353553385 : f32
    %40 = vector.broadcast %cst_29 : f32 to vector<16x32xf32>
    %41 = arith.mulf %39, %40 : vector<16x32xf32>
    %42 = vector.shape_cast %41 : vector<16x32xf32> to vector<2x8x32xf32>
    %43 = vector.shape_cast %30 : vector<2x8x32xf32> to vector<16x32xf32>
    %c0_30 = arith.constant 0 : index
    %c1 = arith.constant 1 : index
    %c0_31 = arith.constant 0 : index
    %c0_32 = arith.constant 0 : index
    %44 = vector.load %arg10[%c0_30, %c1, %c0_31, %c0_32] : memref<1x16x32x32xf32, #tpu.memory_space<vmem>>, vector<1x1x32x32xf32>
    %45 = vector.shape_cast %44 : vector<1x1x32x32xf32> to vector<32x32xf32>
    %c0_33 = arith.constant 0 : index
    %c1_34 = arith.constant 1 : index
    %c0_35 = arith.constant 0 : index
    %46 = vector.load %arg11[%c0_33, %c1_34, %c0_35] : memref<1x16x32xf32, #tpu.memory_space<vmem>>, vector<1x1x32xf32>
    %47 = vector.shape_cast %46 : vector<1x1x32xf32> to vector<32xf32>
    %cst_36 = arith.constant dense<0.000000e+00> : vector<16x32xf32>
    %48 = tpu.matmul %43, %45, %cst_36 {dimension_numbers = #tpu.dot_dimension_numbers<[1], [0], [0], [1], [0, 0, 1, 1], [], []>} : vector<16x32xf32>, vector<32x32xf32>, vector<16x32xf32> -> vector<16x32xf32>
    %49 = vector.shape_cast %47 : vector<32xf32> to vector<1x32xf32>
    %50 = vector.broadcast %49 : vector<1x32xf32> to vector<16x32xf32>
    %51 = arith.addf %48, %50 : vector<16x32xf32>
    %52 = vector.shape_cast %51 : vector<16x32xf32> to vector<2x8x32xf32>
    %53 = vector.shape_cast %30 : vector<2x8x32xf32> to vector<16x32xf32>
    %c0_37 = arith.constant 0 : index
    %c2 = arith.constant 2 : index
    %c0_38 = arith.constant 0 : index
    %c0_39 = arith.constant 0 : index
    %54 = vector.load %arg10[%c0_37, %c2, %c0_38, %c0_39] : memref<1x16x32x32xf32, #tpu.memory_space<vmem>>, vector<1x1x32x32xf32>
    %55 = vector.shape_cast %54 : vector<1x1x32x32xf32> to vector<32x32xf32>
    %c0_40 = arith.constant 0 : index
    %c2_41 = arith.constant 2 : index
    %c0_42 = arith.constant 0 : index
    %56 = vector.load %arg11[%c0_40, %c2_41, %c0_42] : memref<1x16x32xf32, #tpu.memory_space<vmem>>, vector<1x1x32xf32>
    %57 = vector.shape_cast %56 : vector<1x1x32xf32> to vector<32xf32>
    %cst_43 = arith.constant dense<0.000000e+00> : vector<16x32xf32>
    %58 = tpu.matmul %53, %55, %cst_43 {dimension_numbers = #tpu.dot_dimension_numbers<[1], [0], [0], [1], [0, 0, 1, 1], [], []>} : vector<16x32xf32>, vector<32x32xf32>, vector<16x32xf32> -> vector<16x32xf32>
    %59 = vector.shape_cast %57 : vector<32xf32> to vector<1x32xf32>
    %60 = vector.broadcast %59 : vector<1x32xf32> to vector<16x32xf32>
    %61 = arith.addf %58, %60 : vector<16x32xf32>
    %62 = vector.shape_cast %61 : vector<16x32xf32> to vector<2x8x32xf32>
    %63 = vector.extract_strided_slice %42 {offsets = [0, 0, 0], sizes = [2, 8, 8], strides = [1, 1, 1]} : vector<2x8x32xf32> to vector<2x8x8xf32>
    %64 = vector.extract_strided_slice %52 {offsets = [0, 0, 0], sizes = [2, 8, 8], strides = [1, 1, 1]} : vector<2x8x32xf32> to vector<2x8x8xf32>
    "tpu.trace_start"() <{level = 10 : i32, message = "bqd,bkd->bqk"}> : () -> ()
    %cst_44 = arith.constant dense<0.000000e+00> : vector<2x8x8xf32>
    %65 = tpu.matmul %63, %64, %cst_44 {dimension_numbers = #tpu.dot_dimension_numbers<[2], [2], [1], [1], [0, 0, 0, 1, 1, 1], [0], [0]>} : vector<2x8x8xf32>, vector<2x8x8xf32>, vector<2x8x8xf32> -> vector<2x8x8xf32>
    "tpu.trace_stop"() : () -> ()
    %cst_45 = arith.constant dense<0xFF800000> : vector<2x8xf32>
    %66 = vector.multi_reduction <maximumf>, %65, %cst_45 [2] : vector<2x8x8xf32> to vector<2x8xf32>
    %67 = vector.shape_cast %66 : vector<2x8xf32> to vector<2x8x1xf32>
    %68 = vector.broadcast %67 : vector<2x8x1xf32> to vector<2x8x8xf32>
    %69 = arith.subf %65, %68 : vector<2x8x8xf32>
    %70 = math.exp %69 : vector<2x8x8xf32>
    %cst_46 = arith.constant dense<0.000000e+00> : vector<2x8xf32>
    %71 = vector.multi_reduction <add>, %70, %cst_46 [2] : vector<2x8x8xf32> to vector<2x8xf32>
    %72 = vector.shape_cast %71 : vector<2x8xf32> to vector<2x8x1xf32>
    %73 = vector.broadcast %72 : vector<2x8x1xf32> to vector<2x8x8xf32>
    %74 = arith.divf %70, %73 : vector<2x8x8xf32>
    %75 = vector.extract_strided_slice %62 {offsets = [0, 0, 0], sizes = [2, 8, 8], strides = [1, 1, 1]} : vector<2x8x32xf32> to vector<2x8x8xf32>
    "tpu.trace_start"() <{level = 10 : i32, message = "bqk,bkd->bqd"}> : () -> ()
    %cst_47 = arith.constant dense<0.000000e+00> : vector<2x8x8xf32>
    %76 = tpu.matmul %74, %75, %cst_47 {dimension_numbers = #tpu.dot_dimension_numbers<[2], [1], [1], [2], [0, 0, 0, 1, 1, 2], [0], [0]>} : vector<2x8x8xf32>, vector<2x8x8xf32>, vector<2x8x8xf32> -> vector<2x8x8xf32>
    "tpu.trace_stop"() : () -> ()
    %77 = vector.extract_strided_slice %42 {offsets = [0, 0, 8], sizes = [2, 8, 8], strides = [1, 1, 1]} : vector<2x8x32xf32> to vector<2x8x8xf32>
    %78 = vector.extract_strided_slice %52 {offsets = [0, 0, 8], sizes = [2, 8, 8], strides = [1, 1, 1]} : vector<2x8x32xf32> to vector<2x8x8xf32>
    "tpu.trace_start"() <{level = 10 : i32, message = "bqd,bkd->bqk"}> : () -> ()
    %cst_48 = arith.constant dense<0.000000e+00> : vector<2x8x8xf32>
    %79 = tpu.matmul %77, %78, %cst_48 {dimension_numbers = #tpu.dot_dimension_numbers<[2], [2], [1], [1], [0, 0, 0, 1, 1, 1], [0], [0]>} : vector<2x8x8xf32>, vector<2x8x8xf32>, vector<2x8x8xf32> -> vector<2x8x8xf32>
    "tpu.trace_stop"() : () -> ()
    %cst_49 = arith.constant dense<0xFF800000> : vector<2x8xf32>
    %80 = vector.multi_reduction <maximumf>, %79, %cst_49 [2] : vector<2x8x8xf32> to vector<2x8xf32>
    %81 = vector.shape_cast %80 : vector<2x8xf32> to vector<2x8x1xf32>
    %82 = vector.broadcast %81 : vector<2x8x1xf32> to vector<2x8x8xf32>
    %83 = arith.subf %79, %82 : vector<2x8x8xf32>
    %84 = math.exp %83 : vector<2x8x8xf32>
    %cst_50 = arith.constant dense<0.000000e+00> : vector<2x8xf32>
    %85 = vector.multi_reduction <add>, %84, %cst_50 [2] : vector<2x8x8xf32> to vector<2x8xf32>
    %86 = vector.shape_cast %85 : vector<2x8xf32> to vector<2x8x1xf32>
    %87 = vector.broadcast %86 : vector<2x8x1xf32> to vector<2x8x8xf32>
    %88 = arith.divf %84, %87 : vector<2x8x8xf32>
    %89 = vector.extract_strided_slice %62 {offsets = [0, 0, 8], sizes = [2, 8, 8], strides = [1, 1, 1]} : vector<2x8x32xf32> to vector<2x8x8xf32>
    "tpu.trace_start"() <{level = 10 : i32, message = "bqk,bkd->bqd"}> : () -> ()
    %cst_51 = arith.constant dense<0.000000e+00> : vector<2x8x8xf32>
    %90 = tpu.matmul %88, %89, %cst_51 {dimension_numbers = #tpu.dot_dimension_numbers<[2], [1], [1], [2], [0, 0, 0, 1, 1, 2], [0], [0]>} : vector<2x8x8xf32>, vector<2x8x8xf32>, vector<2x8x8xf32> -> vector<2x8x8xf32>
    "tpu.trace_stop"() : () -> ()
    %91 = vector.extract_strided_slice %42 {offsets = [0, 0, 16], sizes = [2, 8, 8], strides = [1, 1, 1]} : vector<2x8x32xf32> to vector<2x8x8xf32>
    %92 = vector.extract_strided_slice %52 {offsets = [0, 0, 16], sizes = [2, 8, 8], strides = [1, 1, 1]} : vector<2x8x32xf32> to vector<2x8x8xf32>
    "tpu.trace_start"() <{level = 10 : i32, message = "bqd,bkd->bqk"}> : () -> ()
    %cst_52 = arith.constant dense<0.000000e+00> : vector<2x8x8xf32>
    %93 = tpu.matmul %91, %92, %cst_52 {dimension_numbers = #tpu.dot_dimension_numbers<[2], [2], [1], [1], [0, 0, 0, 1, 1, 1], [0], [0]>} : vector<2x8x8xf32>, vector<2x8x8xf32>, vector<2x8x8xf32> -> vector<2x8x8xf32>
    "tpu.trace_stop"() : () -> ()
    %cst_53 = arith.constant dense<0xFF800000> : vector<2x8xf32>
    %94 = vector.multi_reduction <maximumf>, %93, %cst_53 [2] : vector<2x8x8xf32> to vector<2x8xf32>
    %95 = vector.shape_cast %94 : vector<2x8xf32> to vector<2x8x1xf32>
    %96 = vector.broadcast %95 : vector<2x8x1xf32> to vector<2x8x8xf32>
    %97 = arith.subf %93, %96 : vector<2x8x8xf32>
    %98 = math.exp %97 : vector<2x8x8xf32>
    %cst_54 = arith.constant dense<0.000000e+00> : vector<2x8xf32>
    %99 = vector.multi_reduction <add>, %98, %cst_54 [2] : vector<2x8x8xf32> to vector<2x8xf32>
    %100 = vector.shape_cast %99 : vector<2x8xf32> to vector<2x8x1xf32>
    %101 = vector.broadcast %100 : vector<2x8x1xf32> to vector<2x8x8xf32>
    %102 = arith.divf %98, %101 : vector<2x8x8xf32>
    %103 = vector.extract_strided_slice %62 {offsets = [0, 0, 16], sizes = [2, 8, 8], strides = [1, 1, 1]} : vector<2x8x32xf32> to vector<2x8x8xf32>
    "tpu.trace_start"() <{level = 10 : i32, message = "bqk,bkd->bqd"}> : () -> ()
    %cst_55 = arith.constant dense<0.000000e+00> : vector<2x8x8xf32>
    %104 = tpu.matmul %102, %103, %cst_55 {dimension_numbers = #tpu.dot_dimension_numbers<[2], [1], [1], [2], [0, 0, 0, 1, 1, 2], [0], [0]>} : vector<2x8x8xf32>, vector<2x8x8xf32>, vector<2x8x8xf32> -> vector<2x8x8xf32>
    "tpu.trace_stop"() : () -> ()
    %105 = vector.extract_strided_slice %42 {offsets = [0, 0, 24], sizes = [2, 8, 8], strides = [1, 1, 1]} : vector<2x8x32xf32> to vector<2x8x8xf32>
    %106 = vector.extract_strided_slice %52 {offsets = [0, 0, 24], sizes = [2, 8, 8], strides = [1, 1, 1]} : vector<2x8x32xf32> to vector<2x8x8xf32>
    "tpu.trace_start"() <{level = 10 : i32, message = "bqd,bkd->bqk"}> : () -> ()
    %cst_56 = arith.constant dense<0.000000e+00> : vector<2x8x8xf32>
    %107 = tpu.matmul %105, %106, %cst_56 {dimension_numbers = #tpu.dot_dimension_numbers<[2], [2], [1], [1], [0, 0, 0, 1, 1, 1], [0], [0]>} : vector<2x8x8xf32>, vector<2x8x8xf32>, vector<2x8x8xf32> -> vector<2x8x8xf32>
    "tpu.trace_stop"() : () -> ()
    %cst_57 = arith.constant dense<0xFF800000> : vector<2x8xf32>
    %108 = vector.multi_reduction <maximumf>, %107, %cst_57 [2] : vector<2x8x8xf32> to vector<2x8xf32>
    %109 = vector.shape_cast %108 : vector<2x8xf32> to vector<2x8x1xf32>
    %110 = vector.broadcast %109 : vector<2x8x1xf32> to vector<2x8x8xf32>
    %111 = arith.subf %107, %110 : vector<2x8x8xf32>
    %112 = math.exp %111 : vector<2x8x8xf32>
    %cst_58 = arith.constant dense<0.000000e+00> : vector<2x8xf32>
    %113 = vector.multi_reduction <add>, %112, %cst_58 [2] : vector<2x8x8xf32> to vector<2x8xf32>
    %114 = vector.shape_cast %113 : vector<2x8xf32> to vector<2x8x1xf32>
    %115 = vector.broadcast %114 : vector<2x8x1xf32> to vector<2x8x8xf32>
    %116 = arith.divf %112, %115 : vector<2x8x8xf32>
    %117 = vector.extract_strided_slice %62 {offsets = [0, 0, 24], sizes = [2, 8, 8], strides = [1, 1, 1]} : vector<2x8x32xf32> to vector<2x8x8xf32>
    "tpu.trace_start"() <{level = 10 : i32, message = "bqk,bkd->bqd"}> : () -> ()
    %cst_59 = arith.constant dense<0.000000e+00> : vector<2x8x8xf32>
    %118 = tpu.matmul %116, %117, %cst_59 {dimension_numbers = #tpu.dot_dimension_numbers<[2], [1], [1], [2], [0, 0, 0, 1, 1, 2], [0], [0]>} : vector<2x8x8xf32>, vector<2x8x8xf32>, vector<2x8x8xf32> -> vector<2x8x8xf32>
    "tpu.trace_stop"() : () -> ()
    %119 = tpu.concatenate %76, %90, %104, %118 in 2 : vector<2x8x8xf32>, vector<2x8x8xf32>, vector<2x8x8xf32>, vector<2x8x8xf32> -> vector<2x8x32xf32>
    %120 = vector.shape_cast %119 : vector<2x8x32xf32> to vector<16x32xf32>
    %c0_60 = arith.constant 0 : index
    %c3 = arith.constant 3 : index
    %c0_61 = arith.constant 0 : index
    %c0_62 = arith.constant 0 : index
    %121 = vector.load %arg10[%c0_60, %c3, %c0_61, %c0_62] : memref<1x16x32x32xf32, #tpu.memory_space<vmem>>, vector<1x1x32x32xf32>
    %122 = vector.shape_cast %121 : vector<1x1x32x32xf32> to vector<32x32xf32>
    %c0_63 = arith.constant 0 : index
    %c3_64 = arith.constant 3 : index
    %c0_65 = arith.constant 0 : index
    %123 = vector.load %arg11[%c0_63, %c3_64, %c0_65] : memref<1x16x32xf32, #tpu.memory_space<vmem>>, vector<1x1x32xf32>
    %124 = vector.shape_cast %123 : vector<1x1x32xf32> to vector<32xf32>
    %cst_66 = arith.constant dense<0.000000e+00> : vector<16x32xf32>
    %125 = tpu.matmul %120, %122, %cst_66 {dimension_numbers = #tpu.dot_dimension_numbers<[1], [0], [0], [1], [0, 0, 1, 1], [], []>} : vector<16x32xf32>, vector<32x32xf32>, vector<16x32xf32> -> vector<16x32xf32>
    %126 = vector.shape_cast %124 : vector<32xf32> to vector<1x32xf32>
    %127 = vector.broadcast %126 : vector<1x32xf32> to vector<16x32xf32>
    %128 = arith.addf %125, %127 : vector<16x32xf32>
    %129 = vector.shape_cast %128 : vector<16x32xf32> to vector<2x8x32xf32>
    %130 = arith.addf %30, %129 : vector<2x8x32xf32>
    %cst_67 = arith.constant dense<0.000000e+00> : vector<2x8xf32>
    %131 = vector.multi_reduction <add>, %130, %cst_67 [2] : vector<2x8x32xf32> to vector<2x8xf32>
    %132 = vector.shape_cast %131 : vector<2x8xf32> to vector<2x8x1xf32>
    %cst_68 = arith.constant 3.200000e+01 : f32
    %133 = vector.broadcast %cst_68 : f32 to vector<2x8x1xf32>
    %134 = arith.divf %132, %133 : vector<2x8x1xf32>
    %135 = vector.broadcast %134 : vector<2x8x1xf32> to vector<2x8x32xf32>
    %136 = arith.subf %130, %135 : vector<2x8x32xf32>
    %137 = arith.mulf %136, %136 : vector<2x8x32xf32>
    %cst_69 = arith.constant dense<0.000000e+00> : vector<2x8xf32>
    %138 = vector.multi_reduction <add>, %137, %cst_69 [2] : vector<2x8x32xf32> to vector<2x8xf32>
    %139 = vector.shape_cast %138 : vector<2x8xf32> to vector<2x8x1xf32>
    %cst_70 = arith.constant 3.200000e+01 : f32
    %140 = vector.broadcast %cst_70 : f32 to vector<2x8x1xf32>
    %141 = arith.divf %139, %140 : vector<2x8x1xf32>
    %142 = vector.broadcast %134 : vector<2x8x1xf32> to vector<2x8x32xf32>
    %143 = arith.subf %130, %142 : vector<2x8x32xf32>
    %cst_71 = arith.constant 9.99999974E-6 : f32
    %144 = vector.broadcast %cst_71 : f32 to vector<2x8x1xf32>
    %145 = arith.addf %141, %144 : vector<2x8x1xf32>
    %146 = math.rsqrt %145 : vector<2x8x1xf32>
    %147 = vector.broadcast %146 : vector<2x8x1xf32> to vector<2x8x32xf32>
    %148 = arith.mulf %143, %147 : vector<2x8x32xf32>
    %c0_72 = arith.constant 0 : index
    %c0_73 = arith.constant 0 : index
    %c0_74 = arith.constant 0 : index
    %149 = vector.load %arg16[%c0_72, %c0_73, %c0_74] : memref<1x8x32xf32, #tpu.memory_space<vmem>>, vector<1x1x32xf32>
    %150 = vector.shape_cast %149 : vector<1x1x32xf32> to vector<32xf32>
    %151 = vector.shape_cast %150 : vector<32xf32> to vector<1x1x32xf32>
    %152 = vector.broadcast %151 : vector<1x1x32xf32> to vector<2x8x32xf32>
    %153 = arith.mulf %148, %152 : vector<2x8x32xf32>
    %c0_75 = arith.constant 0 : index
    %c0_76 = arith.constant 0 : index
    %c0_77 = arith.constant 0 : index
    %154 = vector.load %arg17[%c0_75, %c0_76, %c0_77] : memref<1x8x32xf32, #tpu.memory_space<vmem>>, vector<1x1x32xf32>
    %155 = vector.shape_cast %154 : vector<1x1x32xf32> to vector<32xf32>
    %156 = vector.shape_cast %155 : vector<32xf32> to vector<1x1x32xf32>
    %157 = vector.broadcast %156 : vector<1x1x32xf32> to vector<2x8x32xf32>
    %158 = arith.addf %153, %157 : vector<2x8x32xf32>
    %159 = vector.shape_cast %158 : vector<2x8x32xf32> to vector<16x32xf32>
    %c0_78 = arith.constant 0 : index
    %c4 = arith.constant 4 : index
    %c0_79 = arith.constant 0 : index
    %c0_80 = arith.constant 0 : index
    %160 = vector.load %arg10[%c0_78, %c4, %c0_79, %c0_80] : memref<1x16x32x32xf32, #tpu.memory_space<vmem>>, vector<1x1x32x32xf32>
    %161 = vector.shape_cast %160 : vector<1x1x32x32xf32> to vector<32x32xf32>
    %c0_81 = arith.constant 0 : index
    %c4_82 = arith.constant 4 : index
    %c0_83 = arith.constant 0 : index
    %162 = vector.load %arg11[%c0_81, %c4_82, %c0_83] : memref<1x16x32xf32, #tpu.memory_space<vmem>>, vector<1x1x32xf32>
    %163 = vector.shape_cast %162 : vector<1x1x32xf32> to vector<32xf32>
    %cst_84 = arith.constant dense<0.000000e+00> : vector<16x32xf32>
    %164 = tpu.matmul %159, %161, %cst_84 {dimension_numbers = #tpu.dot_dimension_numbers<[1], [0], [0], [1], [0, 0, 1, 1], [], []>} : vector<16x32xf32>, vector<32x32xf32>, vector<16x32xf32> -> vector<16x32xf32>
    %165 = vector.shape_cast %163 : vector<32xf32> to vector<1x32xf32>
    %166 = vector.broadcast %165 : vector<1x32xf32> to vector<16x32xf32>
    %167 = arith.addf %164, %166 : vector<16x32xf32>
    %cst_85 = arith.constant 0.353553385 : f32
    %168 = vector.broadcast %cst_85 : f32 to vector<16x32xf32>
    %169 = arith.mulf %167, %168 : vector<16x32xf32>
    %170 = vector.shape_cast %169 : vector<16x32xf32> to vector<2x8x32xf32>
    %171 = vector.shape_cast %25 : vector<2x8x32xf32> to vector<16x32xf32>
    %c0_86 = arith.constant 0 : index
    %c5 = arith.constant 5 : index
    %c0_87 = arith.constant 0 : index
    %c0_88 = arith.constant 0 : index
    %172 = vector.load %arg10[%c0_86, %c5, %c0_87, %c0_88] : memref<1x16x32x32xf32, #tpu.memory_space<vmem>>, vector<1x1x32x32xf32>
    %173 = vector.shape_cast %172 : vector<1x1x32x32xf32> to vector<32x32xf32>
    %c0_89 = arith.constant 0 : index
    %c5_90 = arith.constant 5 : index
    %c0_91 = arith.constant 0 : index
    %174 = vector.load %arg11[%c0_89, %c5_90, %c0_91] : memref<1x16x32xf32, #tpu.memory_space<vmem>>, vector<1x1x32xf32>
    %175 = vector.shape_cast %174 : vector<1x1x32xf32> to vector<32xf32>
    %cst_92 = arith.constant dense<0.000000e+00> : vector<16x32xf32>
    %176 = tpu.matmul %171, %173, %cst_92 {dimension_numbers = #tpu.dot_dimension_numbers<[1], [0], [0], [1], [0, 0, 1, 1], [], []>} : vector<16x32xf32>, vector<32x32xf32>, vector<16x32xf32> -> vector<16x32xf32>
    %177 = vector.shape_cast %175 : vector<32xf32> to vector<1x32xf32>
    %178 = vector.broadcast %177 : vector<1x32xf32> to vector<16x32xf32>
    %179 = arith.addf %176, %178 : vector<16x32xf32>
    %180 = vector.shape_cast %179 : vector<16x32xf32> to vector<2x8x32xf32>
    %181 = vector.shape_cast %25 : vector<2x8x32xf32> to vector<16x32xf32>
    %c0_93 = arith.constant 0 : index
    %c6 = arith.constant 6 : index
    %c0_94 = arith.constant 0 : index
    %c0_95 = arith.constant 0 : index
    %182 = vector.load %arg10[%c0_93, %c6, %c0_94, %c0_95] : memref<1x16x32x32xf32, #tpu.memory_space<vmem>>, vector<1x1x32x32xf32>
    %183 = vector.shape_cast %182 : vector<1x1x32x32xf32> to vector<32x32xf32>
    %c0_96 = arith.constant 0 : index
    %c6_97 = arith.constant 6 : index
    %c0_98 = arith.constant 0 : index
    %184 = vector.load %arg11[%c0_96, %c6_97, %c0_98] : memref<1x16x32xf32, #tpu.memory_space<vmem>>, vector<1x1x32xf32>
    %185 = vector.shape_cast %184 : vector<1x1x32xf32> to vector<32xf32>
    %cst_99 = arith.constant dense<0.000000e+00> : vector<16x32xf32>
    %186 = tpu.matmul %181, %183, %cst_99 {dimension_numbers = #tpu.dot_dimension_numbers<[1], [0], [0], [1], [0, 0, 1, 1], [], []>} : vector<16x32xf32>, vector<32x32xf32>, vector<16x32xf32> -> vector<16x32xf32>
    %187 = vector.shape_cast %185 : vector<32xf32> to vector<1x32xf32>
    %188 = vector.broadcast %187 : vector<1x32xf32> to vector<16x32xf32>
    %189 = arith.addf %186, %188 : vector<16x32xf32>
    %190 = vector.shape_cast %189 : vector<16x32xf32> to vector<2x8x32xf32>
    %191 = vector.extract_strided_slice %170 {offsets = [0, 0, 0], sizes = [2, 8, 8], strides = [1, 1, 1]} : vector<2x8x32xf32> to vector<2x8x8xf32>
    %192 = vector.extract_strided_slice %180 {offsets = [0, 0, 0], sizes = [2, 8, 8], strides = [1, 1, 1]} : vector<2x8x32xf32> to vector<2x8x8xf32>
    "tpu.trace_start"() <{level = 10 : i32, message = "bqd,bkd->bqk"}> : () -> ()
    %cst_100 = arith.constant dense<0.000000e+00> : vector<2x8x8xf32>
    %193 = tpu.matmul %191, %192, %cst_100 {dimension_numbers = #tpu.dot_dimension_numbers<[2], [2], [1], [1], [0, 0, 0, 1, 1, 1], [0], [0]>} : vector<2x8x8xf32>, vector<2x8x8xf32>, vector<2x8x8xf32> -> vector<2x8x8xf32>
    "tpu.trace_stop"() : () -> ()
    %cst_101 = arith.constant dense<0xFF800000> : vector<2x8xf32>
    %194 = vector.multi_reduction <maximumf>, %193, %cst_101 [2] : vector<2x8x8xf32> to vector<2x8xf32>
    %195 = vector.shape_cast %194 : vector<2x8xf32> to vector<2x8x1xf32>
    %196 = vector.broadcast %195 : vector<2x8x1xf32> to vector<2x8x8xf32>
    %197 = arith.subf %193, %196 : vector<2x8x8xf32>
    %198 = math.exp %197 : vector<2x8x8xf32>
    %cst_102 = arith.constant dense<0.000000e+00> : vector<2x8xf32>
    %199 = vector.multi_reduction <add>, %198, %cst_102 [2] : vector<2x8x8xf32> to vector<2x8xf32>
    %200 = vector.shape_cast %199 : vector<2x8xf32> to vector<2x8x1xf32>
    %201 = vector.broadcast %200 : vector<2x8x1xf32> to vector<2x8x8xf32>
    %202 = arith.divf %198, %201 : vector<2x8x8xf32>
    %203 = vector.extract_strided_slice %190 {offsets = [0, 0, 0], sizes = [2, 8, 8], strides = [1, 1, 1]} : vector<2x8x32xf32> to vector<2x8x8xf32>
    "tpu.trace_start"() <{level = 10 : i32, message = "bqk,bkd->bqd"}> : () -> ()
    %cst_103 = arith.constant dense<0.000000e+00> : vector<2x8x8xf32>
    %204 = tpu.matmul %202, %203, %cst_103 {dimension_numbers = #tpu.dot_dimension_numbers<[2], [1], [1], [2], [0, 0, 0, 1, 1, 2], [0], [0]>} : vector<2x8x8xf32>, vector<2x8x8xf32>, vector<2x8x8xf32> -> vector<2x8x8xf32>
    "tpu.trace_stop"() : () -> ()
    %205 = vector.extract_strided_slice %170 {offsets = [0, 0, 8], sizes = [2, 8, 8], strides = [1, 1, 1]} : vector<2x8x32xf32> to vector<2x8x8xf32>
    %206 = vector.extract_strided_slice %180 {offsets = [0, 0, 8], sizes = [2, 8, 8], strides = [1, 1, 1]} : vector<2x8x32xf32> to vector<2x8x8xf32>
    "tpu.trace_start"() <{level = 10 : i32, message = "bqd,bkd->bqk"}> : () -> ()
    %cst_104 = arith.constant dense<0.000000e+00> : vector<2x8x8xf32>
    %207 = tpu.matmul %205, %206, %cst_104 {dimension_numbers = #tpu.dot_dimension_numbers<[2], [2], [1], [1], [0, 0, 0, 1, 1, 1], [0], [0]>} : vector<2x8x8xf32>, vector<2x8x8xf32>, vector<2x8x8xf32> -> vector<2x8x8xf32>
    "tpu.trace_stop"() : () -> ()
    %cst_105 = arith.constant dense<0xFF800000> : vector<2x8xf32>
    %208 = vector.multi_reduction <maximumf>, %207, %cst_105 [2] : vector<2x8x8xf32> to vector<2x8xf32>
    %209 = vector.shape_cast %208 : vector<2x8xf32> to vector<2x8x1xf32>
    %210 = vector.broadcast %209 : vector<2x8x1xf32> to vector<2x8x8xf32>
    %211 = arith.subf %207, %210 : vector<2x8x8xf32>
    %212 = math.exp %211 : vector<2x8x8xf32>
    %cst_106 = arith.constant dense<0.000000e+00> : vector<2x8xf32>
    %213 = vector.multi_reduction <add>, %212, %cst_106 [2] : vector<2x8x8xf32> to vector<2x8xf32>
    %214 = vector.shape_cast %213 : vector<2x8xf32> to vector<2x8x1xf32>
    %215 = vector.broadcast %214 : vector<2x8x1xf32> to vector<2x8x8xf32>
    %216 = arith.divf %212, %215 : vector<2x8x8xf32>
    %217 = vector.extract_strided_slice %190 {offsets = [0, 0, 8], sizes = [2, 8, 8], strides = [1, 1, 1]} : vector<2x8x32xf32> to vector<2x8x8xf32>
    "tpu.trace_start"() <{level = 10 : i32, message = "bqk,bkd->bqd"}> : () -> ()
    %cst_107 = arith.constant dense<0.000000e+00> : vector<2x8x8xf32>
    %218 = tpu.matmul %216, %217, %cst_107 {dimension_numbers = #tpu.dot_dimension_numbers<[2], [1], [1], [2], [0, 0, 0, 1, 1, 2], [0], [0]>} : vector<2x8x8xf32>, vector<2x8x8xf32>, vector<2x8x8xf32> -> vector<2x8x8xf32>
    "tpu.trace_stop"() : () -> ()
    %219 = vector.extract_strided_slice %170 {offsets = [0, 0, 16], sizes = [2, 8, 8], strides = [1, 1, 1]} : vector<2x8x32xf32> to vector<2x8x8xf32>
    %220 = vector.extract_strided_slice %180 {offsets = [0, 0, 16], sizes = [2, 8, 8], strides = [1, 1, 1]} : vector<2x8x32xf32> to vector<2x8x8xf32>
    "tpu.trace_start"() <{level = 10 : i32, message = "bqd,bkd->bqk"}> : () -> ()
    %cst_108 = arith.constant dense<0.000000e+00> : vector<2x8x8xf32>
    %221 = tpu.matmul %219, %220, %cst_108 {dimension_numbers = #tpu.dot_dimension_numbers<[2], [2], [1], [1], [0, 0, 0, 1, 1, 1], [0], [0]>} : vector<2x8x8xf32>, vector<2x8x8xf32>, vector<2x8x8xf32> -> vector<2x8x8xf32>
    "tpu.trace_stop"() : () -> ()
    %cst_109 = arith.constant dense<0xFF800000> : vector<2x8xf32>
    %222 = vector.multi_reduction <maximumf>, %221, %cst_109 [2] : vector<2x8x8xf32> to vector<2x8xf32>
    %223 = vector.shape_cast %222 : vector<2x8xf32> to vector<2x8x1xf32>
    %224 = vector.broadcast %223 : vector<2x8x1xf32> to vector<2x8x8xf32>
    %225 = arith.subf %221, %224 : vector<2x8x8xf32>
    %226 = math.exp %225 : vector<2x8x8xf32>
    %cst_110 = arith.constant dense<0.000000e+00> : vector<2x8xf32>
    %227 = vector.multi_reduction <add>, %226, %cst_110 [2] : vector<2x8x8xf32> to vector<2x8xf32>
    %228 = vector.shape_cast %227 : vector<2x8xf32> to vector<2x8x1xf32>
    %229 = vector.broadcast %228 : vector<2x8x1xf32> to vector<2x8x8xf32>
    %230 = arith.divf %226, %229 : vector<2x8x8xf32>
    %231 = vector.extract_strided_slice %190 {offsets = [0, 0, 16], sizes = [2, 8, 8], strides = [1, 1, 1]} : vector<2x8x32xf32> to vector<2x8x8xf32>
    "tpu.trace_start"() <{level = 10 : i32, message = "bqk,bkd->bqd"}> : () -> ()
    %cst_111 = arith.constant dense<0.000000e+00> : vector<2x8x8xf32>
    %232 = tpu.matmul %230, %231, %cst_111 {dimension_numbers = #tpu.dot_dimension_numbers<[2], [1], [1], [2], [0, 0, 0, 1, 1, 2], [0], [0]>} : vector<2x8x8xf32>, vector<2x8x8xf32>, vector<2x8x8xf32> -> vector<2x8x8xf32>
    "tpu.trace_stop"() : () -> ()
    %233 = vector.extract_strided_slice %170 {offsets = [0, 0, 24], sizes = [2, 8, 8], strides = [1, 1, 1]} : vector<2x8x32xf32> to vector<2x8x8xf32>
    %234 = vector.extract_strided_slice %180 {offsets = [0, 0, 24], sizes = [2, 8, 8], strides = [1, 1, 1]} : vector<2x8x32xf32> to vector<2x8x8xf32>
    "tpu.trace_start"() <{level = 10 : i32, message = "bqd,bkd->bqk"}> : () -> ()
    %cst_112 = arith.constant dense<0.000000e+00> : vector<2x8x8xf32>
    %235 = tpu.matmul %233, %234, %cst_112 {dimension_numbers = #tpu.dot_dimension_numbers<[2], [2], [1], [1], [0, 0, 0, 1, 1, 1], [0], [0]>} : vector<2x8x8xf32>, vector<2x8x8xf32>, vector<2x8x8xf32> -> vector<2x8x8xf32>
    "tpu.trace_stop"() : () -> ()
    %cst_113 = arith.constant dense<0xFF800000> : vector<2x8xf32>
    %236 = vector.multi_reduction <maximumf>, %235, %cst_113 [2] : vector<2x8x8xf32> to vector<2x8xf32>
    %237 = vector.shape_cast %236 : vector<2x8xf32> to vector<2x8x1xf32>
    %238 = vector.broadcast %237 : vector<2x8x1xf32> to vector<2x8x8xf32>
    %239 = arith.subf %235, %238 : vector<2x8x8xf32>
    %240 = math.exp %239 : vector<2x8x8xf32>
    %cst_114 = arith.constant dense<0.000000e+00> : vector<2x8xf32>
    %241 = vector.multi_reduction <add>, %240, %cst_114 [2] : vector<2x8x8xf32> to vector<2x8xf32>
    %242 = vector.shape_cast %241 : vector<2x8xf32> to vector<2x8x1xf32>
    %243 = vector.broadcast %242 : vector<2x8x1xf32> to vector<2x8x8xf32>
    %244 = arith.divf %240, %243 : vector<2x8x8xf32>
    %245 = vector.extract_strided_slice %190 {offsets = [0, 0, 24], sizes = [2, 8, 8], strides = [1, 1, 1]} : vector<2x8x32xf32> to vector<2x8x8xf32>
    "tpu.trace_start"() <{level = 10 : i32, message = "bqk,bkd->bqd"}> : () -> ()
    %cst_115 = arith.constant dense<0.000000e+00> : vector<2x8x8xf32>
    %246 = tpu.matmul %244, %245, %cst_115 {dimension_numbers = #tpu.dot_dimension_numbers<[2], [1], [1], [2], [0, 0, 0, 1, 1, 2], [0], [0]>} : vector<2x8x8xf32>, vector<2x8x8xf32>, vector<2x8x8xf32> -> vector<2x8x8xf32>
    "tpu.trace_stop"() : () -> ()
    %247 = tpu.concatenate %204, %218, %232, %246 in 2 : vector<2x8x8xf32>, vector<2x8x8xf32>, vector<2x8x8xf32>, vector<2x8x8xf32> -> vector<2x8x32xf32>
    %248 = vector.shape_cast %247 : vector<2x8x32xf32> to vector<16x32xf32>
    %c0_116 = arith.constant 0 : index
    %c7 = arith.constant 7 : index
    %c0_117 = arith.constant 0 : index
    %c0_118 = arith.constant 0 : index
    %249 = vector.load %arg10[%c0_116, %c7, %c0_117, %c0_118] : memref<1x16x32x32xf32, #tpu.memory_space<vmem>>, vector<1x1x32x32xf32>
    %250 = vector.shape_cast %249 : vector<1x1x32x32xf32> to vector<32x32xf32>
    %c0_119 = arith.constant 0 : index
    %c7_120 = arith.constant 7 : index
    %c0_121 = arith.constant 0 : index
    %251 = vector.load %arg11[%c0_119, %c7_120, %c0_121] : memref<1x16x32xf32, #tpu.memory_space<vmem>>, vector<1x1x32xf32>
    %252 = vector.shape_cast %251 : vector<1x1x32xf32> to vector<32xf32>
    %cst_122 = arith.constant dense<0.000000e+00> : vector<16x32xf32>
    %253 = tpu.matmul %248, %250, %cst_122 {dimension_numbers = #tpu.dot_dimension_numbers<[1], [0], [0], [1], [0, 0, 1, 1], [], []>} : vector<16x32xf32>, vector<32x32xf32>, vector<16x32xf32> -> vector<16x32xf32>
    %254 = vector.shape_cast %252 : vector<32xf32> to vector<1x32xf32>
    %255 = vector.broadcast %254 : vector<1x32xf32> to vector<16x32xf32>
    %256 = arith.addf %253, %255 : vector<16x32xf32>
    %257 = vector.shape_cast %256 : vector<16x32xf32> to vector<2x8x32xf32>
    %258 = arith.addf %158, %257 : vector<2x8x32xf32>
    %cst_123 = arith.constant dense<0.000000e+00> : vector<2x8xf32>
    %259 = vector.multi_reduction <add>, %258, %cst_123 [2] : vector<2x8x32xf32> to vector<2x8xf32>
    %260 = vector.shape_cast %259 : vector<2x8xf32> to vector<2x8x1xf32>
    %cst_124 = arith.constant 3.200000e+01 : f32
    %261 = vector.broadcast %cst_124 : f32 to vector<2x8x1xf32>
    %262 = arith.divf %260, %261 : vector<2x8x1xf32>
    %263 = vector.broadcast %262 : vector<2x8x1xf32> to vector<2x8x32xf32>
    %264 = arith.subf %258, %263 : vector<2x8x32xf32>
    %265 = arith.mulf %264, %264 : vector<2x8x32xf32>
    %cst_125 = arith.constant dense<0.000000e+00> : vector<2x8xf32>
    %266 = vector.multi_reduction <add>, %265, %cst_125 [2] : vector<2x8x32xf32> to vector<2x8xf32>
    %267 = vector.shape_cast %266 : vector<2x8xf32> to vector<2x8x1xf32>
    %cst_126 = arith.constant 3.200000e+01 : f32
    %268 = vector.broadcast %cst_126 : f32 to vector<2x8x1xf32>
    %269 = arith.divf %267, %268 : vector<2x8x1xf32>
    %270 = vector.broadcast %262 : vector<2x8x1xf32> to vector<2x8x32xf32>
    %271 = arith.subf %258, %270 : vector<2x8x32xf32>
    %cst_127 = arith.constant 9.99999974E-6 : f32
    %272 = vector.broadcast %cst_127 : f32 to vector<2x8x1xf32>
    %273 = arith.addf %269, %272 : vector<2x8x1xf32>
    %274 = math.rsqrt %273 : vector<2x8x1xf32>
    %275 = vector.broadcast %274 : vector<2x8x1xf32> to vector<2x8x32xf32>
    %276 = arith.mulf %271, %275 : vector<2x8x32xf32>
    %c0_128 = arith.constant 0 : index
    %c1_129 = arith.constant 1 : index
    %c0_130 = arith.constant 0 : index
    %277 = vector.load %arg16[%c0_128, %c1_129, %c0_130] : memref<1x8x32xf32, #tpu.memory_space<vmem>>, vector<1x1x32xf32>
    %278 = vector.shape_cast %277 : vector<1x1x32xf32> to vector<32xf32>
    %279 = vector.shape_cast %278 : vector<32xf32> to vector<1x1x32xf32>
    %280 = vector.broadcast %279 : vector<1x1x32xf32> to vector<2x8x32xf32>
    %281 = arith.mulf %276, %280 : vector<2x8x32xf32>
    %c0_131 = arith.constant 0 : index
    %c1_132 = arith.constant 1 : index
    %c0_133 = arith.constant 0 : index
    %282 = vector.load %arg17[%c0_131, %c1_132, %c0_133] : memref<1x8x32xf32, #tpu.memory_space<vmem>>, vector<1x1x32xf32>
    %283 = vector.shape_cast %282 : vector<1x1x32xf32> to vector<32xf32>
    %284 = vector.shape_cast %283 : vector<32xf32> to vector<1x1x32xf32>
    %285 = vector.broadcast %284 : vector<1x1x32xf32> to vector<2x8x32xf32>
    %286 = arith.addf %281, %285 : vector<2x8x32xf32>
    %287 = vector.shape_cast %286 : vector<2x8x32xf32> to vector<16x32xf32>
    %c0_134 = arith.constant 0 : index
    %c0_135 = arith.constant 0 : index
    %c0_136 = arith.constant 0 : index
    %c0_137 = arith.constant 0 : index
    %288 = vector.load %arg12[%c0_134, %c0_135, %c0_136, %c0_137] : memref<1x2x32x64xf32, #tpu.memory_space<vmem>>, vector<1x1x32x64xf32>
    %289 = vector.shape_cast %288 : vector<1x1x32x64xf32> to vector<32x64xf32>
    %c0_138 = arith.constant 0 : index
    %c0_139 = arith.constant 0 : index
    %c0_140 = arith.constant 0 : index
    %290 = vector.load %arg13[%c0_138, %c0_139, %c0_140] : memref<1x2x64xf32, #tpu.memory_space<vmem>>, vector<1x1x64xf32>
    %291 = vector.shape_cast %290 : vector<1x1x64xf32> to vector<64xf32>
    %cst_141 = arith.constant dense<0.000000e+00> : vector<16x64xf32>
    %292 = tpu.matmul %287, %289, %cst_141 {dimension_numbers = #tpu.dot_dimension_numbers<[1], [0], [0], [1], [0, 0, 1, 1], [], []>} : vector<16x32xf32>, vector<32x64xf32>, vector<16x64xf32> -> vector<16x64xf32>
    %293 = vector.shape_cast %291 : vector<64xf32> to vector<1x64xf32>
    %294 = vector.broadcast %293 : vector<1x64xf32> to vector<16x64xf32>
    %295 = arith.addf %292, %294 : vector<16x64xf32>
    %cst_142 = arith.constant 0.000000e+00 : f32
    %296 = vector.broadcast %cst_142 : f32 to vector<16x64xf32>
    %297 = arith.maximumf %295, %296 : vector<16x64xf32>
    %c0_143 = arith.constant 0 : index
    %c0_144 = arith.constant 0 : index
    %c0_145 = arith.constant 0 : index
    %c0_146 = arith.constant 0 : index
    %298 = vector.load %arg14[%c0_143, %c0_144, %c0_145, %c0_146] : memref<1x2x64x32xf32, #tpu.memory_space<vmem>>, vector<1x1x64x32xf32>
    %299 = vector.shape_cast %298 : vector<1x1x64x32xf32> to vector<64x32xf32>
    %c0_147 = arith.constant 0 : index
    %c0_148 = arith.constant 0 : index
    %c0_149 = arith.constant 0 : index
    %300 = vector.load %arg15[%c0_147, %c0_148, %c0_149] : memref<1x2x32xf32, #tpu.memory_space<vmem>>, vector<1x1x32xf32>
    %301 = vector.shape_cast %300 : vector<1x1x32xf32> to vector<32xf32>
    %cst_150 = arith.constant dense<0.000000e+00> : vector<16x32xf32>
    %302 = tpu.matmul %297, %299, %cst_150 {dimension_numbers = #tpu.dot_dimension_numbers<[1], [0], [0], [1], [0, 0, 1, 1], [], []>} : vector<16x64xf32>, vector<64x32xf32>, vector<16x32xf32> -> vector<16x32xf32>
    %303 = vector.shape_cast %301 : vector<32xf32> to vector<1x32xf32>
    %304 = vector.broadcast %303 : vector<1x32xf32> to vector<16x32xf32>
    %305 = arith.addf %302, %304 : vector<16x32xf32>
    %306 = vector.shape_cast %305 : vector<16x32xf32> to vector<2x8x32xf32>
    %307 = arith.addf %286, %306 : vector<2x8x32xf32>
    %cst_151 = arith.constant dense<0.000000e+00> : vector<2x8xf32>
    %308 = vector.multi_reduction <add>, %307, %cst_151 [2] : vector<2x8x32xf32> to vector<2x8xf32>
    %309 = vector.shape_cast %308 : vector<2x8xf32> to vector<2x8x1xf32>
    %cst_152 = arith.constant 3.200000e+01 : f32
    %310 = vector.broadcast %cst_152 : f32 to vector<2x8x1xf32>
    %311 = arith.divf %309, %310 : vector<2x8x1xf32>
    %312 = vector.broadcast %311 : vector<2x8x1xf32> to vector<2x8x32xf32>
    %313 = arith.subf %307, %312 : vector<2x8x32xf32>
    %314 = arith.mulf %313, %313 : vector<2x8x32xf32>
    %cst_153 = arith.constant dense<0.000000e+00> : vector<2x8xf32>
    %315 = vector.multi_reduction <add>, %314, %cst_153 [2] : vector<2x8x32xf32> to vector<2x8xf32>
    %316 = vector.shape_cast %315 : vector<2x8xf32> to vector<2x8x1xf32>
    %cst_154 = arith.constant 3.200000e+01 : f32
    %317 = vector.broadcast %cst_154 : f32 to vector<2x8x1xf32>
    %318 = arith.divf %316, %317 : vector<2x8x1xf32>
    %319 = vector.broadcast %311 : vector<2x8x1xf32> to vector<2x8x32xf32>
    %320 = arith.subf %307, %319 : vector<2x8x32xf32>
    %cst_155 = arith.constant 9.99999974E-6 : f32
    %321 = vector.broadcast %cst_155 : f32 to vector<2x8x1xf32>
    %322 = arith.addf %318, %321 : vector<2x8x1xf32>
    %323 = math.rsqrt %322 : vector<2x8x1xf32>
    %324 = vector.broadcast %323 : vector<2x8x1xf32> to vector<2x8x32xf32>
    %325 = arith.mulf %320, %324 : vector<2x8x32xf32>
    %c0_156 = arith.constant 0 : index
    %c2_157 = arith.constant 2 : index
    %c0_158 = arith.constant 0 : index
    %326 = vector.load %arg16[%c0_156, %c2_157, %c0_158] : memref<1x8x32xf32, #tpu.memory_space<vmem>>, vector<1x1x32xf32>
    %327 = vector.shape_cast %326 : vector<1x1x32xf32> to vector<32xf32>
    %328 = vector.shape_cast %327 : vector<32xf32> to vector<1x1x32xf32>
    %329 = vector.broadcast %328 : vector<1x1x32xf32> to vector<2x8x32xf32>
    %330 = arith.mulf %325, %329 : vector<2x8x32xf32>
    %c0_159 = arith.constant 0 : index
    %c2_160 = arith.constant 2 : index
    %c0_161 = arith.constant 0 : index
    %331 = vector.load %arg17[%c0_159, %c2_160, %c0_161] : memref<1x8x32xf32, #tpu.memory_space<vmem>>, vector<1x1x32xf32>
    %332 = vector.shape_cast %331 : vector<1x1x32xf32> to vector<32xf32>
    %333 = vector.shape_cast %332 : vector<32xf32> to vector<1x1x32xf32>
    %334 = vector.broadcast %333 : vector<1x1x32xf32> to vector<2x8x32xf32>
    %335 = arith.addf %330, %334 : vector<2x8x32xf32>
    %cst_162 = arith.constant dense<0.000000e+00> : vector<2x8xf32>
    %336 = vector.multi_reduction <add>, %335, %cst_162 [2] : vector<2x8x32xf32> to vector<2x8xf32>
    %337 = vector.shape_cast %336 : vector<2x8xf32> to vector<2x8x1xf32>
    %cst_163 = arith.constant 3.200000e+01 : f32
    %338 = vector.broadcast %cst_163 : f32 to vector<2x8x1xf32>
    %339 = arith.divf %337, %338 : vector<2x8x1xf32>
    %340 = vector.broadcast %339 : vector<2x8x1xf32> to vector<2x8x32xf32>
    %341 = arith.subf %335, %340 : vector<2x8x32xf32>
    %342 = arith.mulf %341, %341 : vector<2x8x32xf32>
    %cst_164 = arith.constant dense<0.000000e+00> : vector<2x8xf32>
    %343 = vector.multi_reduction <add>, %342, %cst_164 [2] : vector<2x8x32xf32> to vector<2x8xf32>
    %344 = vector.shape_cast %343 : vector<2x8xf32> to vector<2x8x1xf32>
    %cst_165 = arith.constant 3.200000e+01 : f32
    %345 = vector.broadcast %cst_165 : f32 to vector<2x8x1xf32>
    %346 = arith.divf %344, %345 : vector<2x8x1xf32>
    %347 = vector.broadcast %339 : vector<2x8x1xf32> to vector<2x8x32xf32>
    %348 = arith.subf %335, %347 : vector<2x8x32xf32>
    %cst_166 = arith.constant 9.99999974E-6 : f32
    %349 = vector.broadcast %cst_166 : f32 to vector<2x8x1xf32>
    %350 = arith.addf %346, %349 : vector<2x8x1xf32>
    %351 = math.rsqrt %350 : vector<2x8x1xf32>
    %352 = vector.broadcast %351 : vector<2x8x1xf32> to vector<2x8x32xf32>
    %353 = arith.mulf %348, %352 : vector<2x8x32xf32>
    %c0_167 = arith.constant 0 : index
    %c3_168 = arith.constant 3 : index
    %c0_169 = arith.constant 0 : index
    %354 = vector.load %arg16[%c0_167, %c3_168, %c0_169] : memref<1x8x32xf32, #tpu.memory_space<vmem>>, vector<1x1x32xf32>
    %355 = vector.shape_cast %354 : vector<1x1x32xf32> to vector<32xf32>
    %356 = vector.shape_cast %355 : vector<32xf32> to vector<1x1x32xf32>
    %357 = vector.broadcast %356 : vector<1x1x32xf32> to vector<2x8x32xf32>
    %358 = arith.mulf %353, %357 : vector<2x8x32xf32>
    %c0_170 = arith.constant 0 : index
    %c3_171 = arith.constant 3 : index
    %c0_172 = arith.constant 0 : index
    %359 = vector.load %arg17[%c0_170, %c3_171, %c0_172] : memref<1x8x32xf32, #tpu.memory_space<vmem>>, vector<1x1x32xf32>
    %360 = vector.shape_cast %359 : vector<1x1x32xf32> to vector<32xf32>
    %361 = vector.shape_cast %360 : vector<32xf32> to vector<1x1x32xf32>
    %362 = vector.broadcast %361 : vector<1x1x32xf32> to vector<2x8x32xf32>
    %363 = arith.addf %358, %362 : vector<2x8x32xf32>
    %364 = vector.extract_strided_slice %7 {offsets = [0, 8, 0], sizes = [2, 8, 32], strides = [1, 1, 1]} : vector<2x16x32xf32> to vector<2x8x32xf32>
    %365 = vector.shape_cast %364 : vector<2x8x32xf32> to vector<16x32xf32>
    %c0_173 = arith.constant 0 : index
    %c1_174 = arith.constant 1 : index
    %c0_175 = arith.constant 0 : index
    %c0_176 = arith.constant 0 : index
    %366 = vector.load %arg7[%c0_173, %c1_174, %c0_175, %c0_176] : memref<1x2x32x32xf32, #tpu.memory_space<vmem>>, vector<1x1x32x32xf32>
    %367 = vector.shape_cast %366 : vector<1x1x32x32xf32> to vector<32x32xf32>
    %c0_177 = arith.constant 0 : index
    %c1_178 = arith.constant 1 : index
    %c0_179 = arith.constant 0 : index
    %368 = vector.load %arg8[%c0_177, %c1_178, %c0_179] : memref<1x2x32xf32, #tpu.memory_space<vmem>>, vector<1x1x32xf32>
    %369 = vector.shape_cast %368 : vector<1x1x32xf32> to vector<32xf32>
    %cst_180 = arith.constant dense<0.000000e+00> : vector<16x32xf32>
    %370 = tpu.matmul %365, %367, %cst_180 {dimension_numbers = #tpu.dot_dimension_numbers<[1], [0], [0], [1], [0, 0, 1, 1], [], []>} : vector<16x32xf32>, vector<32x32xf32>, vector<16x32xf32> -> vector<16x32xf32>
    %371 = vector.shape_cast %369 : vector<32xf32> to vector<1x32xf32>
    %372 = vector.broadcast %371 : vector<1x32xf32> to vector<16x32xf32>
    %373 = arith.addf %370, %372 : vector<16x32xf32>
    %cst_181 = arith.constant 0.000000e+00 : f32
    %374 = vector.broadcast %cst_181 : f32 to vector<16x32xf32>
    %375 = arith.maximumf %373, %374 : vector<16x32xf32>
    %376 = vector.shape_cast %375 : vector<16x32xf32> to vector<2x8x32xf32>
    %377 = vector.extract_strided_slice %8 {offsets = [8, 0], sizes = [8, 32], strides = [1, 1]} : vector<16x32xf32> to vector<8x32xf32>
    %378 = vector.shape_cast %377 : vector<8x32xf32> to vector<1x8x32xf32>
    %379 = vector.broadcast %378 : vector<1x8x32xf32> to vector<2x8x32xf32>
    %380 = arith.addf %376, %379 : vector<2x8x32xf32>
    %381 = tpu.iota {dimensions = array<i32: 0>} : vector<8x8xi32>
    %382 = tpu.iota {dimensions = array<i32: 1>} : vector<8x8xi32>
    %383 = arith.cmpi sge, %381, %382 : vector<8x8xi32>
    %cst_182 = arith.constant 0.000000e+00 : f32
    %cst_183 = arith.constant -1.000000e+30 : f32
    %384 = vector.broadcast %cst_182 : f32 to vector<8x8xf32>
    %385 = vector.broadcast %cst_183 : f32 to vector<8x8xf32>
    %386 = arith.select %383, %384, %385 : vector<8x8xi1>, vector<8x8xf32>
    %387 = vector.shape_cast %380 : vector<2x8x32xf32> to vector<16x32xf32>
    %c0_184 = arith.constant 0 : index
    %c8 = arith.constant 8 : index
    %c0_185 = arith.constant 0 : index
    %c0_186 = arith.constant 0 : index
    %388 = vector.load %arg10[%c0_184, %c8, %c0_185, %c0_186] : memref<1x16x32x32xf32, #tpu.memory_space<vmem>>, vector<1x1x32x32xf32>
    %389 = vector.shape_cast %388 : vector<1x1x32x32xf32> to vector<32x32xf32>
    %c0_187 = arith.constant 0 : index
    %c8_188 = arith.constant 8 : index
    %c0_189 = arith.constant 0 : index
    %390 = vector.load %arg11[%c0_187, %c8_188, %c0_189] : memref<1x16x32xf32, #tpu.memory_space<vmem>>, vector<1x1x32xf32>
    %391 = vector.shape_cast %390 : vector<1x1x32xf32> to vector<32xf32>
    %cst_190 = arith.constant dense<0.000000e+00> : vector<16x32xf32>
    %392 = tpu.matmul %387, %389, %cst_190 {dimension_numbers = #tpu.dot_dimension_numbers<[1], [0], [0], [1], [0, 0, 1, 1], [], []>} : vector<16x32xf32>, vector<32x32xf32>, vector<16x32xf32> -> vector<16x32xf32>
    %393 = vector.shape_cast %391 : vector<32xf32> to vector<1x32xf32>
    %394 = vector.broadcast %393 : vector<1x32xf32> to vector<16x32xf32>
    %395 = arith.addf %392, %394 : vector<16x32xf32>
    %cst_191 = arith.constant 0.353553385 : f32
    %396 = vector.broadcast %cst_191 : f32 to vector<16x32xf32>
    %397 = arith.mulf %395, %396 : vector<16x32xf32>
    %398 = vector.shape_cast %397 : vector<16x32xf32> to vector<2x8x32xf32>
    %399 = vector.shape_cast %380 : vector<2x8x32xf32> to vector<16x32xf32>
    %c0_192 = arith.constant 0 : index
    %c9 = arith.constant 9 : index
    %c0_193 = arith.constant 0 : index
    %c0_194 = arith.constant 0 : index
    %400 = vector.load %arg10[%c0_192, %c9, %c0_193, %c0_194] : memref<1x16x32x32xf32, #tpu.memory_space<vmem>>, vector<1x1x32x32xf32>
    %401 = vector.shape_cast %400 : vector<1x1x32x32xf32> to vector<32x32xf32>
    %c0_195 = arith.constant 0 : index
    %c9_196 = arith.constant 9 : index
    %c0_197 = arith.constant 0 : index
    %402 = vector.load %arg11[%c0_195, %c9_196, %c0_197] : memref<1x16x32xf32, #tpu.memory_space<vmem>>, vector<1x1x32xf32>
    %403 = vector.shape_cast %402 : vector<1x1x32xf32> to vector<32xf32>
    %cst_198 = arith.constant dense<0.000000e+00> : vector<16x32xf32>
    %404 = tpu.matmul %399, %401, %cst_198 {dimension_numbers = #tpu.dot_dimension_numbers<[1], [0], [0], [1], [0, 0, 1, 1], [], []>} : vector<16x32xf32>, vector<32x32xf32>, vector<16x32xf32> -> vector<16x32xf32>
    %405 = vector.shape_cast %403 : vector<32xf32> to vector<1x32xf32>
    %406 = vector.broadcast %405 : vector<1x32xf32> to vector<16x32xf32>
    %407 = arith.addf %404, %406 : vector<16x32xf32>
    %408 = vector.shape_cast %407 : vector<16x32xf32> to vector<2x8x32xf32>
    %409 = vector.shape_cast %380 : vector<2x8x32xf32> to vector<16x32xf32>
    %c0_199 = arith.constant 0 : index
    %c10 = arith.constant 10 : index
    %c0_200 = arith.constant 0 : index
    %c0_201 = arith.constant 0 : index
    %410 = vector.load %arg10[%c0_199, %c10, %c0_200, %c0_201] : memref<1x16x32x32xf32, #tpu.memory_space<vmem>>, vector<1x1x32x32xf32>
    %411 = vector.shape_cast %410 : vector<1x1x32x32xf32> to vector<32x32xf32>
    %c0_202 = arith.constant 0 : index
    %c10_203 = arith.constant 10 : index
    %c0_204 = arith.constant 0 : index
    %412 = vector.load %arg11[%c0_202, %c10_203, %c0_204] : memref<1x16x32xf32, #tpu.memory_space<vmem>>, vector<1x1x32xf32>
    %413 = vector.shape_cast %412 : vector<1x1x32xf32> to vector<32xf32>
    %cst_205 = arith.constant dense<0.000000e+00> : vector<16x32xf32>
    %414 = tpu.matmul %409, %411, %cst_205 {dimension_numbers = #tpu.dot_dimension_numbers<[1], [0], [0], [1], [0, 0, 1, 1], [], []>} : vector<16x32xf32>, vector<32x32xf32>, vector<16x32xf32> -> vector<16x32xf32>
    %415 = vector.shape_cast %413 : vector<32xf32> to vector<1x32xf32>
    %416 = vector.broadcast %415 : vector<1x32xf32> to vector<16x32xf32>
    %417 = arith.addf %414, %416 : vector<16x32xf32>
    %418 = vector.shape_cast %417 : vector<16x32xf32> to vector<2x8x32xf32>
    %419 = vector.extract_strided_slice %398 {offsets = [0, 0, 0], sizes = [2, 8, 8], strides = [1, 1, 1]} : vector<2x8x32xf32> to vector<2x8x8xf32>
    %420 = vector.extract_strided_slice %408 {offsets = [0, 0, 0], sizes = [2, 8, 8], strides = [1, 1, 1]} : vector<2x8x32xf32> to vector<2x8x8xf32>
    "tpu.trace_start"() <{level = 10 : i32, message = "bqd,bkd->bqk"}> : () -> ()
    %cst_206 = arith.constant dense<0.000000e+00> : vector<2x8x8xf32>
    %421 = tpu.matmul %419, %420, %cst_206 {dimension_numbers = #tpu.dot_dimension_numbers<[2], [2], [1], [1], [0, 0, 0, 1, 1, 1], [0], [0]>} : vector<2x8x8xf32>, vector<2x8x8xf32>, vector<2x8x8xf32> -> vector<2x8x8xf32>
    "tpu.trace_stop"() : () -> ()
    %422 = vector.shape_cast %386 : vector<8x8xf32> to vector<1x8x8xf32>
    %423 = vector.broadcast %422 : vector<1x8x8xf32> to vector<2x8x8xf32>
    %424 = arith.addf %421, %423 : vector<2x8x8xf32>
    %cst_207 = arith.constant dense<0xFF800000> : vector<2x8xf32>
    %425 = vector.multi_reduction <maximumf>, %424, %cst_207 [2] : vector<2x8x8xf32> to vector<2x8xf32>
    %426 = vector.shape_cast %425 : vector<2x8xf32> to vector<2x8x1xf32>
    %427 = vector.broadcast %426 : vector<2x8x1xf32> to vector<2x8x8xf32>
    %428 = arith.subf %424, %427 : vector<2x8x8xf32>
    %429 = math.exp %428 : vector<2x8x8xf32>
    %cst_208 = arith.constant dense<0.000000e+00> : vector<2x8xf32>
    %430 = vector.multi_reduction <add>, %429, %cst_208 [2] : vector<2x8x8xf32> to vector<2x8xf32>
    %431 = vector.shape_cast %430 : vector<2x8xf32> to vector<2x8x1xf32>
    %432 = vector.broadcast %431 : vector<2x8x1xf32> to vector<2x8x8xf32>
    %433 = arith.divf %429, %432 : vector<2x8x8xf32>
    %434 = vector.extract_strided_slice %418 {offsets = [0, 0, 0], sizes = [2, 8, 8], strides = [1, 1, 1]} : vector<2x8x32xf32> to vector<2x8x8xf32>
    "tpu.trace_start"() <{level = 10 : i32, message = "bqk,bkd->bqd"}> : () -> ()
    %cst_209 = arith.constant dense<0.000000e+00> : vector<2x8x8xf32>
    %435 = tpu.matmul %433, %434, %cst_209 {dimension_numbers = #tpu.dot_dimension_numbers<[2], [1], [1], [2], [0, 0, 0, 1, 1, 2], [0], [0]>} : vector<2x8x8xf32>, vector<2x8x8xf32>, vector<2x8x8xf32> -> vector<2x8x8xf32>
    "tpu.trace_stop"() : () -> ()
    %436 = vector.extract_strided_slice %398 {offsets = [0, 0, 8], sizes = [2, 8, 8], strides = [1, 1, 1]} : vector<2x8x32xf32> to vector<2x8x8xf32>
    %437 = vector.extract_strided_slice %408 {offsets = [0, 0, 8], sizes = [2, 8, 8], strides = [1, 1, 1]} : vector<2x8x32xf32> to vector<2x8x8xf32>
    "tpu.trace_start"() <{level = 10 : i32, message = "bqd,bkd->bqk"}> : () -> ()
    %cst_210 = arith.constant dense<0.000000e+00> : vector<2x8x8xf32>
    %438 = tpu.matmul %436, %437, %cst_210 {dimension_numbers = #tpu.dot_dimension_numbers<[2], [2], [1], [1], [0, 0, 0, 1, 1, 1], [0], [0]>} : vector<2x8x8xf32>, vector<2x8x8xf32>, vector<2x8x8xf32> -> vector<2x8x8xf32>
    "tpu.trace_stop"() : () -> ()
    %439 = vector.shape_cast %386 : vector<8x8xf32> to vector<1x8x8xf32>
    %440 = vector.broadcast %439 : vector<1x8x8xf32> to vector<2x8x8xf32>
    %441 = arith.addf %438, %440 : vector<2x8x8xf32>
    %cst_211 = arith.constant dense<0xFF800000> : vector<2x8xf32>
    %442 = vector.multi_reduction <maximumf>, %441, %cst_211 [2] : vector<2x8x8xf32> to vector<2x8xf32>
    %443 = vector.shape_cast %442 : vector<2x8xf32> to vector<2x8x1xf32>
    %444 = vector.broadcast %443 : vector<2x8x1xf32> to vector<2x8x8xf32>
    %445 = arith.subf %441, %444 : vector<2x8x8xf32>
    %446 = math.exp %445 : vector<2x8x8xf32>
    %cst_212 = arith.constant dense<0.000000e+00> : vector<2x8xf32>
    %447 = vector.multi_reduction <add>, %446, %cst_212 [2] : vector<2x8x8xf32> to vector<2x8xf32>
    %448 = vector.shape_cast %447 : vector<2x8xf32> to vector<2x8x1xf32>
    %449 = vector.broadcast %448 : vector<2x8x1xf32> to vector<2x8x8xf32>
    %450 = arith.divf %446, %449 : vector<2x8x8xf32>
    %451 = vector.extract_strided_slice %418 {offsets = [0, 0, 8], sizes = [2, 8, 8], strides = [1, 1, 1]} : vector<2x8x32xf32> to vector<2x8x8xf32>
    "tpu.trace_start"() <{level = 10 : i32, message = "bqk,bkd->bqd"}> : () -> ()
    %cst_213 = arith.constant dense<0.000000e+00> : vector<2x8x8xf32>
    %452 = tpu.matmul %450, %451, %cst_213 {dimension_numbers = #tpu.dot_dimension_numbers<[2], [1], [1], [2], [0, 0, 0, 1, 1, 2], [0], [0]>} : vector<2x8x8xf32>, vector<2x8x8xf32>, vector<2x8x8xf32> -> vector<2x8x8xf32>
    "tpu.trace_stop"() : () -> ()
    %453 = vector.extract_strided_slice %398 {offsets = [0, 0, 16], sizes = [2, 8, 8], strides = [1, 1, 1]} : vector<2x8x32xf32> to vector<2x8x8xf32>
    %454 = vector.extract_strided_slice %408 {offsets = [0, 0, 16], sizes = [2, 8, 8], strides = [1, 1, 1]} : vector<2x8x32xf32> to vector<2x8x8xf32>
    "tpu.trace_start"() <{level = 10 : i32, message = "bqd,bkd->bqk"}> : () -> ()
    %cst_214 = arith.constant dense<0.000000e+00> : vector<2x8x8xf32>
    %455 = tpu.matmul %453, %454, %cst_214 {dimension_numbers = #tpu.dot_dimension_numbers<[2], [2], [1], [1], [0, 0, 0, 1, 1, 1], [0], [0]>} : vector<2x8x8xf32>, vector<2x8x8xf32>, vector<2x8x8xf32> -> vector<2x8x8xf32>
    "tpu.trace_stop"() : () -> ()
    %456 = vector.shape_cast %386 : vector<8x8xf32> to vector<1x8x8xf32>
    %457 = vector.broadcast %456 : vector<1x8x8xf32> to vector<2x8x8xf32>
    %458 = arith.addf %455, %457 : vector<2x8x8xf32>
    %cst_215 = arith.constant dense<0xFF800000> : vector<2x8xf32>
    %459 = vector.multi_reduction <maximumf>, %458, %cst_215 [2] : vector<2x8x8xf32> to vector<2x8xf32>
    %460 = vector.shape_cast %459 : vector<2x8xf32> to vector<2x8x1xf32>
    %461 = vector.broadcast %460 : vector<2x8x1xf32> to vector<2x8x8xf32>
    %462 = arith.subf %458, %461 : vector<2x8x8xf32>
    %463 = math.exp %462 : vector<2x8x8xf32>
    %cst_216 = arith.constant dense<0.000000e+00> : vector<2x8xf32>
    %464 = vector.multi_reduction <add>, %463, %cst_216 [2] : vector<2x8x8xf32> to vector<2x8xf32>
    %465 = vector.shape_cast %464 : vector<2x8xf32> to vector<2x8x1xf32>
    %466 = vector.broadcast %465 : vector<2x8x1xf32> to vector<2x8x8xf32>
    %467 = arith.divf %463, %466 : vector<2x8x8xf32>
    %468 = vector.extract_strided_slice %418 {offsets = [0, 0, 16], sizes = [2, 8, 8], strides = [1, 1, 1]} : vector<2x8x32xf32> to vector<2x8x8xf32>
    "tpu.trace_start"() <{level = 10 : i32, message = "bqk,bkd->bqd"}> : () -> ()
    %cst_217 = arith.constant dense<0.000000e+00> : vector<2x8x8xf32>
    %469 = tpu.matmul %467, %468, %cst_217 {dimension_numbers = #tpu.dot_dimension_numbers<[2], [1], [1], [2], [0, 0, 0, 1, 1, 2], [0], [0]>} : vector<2x8x8xf32>, vector<2x8x8xf32>, vector<2x8x8xf32> -> vector<2x8x8xf32>
    "tpu.trace_stop"() : () -> ()
    %470 = vector.extract_strided_slice %398 {offsets = [0, 0, 24], sizes = [2, 8, 8], strides = [1, 1, 1]} : vector<2x8x32xf32> to vector<2x8x8xf32>
    %471 = vector.extract_strided_slice %408 {offsets = [0, 0, 24], sizes = [2, 8, 8], strides = [1, 1, 1]} : vector<2x8x32xf32> to vector<2x8x8xf32>
    "tpu.trace_start"() <{level = 10 : i32, message = "bqd,bkd->bqk"}> : () -> ()
    %cst_218 = arith.constant dense<0.000000e+00> : vector<2x8x8xf32>
    %472 = tpu.matmul %470, %471, %cst_218 {dimension_numbers = #tpu.dot_dimension_numbers<[2], [2], [1], [1], [0, 0, 0, 1, 1, 1], [0], [0]>} : vector<2x8x8xf32>, vector<2x8x8xf32>, vector<2x8x8xf32> -> vector<2x8x8xf32>
    "tpu.trace_stop"() : () -> ()
    %473 = vector.shape_cast %386 : vector<8x8xf32> to vector<1x8x8xf32>
    %474 = vector.broadcast %473 : vector<1x8x8xf32> to vector<2x8x8xf32>
    %475 = arith.addf %472, %474 : vector<2x8x8xf32>
    %cst_219 = arith.constant dense<0xFF800000> : vector<2x8xf32>
    %476 = vector.multi_reduction <maximumf>, %475, %cst_219 [2] : vector<2x8x8xf32> to vector<2x8xf32>
    %477 = vector.shape_cast %476 : vector<2x8xf32> to vector<2x8x1xf32>
    %478 = vector.broadcast %477 : vector<2x8x1xf32> to vector<2x8x8xf32>
    %479 = arith.subf %475, %478 : vector<2x8x8xf32>
    %480 = math.exp %479 : vector<2x8x8xf32>
    %cst_220 = arith.constant dense<0.000000e+00> : vector<2x8xf32>
    %481 = vector.multi_reduction <add>, %480, %cst_220 [2] : vector<2x8x8xf32> to vector<2x8xf32>
    %482 = vector.shape_cast %481 : vector<2x8xf32> to vector<2x8x1xf32>
    %483 = vector.broadcast %482 : vector<2x8x1xf32> to vector<2x8x8xf32>
    %484 = arith.divf %480, %483 : vector<2x8x8xf32>
    %485 = vector.extract_strided_slice %418 {offsets = [0, 0, 24], sizes = [2, 8, 8], strides = [1, 1, 1]} : vector<2x8x32xf32> to vector<2x8x8xf32>
    "tpu.trace_start"() <{level = 10 : i32, message = "bqk,bkd->bqd"}> : () -> ()
    %cst_221 = arith.constant dense<0.000000e+00> : vector<2x8x8xf32>
    %486 = tpu.matmul %484, %485, %cst_221 {dimension_numbers = #tpu.dot_dimension_numbers<[2], [1], [1], [2], [0, 0, 0, 1, 1, 2], [0], [0]>} : vector<2x8x8xf32>, vector<2x8x8xf32>, vector<2x8x8xf32> -> vector<2x8x8xf32>
    "tpu.trace_stop"() : () -> ()
    %487 = tpu.concatenate %435, %452, %469, %486 in 2 : vector<2x8x8xf32>, vector<2x8x8xf32>, vector<2x8x8xf32>, vector<2x8x8xf32> -> vector<2x8x32xf32>
    %488 = vector.shape_cast %487 : vector<2x8x32xf32> to vector<16x32xf32>
    %c0_222 = arith.constant 0 : index
    %c11 = arith.constant 11 : index
    %c0_223 = arith.constant 0 : index
    %c0_224 = arith.constant 0 : index
    %489 = vector.load %arg10[%c0_222, %c11, %c0_223, %c0_224] : memref<1x16x32x32xf32, #tpu.memory_space<vmem>>, vector<1x1x32x32xf32>
    %490 = vector.shape_cast %489 : vector<1x1x32x32xf32> to vector<32x32xf32>
    %c0_225 = arith.constant 0 : index
    %c11_226 = arith.constant 11 : index
    %c0_227 = arith.constant 0 : index
    %491 = vector.load %arg11[%c0_225, %c11_226, %c0_227] : memref<1x16x32xf32, #tpu.memory_space<vmem>>, vector<1x1x32xf32>
    %492 = vector.shape_cast %491 : vector<1x1x32xf32> to vector<32xf32>
    %cst_228 = arith.constant dense<0.000000e+00> : vector<16x32xf32>
    %493 = tpu.matmul %488, %490, %cst_228 {dimension_numbers = #tpu.dot_dimension_numbers<[1], [0], [0], [1], [0, 0, 1, 1], [], []>} : vector<16x32xf32>, vector<32x32xf32>, vector<16x32xf32> -> vector<16x32xf32>
    %494 = vector.shape_cast %492 : vector<32xf32> to vector<1x32xf32>
    %495 = vector.broadcast %494 : vector<1x32xf32> to vector<16x32xf32>
    %496 = arith.addf %493, %495 : vector<16x32xf32>
    %497 = vector.shape_cast %496 : vector<16x32xf32> to vector<2x8x32xf32>
    %498 = arith.addf %380, %497 : vector<2x8x32xf32>
    %cst_229 = arith.constant dense<0.000000e+00> : vector<2x8xf32>
    %499 = vector.multi_reduction <add>, %498, %cst_229 [2] : vector<2x8x32xf32> to vector<2x8xf32>
    %500 = vector.shape_cast %499 : vector<2x8xf32> to vector<2x8x1xf32>
    %cst_230 = arith.constant 3.200000e+01 : f32
    %501 = vector.broadcast %cst_230 : f32 to vector<2x8x1xf32>
    %502 = arith.divf %500, %501 : vector<2x8x1xf32>
    %503 = vector.broadcast %502 : vector<2x8x1xf32> to vector<2x8x32xf32>
    %504 = arith.subf %498, %503 : vector<2x8x32xf32>
    %505 = arith.mulf %504, %504 : vector<2x8x32xf32>
    %cst_231 = arith.constant dense<0.000000e+00> : vector<2x8xf32>
    %506 = vector.multi_reduction <add>, %505, %cst_231 [2] : vector<2x8x32xf32> to vector<2x8xf32>
    %507 = vector.shape_cast %506 : vector<2x8xf32> to vector<2x8x1xf32>
    %cst_232 = arith.constant 3.200000e+01 : f32
    %508 = vector.broadcast %cst_232 : f32 to vector<2x8x1xf32>
    %509 = arith.divf %507, %508 : vector<2x8x1xf32>
    %510 = vector.broadcast %502 : vector<2x8x1xf32> to vector<2x8x32xf32>
    %511 = arith.subf %498, %510 : vector<2x8x32xf32>
    %cst_233 = arith.constant 9.99999974E-6 : f32
    %512 = vector.broadcast %cst_233 : f32 to vector<2x8x1xf32>
    %513 = arith.addf %509, %512 : vector<2x8x1xf32>
    %514 = math.rsqrt %513 : vector<2x8x1xf32>
    %515 = vector.broadcast %514 : vector<2x8x1xf32> to vector<2x8x32xf32>
    %516 = arith.mulf %511, %515 : vector<2x8x32xf32>
    %c0_234 = arith.constant 0 : index
    %c4_235 = arith.constant 4 : index
    %c0_236 = arith.constant 0 : index
    %517 = vector.load %arg16[%c0_234, %c4_235, %c0_236] : memref<1x8x32xf32, #tpu.memory_space<vmem>>, vector<1x1x32xf32>
    %518 = vector.shape_cast %517 : vector<1x1x32xf32> to vector<32xf32>
    %519 = vector.shape_cast %518 : vector<32xf32> to vector<1x1x32xf32>
    %520 = vector.broadcast %519 : vector<1x1x32xf32> to vector<2x8x32xf32>
    %521 = arith.mulf %516, %520 : vector<2x8x32xf32>
    %c0_237 = arith.constant 0 : index
    %c4_238 = arith.constant 4 : index
    %c0_239 = arith.constant 0 : index
    %522 = vector.load %arg17[%c0_237, %c4_238, %c0_239] : memref<1x8x32xf32, #tpu.memory_space<vmem>>, vector<1x1x32xf32>
    %523 = vector.shape_cast %522 : vector<1x1x32xf32> to vector<32xf32>
    %524 = vector.shape_cast %523 : vector<32xf32> to vector<1x1x32xf32>
    %525 = vector.broadcast %524 : vector<1x1x32xf32> to vector<2x8x32xf32>
    %526 = arith.addf %521, %525 : vector<2x8x32xf32>
    %527 = vector.shape_cast %526 : vector<2x8x32xf32> to vector<16x32xf32>
    %c0_240 = arith.constant 0 : index
    %c12 = arith.constant 12 : index
    %c0_241 = arith.constant 0 : index
    %c0_242 = arith.constant 0 : index
    %528 = vector.load %arg10[%c0_240, %c12, %c0_241, %c0_242] : memref<1x16x32x32xf32, #tpu.memory_space<vmem>>, vector<1x1x32x32xf32>
    %529 = vector.shape_cast %528 : vector<1x1x32x32xf32> to vector<32x32xf32>
    %c0_243 = arith.constant 0 : index
    %c12_244 = arith.constant 12 : index
    %c0_245 = arith.constant 0 : index
    %530 = vector.load %arg11[%c0_243, %c12_244, %c0_245] : memref<1x16x32xf32, #tpu.memory_space<vmem>>, vector<1x1x32xf32>
    %531 = vector.shape_cast %530 : vector<1x1x32xf32> to vector<32xf32>
    %cst_246 = arith.constant dense<0.000000e+00> : vector<16x32xf32>
    %532 = tpu.matmul %527, %529, %cst_246 {dimension_numbers = #tpu.dot_dimension_numbers<[1], [0], [0], [1], [0, 0, 1, 1], [], []>} : vector<16x32xf32>, vector<32x32xf32>, vector<16x32xf32> -> vector<16x32xf32>
    %533 = vector.shape_cast %531 : vector<32xf32> to vector<1x32xf32>
    %534 = vector.broadcast %533 : vector<1x32xf32> to vector<16x32xf32>
    %535 = arith.addf %532, %534 : vector<16x32xf32>
    %cst_247 = arith.constant 0.353553385 : f32
    %536 = vector.broadcast %cst_247 : f32 to vector<16x32xf32>
    %537 = arith.mulf %535, %536 : vector<16x32xf32>
    %538 = vector.shape_cast %537 : vector<16x32xf32> to vector<2x8x32xf32>
    %539 = vector.shape_cast %363 : vector<2x8x32xf32> to vector<16x32xf32>
    %c0_248 = arith.constant 0 : index
    %c13 = arith.constant 13 : index
    %c0_249 = arith.constant 0 : index
    %c0_250 = arith.constant 0 : index
    %540 = vector.load %arg10[%c0_248, %c13, %c0_249, %c0_250] : memref<1x16x32x32xf32, #tpu.memory_space<vmem>>, vector<1x1x32x32xf32>
    %541 = vector.shape_cast %540 : vector<1x1x32x32xf32> to vector<32x32xf32>
    %c0_251 = arith.constant 0 : index
    %c13_252 = arith.constant 13 : index
    %c0_253 = arith.constant 0 : index
    %542 = vector.load %arg11[%c0_251, %c13_252, %c0_253] : memref<1x16x32xf32, #tpu.memory_space<vmem>>, vector<1x1x32xf32>
    %543 = vector.shape_cast %542 : vector<1x1x32xf32> to vector<32xf32>
    %cst_254 = arith.constant dense<0.000000e+00> : vector<16x32xf32>
    %544 = tpu.matmul %539, %541, %cst_254 {dimension_numbers = #tpu.dot_dimension_numbers<[1], [0], [0], [1], [0, 0, 1, 1], [], []>} : vector<16x32xf32>, vector<32x32xf32>, vector<16x32xf32> -> vector<16x32xf32>
    %545 = vector.shape_cast %543 : vector<32xf32> to vector<1x32xf32>
    %546 = vector.broadcast %545 : vector<1x32xf32> to vector<16x32xf32>
    %547 = arith.addf %544, %546 : vector<16x32xf32>
    %548 = vector.shape_cast %547 : vector<16x32xf32> to vector<2x8x32xf32>
    %549 = vector.shape_cast %363 : vector<2x8x32xf32> to vector<16x32xf32>
    %c0_255 = arith.constant 0 : index
    %c14 = arith.constant 14 : index
    %c0_256 = arith.constant 0 : index
    %c0_257 = arith.constant 0 : index
    %550 = vector.load %arg10[%c0_255, %c14, %c0_256, %c0_257] : memref<1x16x32x32xf32, #tpu.memory_space<vmem>>, vector<1x1x32x32xf32>
    %551 = vector.shape_cast %550 : vector<1x1x32x32xf32> to vector<32x32xf32>
    %c0_258 = arith.constant 0 : index
    %c14_259 = arith.constant 14 : index
    %c0_260 = arith.constant 0 : index
    %552 = vector.load %arg11[%c0_258, %c14_259, %c0_260] : memref<1x16x32xf32, #tpu.memory_space<vmem>>, vector<1x1x32xf32>
    %553 = vector.shape_cast %552 : vector<1x1x32xf32> to vector<32xf32>
    %cst_261 = arith.constant dense<0.000000e+00> : vector<16x32xf32>
    %554 = tpu.matmul %549, %551, %cst_261 {dimension_numbers = #tpu.dot_dimension_numbers<[1], [0], [0], [1], [0, 0, 1, 1], [], []>} : vector<16x32xf32>, vector<32x32xf32>, vector<16x32xf32> -> vector<16x32xf32>
    %555 = vector.shape_cast %553 : vector<32xf32> to vector<1x32xf32>
    %556 = vector.broadcast %555 : vector<1x32xf32> to vector<16x32xf32>
    %557 = arith.addf %554, %556 : vector<16x32xf32>
    %558 = vector.shape_cast %557 : vector<16x32xf32> to vector<2x8x32xf32>
    %559 = vector.extract_strided_slice %538 {offsets = [0, 0, 0], sizes = [2, 8, 8], strides = [1, 1, 1]} : vector<2x8x32xf32> to vector<2x8x8xf32>
    %560 = vector.extract_strided_slice %548 {offsets = [0, 0, 0], sizes = [2, 8, 8], strides = [1, 1, 1]} : vector<2x8x32xf32> to vector<2x8x8xf32>
    "tpu.trace_start"() <{level = 10 : i32, message = "bqd,bkd->bqk"}> : () -> ()
    %cst_262 = arith.constant dense<0.000000e+00> : vector<2x8x8xf32>
    %561 = tpu.matmul %559, %560, %cst_262 {dimension_numbers = #tpu.dot_dimension_numbers<[2], [2], [1], [1], [0, 0, 0, 1, 1, 1], [0], [0]>} : vector<2x8x8xf32>, vector<2x8x8xf32>, vector<2x8x8xf32> -> vector<2x8x8xf32>
    "tpu.trace_stop"() : () -> ()
    %cst_263 = arith.constant dense<0xFF800000> : vector<2x8xf32>
    %562 = vector.multi_reduction <maximumf>, %561, %cst_263 [2] : vector<2x8x8xf32> to vector<2x8xf32>
    %563 = vector.shape_cast %562 : vector<2x8xf32> to vector<2x8x1xf32>
    %564 = vector.broadcast %563 : vector<2x8x1xf32> to vector<2x8x8xf32>
    %565 = arith.subf %561, %564 : vector<2x8x8xf32>
    %566 = math.exp %565 : vector<2x8x8xf32>
    %cst_264 = arith.constant dense<0.000000e+00> : vector<2x8xf32>
    %567 = vector.multi_reduction <add>, %566, %cst_264 [2] : vector<2x8x8xf32> to vector<2x8xf32>
    %568 = vector.shape_cast %567 : vector<2x8xf32> to vector<2x8x1xf32>
    %569 = vector.broadcast %568 : vector<2x8x1xf32> to vector<2x8x8xf32>
    %570 = arith.divf %566, %569 : vector<2x8x8xf32>
    %571 = vector.extract_strided_slice %558 {offsets = [0, 0, 0], sizes = [2, 8, 8], strides = [1, 1, 1]} : vector<2x8x32xf32> to vector<2x8x8xf32>
    "tpu.trace_start"() <{level = 10 : i32, message = "bqk,bkd->bqd"}> : () -> ()
    %cst_265 = arith.constant dense<0.000000e+00> : vector<2x8x8xf32>
    %572 = tpu.matmul %570, %571, %cst_265 {dimension_numbers = #tpu.dot_dimension_numbers<[2], [1], [1], [2], [0, 0, 0, 1, 1, 2], [0], [0]>} : vector<2x8x8xf32>, vector<2x8x8xf32>, vector<2x8x8xf32> -> vector<2x8x8xf32>
    "tpu.trace_stop"() : () -> ()
    %573 = vector.extract_strided_slice %538 {offsets = [0, 0, 8], sizes = [2, 8, 8], strides = [1, 1, 1]} : vector<2x8x32xf32> to vector<2x8x8xf32>
    %574 = vector.extract_strided_slice %548 {offsets = [0, 0, 8], sizes = [2, 8, 8], strides = [1, 1, 1]} : vector<2x8x32xf32> to vector<2x8x8xf32>
    "tpu.trace_start"() <{level = 10 : i32, message = "bqd,bkd->bqk"}> : () -> ()
    %cst_266 = arith.constant dense<0.000000e+00> : vector<2x8x8xf32>
    %575 = tpu.matmul %573, %574, %cst_266 {dimension_numbers = #tpu.dot_dimension_numbers<[2], [2], [1], [1], [0, 0, 0, 1, 1, 1], [0], [0]>} : vector<2x8x8xf32>, vector<2x8x8xf32>, vector<2x8x8xf32> -> vector<2x8x8xf32>
    "tpu.trace_stop"() : () -> ()
    %cst_267 = arith.constant dense<0xFF800000> : vector<2x8xf32>
    %576 = vector.multi_reduction <maximumf>, %575, %cst_267 [2] : vector<2x8x8xf32> to vector<2x8xf32>
    %577 = vector.shape_cast %576 : vector<2x8xf32> to vector<2x8x1xf32>
    %578 = vector.broadcast %577 : vector<2x8x1xf32> to vector<2x8x8xf32>
    %579 = arith.subf %575, %578 : vector<2x8x8xf32>
    %580 = math.exp %579 : vector<2x8x8xf32>
    %cst_268 = arith.constant dense<0.000000e+00> : vector<2x8xf32>
    %581 = vector.multi_reduction <add>, %580, %cst_268 [2] : vector<2x8x8xf32> to vector<2x8xf32>
    %582 = vector.shape_cast %581 : vector<2x8xf32> to vector<2x8x1xf32>
    %583 = vector.broadcast %582 : vector<2x8x1xf32> to vector<2x8x8xf32>
    %584 = arith.divf %580, %583 : vector<2x8x8xf32>
    %585 = vector.extract_strided_slice %558 {offsets = [0, 0, 8], sizes = [2, 8, 8], strides = [1, 1, 1]} : vector<2x8x32xf32> to vector<2x8x8xf32>
    "tpu.trace_start"() <{level = 10 : i32, message = "bqk,bkd->bqd"}> : () -> ()
    %cst_269 = arith.constant dense<0.000000e+00> : vector<2x8x8xf32>
    %586 = tpu.matmul %584, %585, %cst_269 {dimension_numbers = #tpu.dot_dimension_numbers<[2], [1], [1], [2], [0, 0, 0, 1, 1, 2], [0], [0]>} : vector<2x8x8xf32>, vector<2x8x8xf32>, vector<2x8x8xf32> -> vector<2x8x8xf32>
    "tpu.trace_stop"() : () -> ()
    %587 = vector.extract_strided_slice %538 {offsets = [0, 0, 16], sizes = [2, 8, 8], strides = [1, 1, 1]} : vector<2x8x32xf32> to vector<2x8x8xf32>
    %588 = vector.extract_strided_slice %548 {offsets = [0, 0, 16], sizes = [2, 8, 8], strides = [1, 1, 1]} : vector<2x8x32xf32> to vector<2x8x8xf32>
    "tpu.trace_start"() <{level = 10 : i32, message = "bqd,bkd->bqk"}> : () -> ()
    %cst_270 = arith.constant dense<0.000000e+00> : vector<2x8x8xf32>
    %589 = tpu.matmul %587, %588, %cst_270 {dimension_numbers = #tpu.dot_dimension_numbers<[2], [2], [1], [1], [0, 0, 0, 1, 1, 1], [0], [0]>} : vector<2x8x8xf32>, vector<2x8x8xf32>, vector<2x8x8xf32> -> vector<2x8x8xf32>
    "tpu.trace_stop"() : () -> ()
    %cst_271 = arith.constant dense<0xFF800000> : vector<2x8xf32>
    %590 = vector.multi_reduction <maximumf>, %589, %cst_271 [2] : vector<2x8x8xf32> to vector<2x8xf32>
    %591 = vector.shape_cast %590 : vector<2x8xf32> to vector<2x8x1xf32>
    %592 = vector.broadcast %591 : vector<2x8x1xf32> to vector<2x8x8xf32>
    %593 = arith.subf %589, %592 : vector<2x8x8xf32>
    %594 = math.exp %593 : vector<2x8x8xf32>
    %cst_272 = arith.constant dense<0.000000e+00> : vector<2x8xf32>
    %595 = vector.multi_reduction <add>, %594, %cst_272 [2] : vector<2x8x8xf32> to vector<2x8xf32>
    %596 = vector.shape_cast %595 : vector<2x8xf32> to vector<2x8x1xf32>
    %597 = vector.broadcast %596 : vector<2x8x1xf32> to vector<2x8x8xf32>
    %598 = arith.divf %594, %597 : vector<2x8x8xf32>
    %599 = vector.extract_strided_slice %558 {offsets = [0, 0, 16], sizes = [2, 8, 8], strides = [1, 1, 1]} : vector<2x8x32xf32> to vector<2x8x8xf32>
    "tpu.trace_start"() <{level = 10 : i32, message = "bqk,bkd->bqd"}> : () -> ()
    %cst_273 = arith.constant dense<0.000000e+00> : vector<2x8x8xf32>
    %600 = tpu.matmul %598, %599, %cst_273 {dimension_numbers = #tpu.dot_dimension_numbers<[2], [1], [1], [2], [0, 0, 0, 1, 1, 2], [0], [0]>} : vector<2x8x8xf32>, vector<2x8x8xf32>, vector<2x8x8xf32> -> vector<2x8x8xf32>
    "tpu.trace_stop"() : () -> ()
    %601 = vector.extract_strided_slice %538 {offsets = [0, 0, 24], sizes = [2, 8, 8], strides = [1, 1, 1]} : vector<2x8x32xf32> to vector<2x8x8xf32>
    %602 = vector.extract_strided_slice %548 {offsets = [0, 0, 24], sizes = [2, 8, 8], strides = [1, 1, 1]} : vector<2x8x32xf32> to vector<2x8x8xf32>
    "tpu.trace_start"() <{level = 10 : i32, message = "bqd,bkd->bqk"}> : () -> ()
    %cst_274 = arith.constant dense<0.000000e+00> : vector<2x8x8xf32>
    %603 = tpu.matmul %601, %602, %cst_274 {dimension_numbers = #tpu.dot_dimension_numbers<[2], [2], [1], [1], [0, 0, 0, 1, 1, 1], [0], [0]>} : vector<2x8x8xf32>, vector<2x8x8xf32>, vector<2x8x8xf32> -> vector<2x8x8xf32>
    "tpu.trace_stop"() : () -> ()
    %cst_275 = arith.constant dense<0xFF800000> : vector<2x8xf32>
    %604 = vector.multi_reduction <maximumf>, %603, %cst_275 [2] : vector<2x8x8xf32> to vector<2x8xf32>
    %605 = vector.shape_cast %604 : vector<2x8xf32> to vector<2x8x1xf32>
    %606 = vector.broadcast %605 : vector<2x8x1xf32> to vector<2x8x8xf32>
    %607 = arith.subf %603, %606 : vector<2x8x8xf32>
    %608 = math.exp %607 : vector<2x8x8xf32>
    %cst_276 = arith.constant dense<0.000000e+00> : vector<2x8xf32>
    %609 = vector.multi_reduction <add>, %608, %cst_276 [2] : vector<2x8x8xf32> to vector<2x8xf32>
    %610 = vector.shape_cast %609 : vector<2x8xf32> to vector<2x8x1xf32>
    %611 = vector.broadcast %610 : vector<2x8x1xf32> to vector<2x8x8xf32>
    %612 = arith.divf %608, %611 : vector<2x8x8xf32>
    %613 = vector.extract_strided_slice %558 {offsets = [0, 0, 24], sizes = [2, 8, 8], strides = [1, 1, 1]} : vector<2x8x32xf32> to vector<2x8x8xf32>
    "tpu.trace_start"() <{level = 10 : i32, message = "bqk,bkd->bqd"}> : () -> ()
    %cst_277 = arith.constant dense<0.000000e+00> : vector<2x8x8xf32>
    %614 = tpu.matmul %612, %613, %cst_277 {dimension_numbers = #tpu.dot_dimension_numbers<[2], [1], [1], [2], [0, 0, 0, 1, 1, 2], [0], [0]>} : vector<2x8x8xf32>, vector<2x8x8xf32>, vector<2x8x8xf32> -> vector<2x8x8xf32>
    "tpu.trace_stop"() : () -> ()
    %615 = tpu.concatenate %572, %586, %600, %614 in 2 : vector<2x8x8xf32>, vector<2x8x8xf32>, vector<2x8x8xf32>, vector<2x8x8xf32> -> vector<2x8x32xf32>
    %616 = vector.shape_cast %615 : vector<2x8x32xf32> to vector<16x32xf32>
    %c0_278 = arith.constant 0 : index
    %c15 = arith.constant 15 : index
    %c0_279 = arith.constant 0 : index
    %c0_280 = arith.constant 0 : index
    %617 = vector.load %arg10[%c0_278, %c15, %c0_279, %c0_280] : memref<1x16x32x32xf32, #tpu.memory_space<vmem>>, vector<1x1x32x32xf32>
    %618 = vector.shape_cast %617 : vector<1x1x32x32xf32> to vector<32x32xf32>
    %c0_281 = arith.constant 0 : index
    %c15_282 = arith.constant 15 : index
    %c0_283 = arith.constant 0 : index
    %619 = vector.load %arg11[%c0_281, %c15_282, %c0_283] : memref<1x16x32xf32, #tpu.memory_space<vmem>>, vector<1x1x32xf32>
    %620 = vector.shape_cast %619 : vector<1x1x32xf32> to vector<32xf32>
    %cst_284 = arith.constant dense<0.000000e+00> : vector<16x32xf32>
    %621 = tpu.matmul %616, %618, %cst_284 {dimension_numbers = #tpu.dot_dimension_numbers<[1], [0], [0], [1], [0, 0, 1, 1], [], []>} : vector<16x32xf32>, vector<32x32xf32>, vector<16x32xf32> -> vector<16x32xf32>
    %622 = vector.shape_cast %620 : vector<32xf32> to vector<1x32xf32>
    %623 = vector.broadcast %622 : vector<1x32xf32> to vector<16x32xf32>
    %624 = arith.addf %621, %623 : vector<16x32xf32>
    %625 = vector.shape_cast %624 : vector<16x32xf32> to vector<2x8x32xf32>
    %626 = arith.addf %526, %625 : vector<2x8x32xf32>
    %cst_285 = arith.constant dense<0.000000e+00> : vector<2x8xf32>
    %627 = vector.multi_reduction <add>, %626, %cst_285 [2] : vector<2x8x32xf32> to vector<2x8xf32>
    %628 = vector.shape_cast %627 : vector<2x8xf32> to vector<2x8x1xf32>
    %cst_286 = arith.constant 3.200000e+01 : f32
    %629 = vector.broadcast %cst_286 : f32 to vector<2x8x1xf32>
    %630 = arith.divf %628, %629 : vector<2x8x1xf32>
    %631 = vector.broadcast %630 : vector<2x8x1xf32> to vector<2x8x32xf32>
    %632 = arith.subf %626, %631 : vector<2x8x32xf32>
    %633 = arith.mulf %632, %632 : vector<2x8x32xf32>
    %cst_287 = arith.constant dense<0.000000e+00> : vector<2x8xf32>
    %634 = vector.multi_reduction <add>, %633, %cst_287 [2] : vector<2x8x32xf32> to vector<2x8xf32>
    %635 = vector.shape_cast %634 : vector<2x8xf32> to vector<2x8x1xf32>
    %cst_288 = arith.constant 3.200000e+01 : f32
    %636 = vector.broadcast %cst_288 : f32 to vector<2x8x1xf32>
    %637 = arith.divf %635, %636 : vector<2x8x1xf32>
    %638 = vector.broadcast %630 : vector<2x8x1xf32> to vector<2x8x32xf32>
    %639 = arith.subf %626, %638 : vector<2x8x32xf32>
    %cst_289 = arith.constant 9.99999974E-6 : f32
    %640 = vector.broadcast %cst_289 : f32 to vector<2x8x1xf32>
    %641 = arith.addf %637, %640 : vector<2x8x1xf32>
    %642 = math.rsqrt %641 : vector<2x8x1xf32>
    %643 = vector.broadcast %642 : vector<2x8x1xf32> to vector<2x8x32xf32>
    %644 = arith.mulf %639, %643 : vector<2x8x32xf32>
    %c0_290 = arith.constant 0 : index
    %c5_291 = arith.constant 5 : index
    %c0_292 = arith.constant 0 : index
    %645 = vector.load %arg16[%c0_290, %c5_291, %c0_292] : memref<1x8x32xf32, #tpu.memory_space<vmem>>, vector<1x1x32xf32>
    %646 = vector.shape_cast %645 : vector<1x1x32xf32> to vector<32xf32>
    %647 = vector.shape_cast %646 : vector<32xf32> to vector<1x1x32xf32>
    %648 = vector.broadcast %647 : vector<1x1x32xf32> to vector<2x8x32xf32>
    %649 = arith.mulf %644, %648 : vector<2x8x32xf32>
    %c0_293 = arith.constant 0 : index
    %c5_294 = arith.constant 5 : index
    %c0_295 = arith.constant 0 : index
    %650 = vector.load %arg17[%c0_293, %c5_294, %c0_295] : memref<1x8x32xf32, #tpu.memory_space<vmem>>, vector<1x1x32xf32>
    %651 = vector.shape_cast %650 : vector<1x1x32xf32> to vector<32xf32>
    %652 = vector.shape_cast %651 : vector<32xf32> to vector<1x1x32xf32>
    %653 = vector.broadcast %652 : vector<1x1x32xf32> to vector<2x8x32xf32>
    %654 = arith.addf %649, %653 : vector<2x8x32xf32>
    %655 = vector.shape_cast %654 : vector<2x8x32xf32> to vector<16x32xf32>
    %c0_296 = arith.constant 0 : index
    %c1_297 = arith.constant 1 : index
    %c0_298 = arith.constant 0 : index
    %c0_299 = arith.constant 0 : index
    %656 = vector.load %arg12[%c0_296, %c1_297, %c0_298, %c0_299] : memref<1x2x32x64xf32, #tpu.memory_space<vmem>>, vector<1x1x32x64xf32>
    %657 = vector.shape_cast %656 : vector<1x1x32x64xf32> to vector<32x64xf32>
    %c0_300 = arith.constant 0 : index
    %c1_301 = arith.constant 1 : index
    %c0_302 = arith.constant 0 : index
    %658 = vector.load %arg13[%c0_300, %c1_301, %c0_302] : memref<1x2x64xf32, #tpu.memory_space<vmem>>, vector<1x1x64xf32>
    %659 = vector.shape_cast %658 : vector<1x1x64xf32> to vector<64xf32>
    %cst_303 = arith.constant dense<0.000000e+00> : vector<16x64xf32>
    %660 = tpu.matmul %655, %657, %cst_303 {dimension_numbers = #tpu.dot_dimension_numbers<[1], [0], [0], [1], [0, 0, 1, 1], [], []>} : vector<16x32xf32>, vector<32x64xf32>, vector<16x64xf32> -> vector<16x64xf32>
    %661 = vector.shape_cast %659 : vector<64xf32> to vector<1x64xf32>
    %662 = vector.broadcast %661 : vector<1x64xf32> to vector<16x64xf32>
    %663 = arith.addf %660, %662 : vector<16x64xf32>
    %cst_304 = arith.constant 0.000000e+00 : f32
    %664 = vector.broadcast %cst_304 : f32 to vector<16x64xf32>
    %665 = arith.maximumf %663, %664 : vector<16x64xf32>
    %c0_305 = arith.constant 0 : index
    %c1_306 = arith.constant 1 : index
    %c0_307 = arith.constant 0 : index
    %c0_308 = arith.constant 0 : index
    %666 = vector.load %arg14[%c0_305, %c1_306, %c0_307, %c0_308] : memref<1x2x64x32xf32, #tpu.memory_space<vmem>>, vector<1x1x64x32xf32>
    %667 = vector.shape_cast %666 : vector<1x1x64x32xf32> to vector<64x32xf32>
    %c0_309 = arith.constant 0 : index
    %c1_310 = arith.constant 1 : index
    %c0_311 = arith.constant 0 : index
    %668 = vector.load %arg15[%c0_309, %c1_310, %c0_311] : memref<1x2x32xf32, #tpu.memory_space<vmem>>, vector<1x1x32xf32>
    %669 = vector.shape_cast %668 : vector<1x1x32xf32> to vector<32xf32>
    %cst_312 = arith.constant dense<0.000000e+00> : vector<16x32xf32>
    %670 = tpu.matmul %665, %667, %cst_312 {dimension_numbers = #tpu.dot_dimension_numbers<[1], [0], [0], [1], [0, 0, 1, 1], [], []>} : vector<16x64xf32>, vector<64x32xf32>, vector<16x32xf32> -> vector<16x32xf32>
    %671 = vector.shape_cast %669 : vector<32xf32> to vector<1x32xf32>
    %672 = vector.broadcast %671 : vector<1x32xf32> to vector<16x32xf32>
    %673 = arith.addf %670, %672 : vector<16x32xf32>
    %674 = vector.shape_cast %673 : vector<16x32xf32> to vector<2x8x32xf32>
    %675 = arith.addf %654, %674 : vector<2x8x32xf32>
    %cst_313 = arith.constant dense<0.000000e+00> : vector<2x8xf32>
    %676 = vector.multi_reduction <add>, %675, %cst_313 [2] : vector<2x8x32xf32> to vector<2x8xf32>
    %677 = vector.shape_cast %676 : vector<2x8xf32> to vector<2x8x1xf32>
    %cst_314 = arith.constant 3.200000e+01 : f32
    %678 = vector.broadcast %cst_314 : f32 to vector<2x8x1xf32>
    %679 = arith.divf %677, %678 : vector<2x8x1xf32>
    %680 = vector.broadcast %679 : vector<2x8x1xf32> to vector<2x8x32xf32>
    %681 = arith.subf %675, %680 : vector<2x8x32xf32>
    %682 = arith.mulf %681, %681 : vector<2x8x32xf32>
    %cst_315 = arith.constant dense<0.000000e+00> : vector<2x8xf32>
    %683 = vector.multi_reduction <add>, %682, %cst_315 [2] : vector<2x8x32xf32> to vector<2x8xf32>
    %684 = vector.shape_cast %683 : vector<2x8xf32> to vector<2x8x1xf32>
    %cst_316 = arith.constant 3.200000e+01 : f32
    %685 = vector.broadcast %cst_316 : f32 to vector<2x8x1xf32>
    %686 = arith.divf %684, %685 : vector<2x8x1xf32>
    %687 = vector.broadcast %679 : vector<2x8x1xf32> to vector<2x8x32xf32>
    %688 = arith.subf %675, %687 : vector<2x8x32xf32>
    %cst_317 = arith.constant 9.99999974E-6 : f32
    %689 = vector.broadcast %cst_317 : f32 to vector<2x8x1xf32>
    %690 = arith.addf %686, %689 : vector<2x8x1xf32>
    %691 = math.rsqrt %690 : vector<2x8x1xf32>
    %692 = vector.broadcast %691 : vector<2x8x1xf32> to vector<2x8x32xf32>
    %693 = arith.mulf %688, %692 : vector<2x8x32xf32>
    %c0_318 = arith.constant 0 : index
    %c6_319 = arith.constant 6 : index
    %c0_320 = arith.constant 0 : index
    %694 = vector.load %arg16[%c0_318, %c6_319, %c0_320] : memref<1x8x32xf32, #tpu.memory_space<vmem>>, vector<1x1x32xf32>
    %695 = vector.shape_cast %694 : vector<1x1x32xf32> to vector<32xf32>
    %696 = vector.shape_cast %695 : vector<32xf32> to vector<1x1x32xf32>
    %697 = vector.broadcast %696 : vector<1x1x32xf32> to vector<2x8x32xf32>
    %698 = arith.mulf %693, %697 : vector<2x8x32xf32>
    %c0_321 = arith.constant 0 : index
    %c6_322 = arith.constant 6 : index
    %c0_323 = arith.constant 0 : index
    %699 = vector.load %arg17[%c0_321, %c6_322, %c0_323] : memref<1x8x32xf32, #tpu.memory_space<vmem>>, vector<1x1x32xf32>
    %700 = vector.shape_cast %699 : vector<1x1x32xf32> to vector<32xf32>
    %701 = vector.shape_cast %700 : vector<32xf32> to vector<1x1x32xf32>
    %702 = vector.broadcast %701 : vector<1x1x32xf32> to vector<2x8x32xf32>
    %703 = arith.addf %698, %702 : vector<2x8x32xf32>
    %cst_324 = arith.constant dense<0.000000e+00> : vector<2x8xf32>
    %704 = vector.multi_reduction <add>, %703, %cst_324 [2] : vector<2x8x32xf32> to vector<2x8xf32>
    %705 = vector.shape_cast %704 : vector<2x8xf32> to vector<2x8x1xf32>
    %cst_325 = arith.constant 3.200000e+01 : f32
    %706 = vector.broadcast %cst_325 : f32 to vector<2x8x1xf32>
    %707 = arith.divf %705, %706 : vector<2x8x1xf32>
    %708 = vector.broadcast %707 : vector<2x8x1xf32> to vector<2x8x32xf32>
    %709 = arith.subf %703, %708 : vector<2x8x32xf32>
    %710 = arith.mulf %709, %709 : vector<2x8x32xf32>
    %cst_326 = arith.constant dense<0.000000e+00> : vector<2x8xf32>
    %711 = vector.multi_reduction <add>, %710, %cst_326 [2] : vector<2x8x32xf32> to vector<2x8xf32>
    %712 = vector.shape_cast %711 : vector<2x8xf32> to vector<2x8x1xf32>
    %cst_327 = arith.constant 3.200000e+01 : f32
    %713 = vector.broadcast %cst_327 : f32 to vector<2x8x1xf32>
    %714 = arith.divf %712, %713 : vector<2x8x1xf32>
    %715 = vector.broadcast %707 : vector<2x8x1xf32> to vector<2x8x32xf32>
    %716 = arith.subf %703, %715 : vector<2x8x32xf32>
    %cst_328 = arith.constant 9.99999974E-6 : f32
    %717 = vector.broadcast %cst_328 : f32 to vector<2x8x1xf32>
    %718 = arith.addf %714, %717 : vector<2x8x1xf32>
    %719 = math.rsqrt %718 : vector<2x8x1xf32>
    %720 = vector.broadcast %719 : vector<2x8x1xf32> to vector<2x8x32xf32>
    %721 = arith.mulf %716, %720 : vector<2x8x32xf32>
    %c0_329 = arith.constant 0 : index
    %c7_330 = arith.constant 7 : index
    %c0_331 = arith.constant 0 : index
    %722 = vector.load %arg16[%c0_329, %c7_330, %c0_331] : memref<1x8x32xf32, #tpu.memory_space<vmem>>, vector<1x1x32xf32>
    %723 = vector.shape_cast %722 : vector<1x1x32xf32> to vector<32xf32>
    %724 = vector.shape_cast %723 : vector<32xf32> to vector<1x1x32xf32>
    %725 = vector.broadcast %724 : vector<1x1x32xf32> to vector<2x8x32xf32>
    %726 = arith.mulf %721, %725 : vector<2x8x32xf32>
    %c0_332 = arith.constant 0 : index
    %c7_333 = arith.constant 7 : index
    %c0_334 = arith.constant 0 : index
    %727 = vector.load %arg17[%c0_332, %c7_333, %c0_334] : memref<1x8x32xf32, #tpu.memory_space<vmem>>, vector<1x1x32xf32>
    %728 = vector.shape_cast %727 : vector<1x1x32xf32> to vector<32xf32>
    %729 = vector.shape_cast %728 : vector<32xf32> to vector<1x1x32xf32>
    %730 = vector.broadcast %729 : vector<1x1x32xf32> to vector<2x8x32xf32>
    %731 = arith.addf %726, %730 : vector<2x8x32xf32>
    %732 = vector.shape_cast %731 : vector<2x8x32xf32> to vector<16x32xf32>
    %c0_335 = arith.constant 0 : index
    %c0_336 = arith.constant 0 : index
    %c0_337 = arith.constant 0 : index
    %733 = vector.load %arg18[%c0_335, %c0_336, %c0_337] : memref<1x32x8xf32, #tpu.memory_space<vmem>>, vector<1x32x8xf32>
    %734 = vector.shape_cast %733 : vector<1x32x8xf32> to vector<32x8xf32>
    %c0_338 = arith.constant 0 : index
    %c0_339 = arith.constant 0 : index
    %c0_340 = arith.constant 0 : index
    %735 = vector.load %arg19[%c0_338, %c0_339, %c0_340] : memref<1x1x8xf32, #tpu.memory_space<vmem>>, vector<1x1x8xf32>
    %736 = vector.shape_cast %735 : vector<1x1x8xf32> to vector<1x8xf32>
    %cst_341 = arith.constant dense<0.000000e+00> : vector<16x8xf32>
    %737 = tpu.matmul %732, %734, %cst_341 {dimension_numbers = #tpu.dot_dimension_numbers<[1], [0], [0], [1], [0, 0, 1, 1], [], []>} : vector<16x32xf32>, vector<32x8xf32>, vector<16x8xf32> -> vector<16x8xf32>
    %738 = vector.broadcast %736 : vector<1x8xf32> to vector<16x8xf32>
    %739 = arith.addf %737, %738 : vector<16x8xf32>
    %740 = vector.shape_cast %739 : vector<16x8xf32> to vector<2x8x8xf32>
    %c0_342 = arith.constant 0 : index
    %c0_343 = arith.constant 0 : index
    %c0_344 = arith.constant 0 : index
    %c0_345 = arith.constant 0 : index
    %741 = vector.load %arg20[%c0_342, %c0_343, %c0_344, %c0_345] : memref<1x2x8x8xf32, #tpu.memory_space<vmem>>, vector<1x2x8x8xf32>
    %742 = vector.shape_cast %741 : vector<1x2x8x8xf32> to vector<2x8x8xf32>
    %743 = vector.shape_cast %740 : vector<2x8x8xf32> to vector<1x2x8x8xf32>
    tpu.vector_store %arg20[%c0_342, %c0_343, %c0_344, %c0_345], %743 {strides = array<i32>} : memref<1x2x8x8xf32, #tpu.memory_space<vmem>>, vector<1x2x8x8xf32>,
    return
  }
  func.func @transform_0(%arg0: i32) -> (i32, i32, i32) {
    %c0_i32 = arith.constant 0 : i32
    %c0_i32_0 = arith.constant 0 : i32
    %c0_i32_1 = arith.constant 0 : i32
    %c0_i32_2 = arith.constant 0 : i32
    return %c0_i32, %c0_i32_0, %c0_i32_1 : i32, i32, i32
  }
  func.func @transform_1(%arg0: i32) -> (i32, i32) {
    %c0_i32 = arith.constant 0 : i32
    %c0_i32_0 = arith.constant 0 : i32
    %c0_i32_1 = arith.constant 0 : i32
    return %c0_i32, %c0_i32_0 : i32, i32
  }
  func.func @transform_2(%arg0: i32) -> (i32, i32) {
    %c0_i32 = arith.constant 0 : i32
    %c0_i32_0 = arith.constant 0 : i32
    %c0_i32_1 = arith.constant 0 : i32
    return %c0_i32, %c0_i32_0 : i32, i32
  }
  func.func @transform_3(%arg0: i32) -> (i32, i32) {
    %c0_i32 = arith.constant 0 : i32
    %c0_i32_0 = arith.constant 0 : i32
    %c0_i32_1 = arith.constant 0 : i32
    return %c0_i32, %c0_i32_0 : i32, i32
  }
  func.func @transform_4(%arg0: i32) -> (i32, i32) {
    %c0_i32 = arith.constant 0 : i32
    %c0_i32_0 = arith.constant 0 : i32
    %c0_i32_1 = arith.constant 0 : i32
    return %c0_i32, %c0_i32_0 : i32, i32
  }
  func.func @transform_5(%arg0: i32) -> (i32, i32) {
    %c0_i32 = arith.constant 0 : i32
    %c0_i32_0 = arith.constant 0 : i32
    %c0_i32_1 = arith.constant 0 : i32
    return %c0_i32, %c0_i32_0 : i32, i32
  }
  func.func @transform_6(%arg0: i32) -> (i32, i32, i32, i32) {
    %c0_i32 = arith.constant 0 : i32
    %c0_i32_0 = arith.constant 0 : i32
    %c0_i32_1 = arith.constant 0 : i32
    %c0_i32_2 = arith.constant 0 : i32
    return %arg0, %c0_i32, %c0_i32_0, %c0_i32_1 : i32, i32, i32, i32
  }
  func.func @transform_7(%arg0: i32) -> (i32, i32, i32) {
    %c0_i32 = arith.constant 0 : i32
    %c0_i32_0 = arith.constant 0 : i32
    %c0_i32_1 = arith.constant 0 : i32
    return %arg0, %c0_i32, %c0_i32_0 : i32, i32, i32
  }
  func.func @transform_8(%arg0: i32) -> (i32, i32, i32) {
    %c0_i32 = arith.constant 0 : i32
    %c0_i32_0 = arith.constant 0 : i32
    %c0_i32_1 = arith.constant 0 : i32
    return %arg0, %c0_i32, %c0_i32_0 : i32, i32, i32
  }
  func.func @transform_9(%arg0: i32) -> (i32, i32, i32, i32) {
    %c0_i32 = arith.constant 0 : i32
    %c0_i32_0 = arith.constant 0 : i32
    %c0_i32_1 = arith.constant 0 : i32
    %c0_i32_2 = arith.constant 0 : i32
    return %arg0, %c0_i32, %c0_i32_0, %c0_i32_1 : i32, i32, i32, i32
  }
  func.func @transform_10(%arg0: i32) -> (i32, i32, i32) {
    %c0_i32 = arith.constant 0 : i32
    %c0_i32_0 = arith.constant 0 : i32
    %c0_i32_1 = arith.constant 0 : i32
    return %arg0, %c0_i32, %c0_i32_0 : i32, i32, i32
  }
  func.func @transform_11(%arg0: i32) -> (i32, i32, i32, i32) {
    %c0_i32 = arith.constant 0 : i32
    %c0_i32_0 = arith.constant 0 : i32
    %c0_i32_1 = arith.constant 0 : i32
    %c0_i32_2 = arith.constant 0 : i32
    return %arg0, %c0_i32, %c0_i32_0, %c0_i32_1 : i32, i32, i32, i32
  }
  func.func @transform_12(%arg0: i32) -> (i32, i32, i32) {
    %c0_i32 = arith.constant 0 : i32
    %c0_i32_0 = arith.constant 0 : i32
    %c0_i32_1 = arith.constant 0 : i32
    return %arg0, %c0_i32, %c0_i32_0 : i32, i32, i32
  }
  func.func @transform_13(%arg0: i32) -> (i32, i32, i32, i32) {
    %c0_i32 = arith.constant 0 : i32
    %c0_i32_0 = arith.constant 0 : i32
    %c0_i32_1 = arith.constant 0 : i32
    %c0_i32_2 = arith.constant 0 : i32
    return %arg0, %c0_i32, %c0_i32_0, %c0_i32_1 : i32, i32, i32, i32
  }
  func.func @transform_14(%arg0: i32) -> (i32, i32, i32) {
    %c0_i32 = arith.constant 0 : i32
    %c0_i32_0 = arith.constant 0 : i32
    %c0_i32_1 = arith.constant 0 : i32
    return %arg0, %c0_i32, %c0_i32_0 : i32, i32, i32
  }
  func.func @transform_15(%arg0: i32) -> (i32, i32, i32) {
    %c0_i32 = arith.constant 0 : i32
    %c0_i32_0 = arith.constant 0 : i32
    %c0_i32_1 = arith.constant 0 : i32
    return %arg0, %c0_i32, %c0_i32_0 : i32, i32, i32
  }
  func.func @transform_16(%arg0: i32) -> (i32, i32, i32) {
    %c0_i32 = arith.constant 0 : i32
    %c0_i32_0 = arith.constant 0 : i32
    %c0_i32_1 = arith.constant 0 : i32
    return %arg0, %c0_i32, %c0_i32_0 : i32, i32, i32
  }
  func.func @transform_17(%arg0: i32) -> (i32, i32, i32) {
    %c0_i32 = arith.constant 0 : i32
    %c0_i32_0 = arith.constant 0 : i32
    %c0_i32_1 = arith.constant 0 : i32
    return %arg0, %c0_i32, %c0_i32_0 : i32, i32, i32
  }
  func.func @transform_18(%arg0: i32) -> (i32, i32, i32) {
    %c0_i32 = arith.constant 0 : i32
    %c0_i32_0 = arith.constant 0 : i32
    %c0_i32_1 = arith.constant 0 : i32
    return %arg0, %c0_i32, %c0_i32_0 : i32, i32, i32
  }
  func.func @transform_19(%arg0: i32) -> (i32, i32, i32, i32) {
    %c0_i32 = arith.constant 0 : i32
    %c0_i32_0 = arith.constant 0 : i32
    %c0_i32_1 = arith.constant 0 : i32
    %c0_i32_2 = arith.constant 0 : i32
    return %arg0, %c0_i32, %c0_i32_0, %c0_i32_1 : i32, i32, i32, i32
  }
}

</mosaic_0001>

<bundles_post_ra>
// kernel: vac_longtext.1
= control target key start
LH: loop header
LB: loop body
LE: loop exit
PB: predicated region body
PF: predicated region fallthrough
CT: control target
= control target key end

     0   :  { %s7361_s0 = inlined_call_operand.vmem [shape: f32[2,16,32], index: 0, kind: input, shape index: {}]   ;;  %s7362_s1 = inlined_call_operand.vmem [shape: f32[3,32], index: 1, kind: input, shape index: {}]   ;;  %s7363_s2 = inlined_call_operand.<no memory space> [shape: f32[1,1], index: 2, kind: input, shape index: {}]   ;;  %s7364_s3 = inlined_call_operand.vmem [shape: f32[32,32], index: 3, kind: input, shape index: {}]   ;;  %s7365_s4 = inlined_call_operand.vmem [shape: f32[1,32], index: 4, kind: input, shape index: {}]   ;;  %s7366_s5 = inlined_call_operand.vmem [shape: f32[16,32], index: 5, kind: input, shape index: {}]   ;;  %s7367_s6 = inlined_call_operand.vmem [shape: f32[2,2,32,32], index: 6, kind: input, shape index: {}]   ;;  %s7368_s7 = inlined_call_operand.vmem [shape: f32[2,2,32], index: 7, kind: input, shape index: {}]   ;;  %s7369_s8 = inlined_call_operand.vmem [shape: f32[2,8,32], index: 8, kind: input, shape index: {}]   ;;  %s7370_s9 = inlined_call_operand.hbm [shape: f32[2,16,32,32], index: 9, kind: input, shape index: {}]   ;;  %s7371_s10 = inlined_call_operand.vmem [shape: f32[2,16,32], index: 10, kind: input, shape index: {}]   ;;  %s7372_s11 = inlined_call_operand.vmem [shape: f32[2,2,32,64], index: 11, kind: input, shape index: {}]   ;;  %s7373_s12 = inlined_call_operand.vmem [shape: f32[2,2,64], index: 12, kind: input, shape index: {}]   ;;  %s7374_s13 = inlined_call_operand.vmem [shape: f32[2,2,64,32], index: 13, kind: input, shape index: {}]   ;;  %s7375_s14 = inlined_call_operand.vmem [shape: f32[2,2,32], index: 14, kind: input, shape index: {}]   ;;  %s7376_s15 = inlined_call_operand.vmem [shape: f32[2,8,32], index: 15, kind: input, shape index: {}]   ;;  %s7377_s16 = inlined_call_operand.vmem [shape: f32[2,8,32], index: 16, kind: input, shape index: {}]   ;;  %s7378_s17 = inlined_call_operand.vmem [shape: f32[2,32,8], index: 17, kind: input, shape index: {}]   ;;  %s7379_s18 = inlined_call_operand.vmem [shape: f32[2,1,8], index: 18, kind: input, shape index: {}]   ;;  %s7380_s19 = inlined_call_operand.vmem [shape: f32[2,2,8,8], index: 19, kind: output, shape index: {}]  }
   0x1   :  { %7391 = sst [smem:[#allocation13_spill]] %s7361_s0 }
   0x2   :  { %7392 = sst [smem:[#allocation14_spill]] %s7362_s1 }
   0x3   :  { %7393 = sst [smem:[#allocation15_spill]] %s7363_s2 }
   0x4   :  { %7394 = sst [smem:[#allocation16_spill]] %s7364_s3 }
   0x5   :  { %7395 = sst [smem:[#allocation17_spill]] %s7365_s4 }
   0x6   :  { %7396 = sst [smem:[#allocation18_spill]] %s7366_s5 }
   0x7   :  { %7397 = sst [smem:[#allocation19_spill]] %s7367_s6 }
   0x8   :  { %7398 = sst [smem:[#allocation20_spill]] %s7368_s7 }
   0x9   :  { %7399 = sst [smem:[#allocation21_spill]] %s7370_s9 }
   0xa   :  { %7400 = sst [smem:[#allocation22_spill]] %s7371_s10 }
   0xb   :  { %7401 = sst [smem:[#allocation23_spill]] %s7372_s11 }
   0xc   :  { %7402 = sst [smem:[#allocation24_spill]] %s7373_s12 }
   0xd   :  { %7403 = sst [smem:[#allocation25_spill]] %s7374_s13 }
   0xe   :  { %7404 = sst [smem:[#allocation26_spill]] %s7375_s14 }
   0xf   :  { %7405 = sst [smem:[#allocation27_spill]] %s7376_s15 }
  0x10   :  { %7406 = sst [smem:[#allocation28_spill]] %s7380_s19 }
  0x11   :  { %s7407_s20 = sld [smem:[#allocation15_spill]] }
  0x17   :  { %24 = sst [smem:[#allocation3]] %s7407_s20 }
  0x18   :  { %25 = vsyncpa [#allocation5], 0 }
  0x19   :  { %27 = vsyncpa [#allocation5 + $0x1], 0  ;;  %s5988_s21 = smov 0   ;;  %s5990_s1 = smov 0  }
  0x1a   :  { %s5992_s22 = smov 0   ;;  %s5994_s2 = smov 0  }
  0x1b LB: > { %7408 = sst [smem:[#allocation7_spill]] %s5865_s1  ;;  %s6007_s23 = sadd.s32 4294967295, %s5873_s2   ;;  %s5873_s2 = sphi %s5994_s2, %s7469_s2   ;;  %s5869_s22 = sphi %s5992_s22, %s7472_s22   ;;  %s5865_s1 = sphi %s5990_s1, %s7471_s1   ;;  %s5861_s21 = sphi %s5988_s21, %s7470_s21  }
  0x1c   : > { %7409 = sst [smem:[#allocation8_spill]] %s5869_s22  ;;  %s6010_s24 = sadd.s32 1, %s5873_s2  }
  0x1d   : > { %7410 = sst [smem:[#allocation9_spill]] %s6010_s24  ;;  %s241_s25 = ssub.s32 %s5873_s2, %s6010_s24 }
  0x1e   : > { %s244_s3 = sadd.s32 1, %s5869_s22  ;;  %p242_p0 = scmp.eq.s32.totalorder %s241_s25, 0 }
  0x1f   : > { %p251_p1 = scmp.ne.s32.totalorder %s5869_s22, %s5865_s1  ;;  %p252_p2 = scmp.eq.s32.totalorder %s5873_s2, 0 }
  0x20   : > { %p257_p3 = scmp.ne.s32.totalorder %s5865_s1, %s5861_s21  ;;  %p258_p5 = scmp.eq.s32.totalorder %s6007_s23, 0 }
  0x21   : > { %s6020_s26 = scalar_select %p242_p0, %s5869_s22, %s244_s3  }
  0x22   : > { %p6022_p4 = por %p252_p2, %p251_p1  ;;  %p5492_p6 = scmp.lt.s32.totalorder %s5873_s2, 2 }
  0x23   : > { %7411 = sst [smem:[#allocation10_spill]] %s6020_s26  ;;  %p6030_p7 = por %p258_p5, %p257_p3 }
  0x24   : > { %s581_s29 = sand.u32 1, %s5869_s22   ;;  %s5463_s30 = sshll.u32 %s5873_s2, 9 }
  0x25   : > { %s5214_s0 = sshll.u32 %s581_s29, 9  ;;  %s7414_s9 = sld [smem:[#allocation21_spill]] }
  0x26   : > { %s585_s3 = scalar_lea.vmem [#allocation4], %s5214_s0  ;;  %p6041_p8 = pnand %p5492_p6, %p6022_p4 }
  0x27   : > { %s593_s26 = sshll.u32 %s585_s3, 4  ;;  %p5217_p9 = scmp.ge.s32.totalorder %s5873_s2, 1  ;;  %s594_s26 = int_to_ptr.vmem [resolvable:$true] %s593_s26 }
  0x28   : > { %s582_s4 = scalar_lea.sflag [#allocation5], %s581_s29  ;;  %p5813_p11 = pneg %p6041_p8 }
  0x2b   : > { %s590_s25 = scalar_lea.hbm %s7414_s9, %s5463_s30  ;;  %s5816_s20 = scalar_lea.hbm %s7414_s9, 1024 }
  0x2c   : > { %s591_s24 = sshll.u32 %s590_s25, 4  ;;  %s592_s24 = int_to_ptr.hbm [resolvable:$true] %s591_s24 }
  0x2d   : > { %s5809_s22 = sshra.s32 %s592_s24, 4  ;;  %s5810_s22 = int_to_ptr.hbm [resolvable:$true] %s5809_s22 }
  0x2e   : > { %s5811_s19 = scalar_lea.hbm %s5810_s22, 512  ;;  %p5817_p0 = scmp.lt.s32.totalorder %s5810_s22, %s7414_s9 }
  0x2f   : > { %p5812_p10 = scmp.ne.s32.totalorder %s5810_s22, %s5811_s19  ;;  %p5818_p1 = scmp.lt.s32.totalorder %s5816_s20, %s5811_s19 }
  0x31   : > { %p5814_p12 = pnand %p5813_p11, %p5812_p10  ;;  %p5819_p2 = por %p5818_p1, %p5817_p0 }
  0x33   : > { %p5815_p13 = pneg %p5814_p12 }
  0x35   : > { %p5820_p3 = pnand %p5819_p2, %p5815_p13 }
  0x37   : > { %5823 = shalt.err (!%p5820_p3)
}
  0x38   : > { %s5875_s29 = smov 128   ;;  %s5876_s25 = smov 8  }
  0x39   : > { %5491 = dma.hbm_to_vmem [thread:$0]  (!%p6041_p8), %s592_s24, 8192, %s594_s26, %s582_s4, %s5875_s29, %s5875_s29, %s5876_s25  }
  0x3a   : > { %p667_p4 = scmp.lt.s32.totalorder %s5873_s2, 3 }
  0x3c   : > { %p668_p6 = pnand %p5217_p9, %p667_p4 }
  0x3e   : > { %671 = sbr.rel (%p668_p6) target bundleno = 6589 (0x19bd), region = 96 }
  0x43   : > { %s673_s3 = sand.u32 1, %s5865_s1  }
  0x44   : > { %s5218_s0 = sshll.u32 %s673_s3, 9  ;;  %s674_s22 = scalar_lea.sflag [#allocation5], %s673_s3 }
  0x45   : > { %s6060_s19 = scalar_lea.vmem [#allocation4], %s5218_s0 }
  0x46   : > { %5856 = dma.done.wait (%p6030_p7), %s674_s22, 8192  }
  0x47   : > { %5858 = vsyncadd (%p6030_p7), %s674_s22, 4294959104  ;;  %p785_p10 = scmp.lt.s32.totalorder %s6007_s23, 1  ;;  %s7416_s6 = sld [smem:[#allocation19_spill]] }
  0x48   : > { %s7418_s7 = sld [smem:[#allocation20_spill]]  ;;  %p5237_p7 = scmp.ne.s32.totalorder %s6007_s23, 0 }
  0x49   : > { %s6068_s4 = scalar_select %p785_p10, %s6007_s23, 1 }
  0x4a   : > { %s7420_s0 = sld [smem:[#allocation13_spill]] }
  0x4b   : > { %s5464_s5 = sshll.u32 %s6068_s4, 6  ;;  %s5221_s2 = sshll.u32 %s6068_s4, 1 }
  0x4c   : > { %s6083_s21 = sshll.u32 %s6068_s4, 3  ;;  %s5465_s29 = sshll.u32 %s6068_s4, 4 }
  0x4d   : > { %s6075_s30 = scalar_lea.vmem %s7416_s6, %s5464_s5  ;;  %s7421_s10 = sld [smem:[#allocation22_spill]] }
  0x4e   : > { %7417 = sst [smem:[#allocation11_spill]] %s6075_s30  ;;  %s6080_s27 = scalar_lea.vmem %s7418_s7, %s5221_s2 }
  0x4f   : > { %7419 = sst [smem:[#allocation12_spill]] %s6080_s27  ;;  %s5467_s28 = sshll.u32 %s6068_s4, 7 }
  0x50   : > { %v6089_v0 = vld [vmem:[%s7420_s0] sm:$0xff]  ;;  %v6094_v1 = vld [vmem:[%s7420_s0 + $0x8] sm:$0xff]  ;;  %v6099_v2 = vld [vmem:[%s7420_s0 + $0x10] sm:$0xff]  ;;  %s7422_s11 = sld [smem:[#allocation23_spill]]  ;;  %s6146_s20 = scalar_lea.vmem %s7377_s16, %s6083_s21 }
  0x51   : > { %v6113_v3 = vld [vmem:[%s7420_s0 + $0x18] sm:$0xff]  ;;  %s7423_s12 = sld [smem:[#allocation24_spill]] }
  0x52   : > { %s7424_s14 = sld [smem:[#allocation26_spill]] }
  0x53   : > { %s6108_s25 = scalar_lea.vmem %s7421_s10, %s5465_s29  ;;  %s7425_s13 = sld [smem:[#allocation25_spill]] }
  0x54   : > { %s7426_s15 = sld [smem:[#allocation27_spill]] }
  0x55   : > { %s7427_s0 = sld [smem:[#allocation28_spill]] }
  0x56   : > { %s6118_s26 = scalar_lea.vmem %s7422_s11, %s5464_s5  ;;  %s5468_s11 = sshll.u32 %s6068_s4, 5 }
  0x57   : > { %s6123_s6 = scalar_lea.vmem %s7423_s12, %s5221_s2  ;;  %849 = sbr.rel (%p5237_p7) target bundleno = 293 (0x125), region = 104 }
  0x58   : > { %s6129_s1 = scalar_lea.vmem %s7424_s14, %s5221_s2  ;;  %s6152_s2 = scalar_lea.vmem %s7378_s17, %s5468_s11 }
  0x59   : > { %s6134_s3 = scalar_lea.vmem %s7425_s13, %s5467_s28  ;;  %s836_s28 = scalar_lea.vmem %s7379_s18, %s6068_s4 }
  0x5a   : > { %s6140_s5 = scalar_lea.vmem %s7426_s15, %s6083_s21  ;;  %s7428_s14 = sld [smem:[#allocation16_spill]] (!%p5237_p7) }
  0x5b   : > { %s6161_s22 = scalar_lea.vmem %s7427_s0, %s5465_s29  ;;  %s7429_s9 = sld [smem:[#allocation14_spill]] (!%p5237_p7) }
  0x5c   : > { %v987_v7 = vadd.f32 %v6099_v2, %v6089_v0  ;;  %v988_v11 = vadd.f32 %v6113_v3, %v6094_v1  ;;  %vm855_vm0 = vcmask 261120   ;;  %s903_s27 = sld [smem:[#allocation3]] }
  0x5d   : > { %s7430_s30 = sld [smem:[#allocation17_spill]] }
  0x5e   : > { %v993_v16 = vmul.f32 0.33333334, %v987_v7  ;;  %v994_v20 = vmul.f32 0.33333334, %v988_v11 }
  0x60   : > { %v1000_v4 = vld [vmem:[%s7428_s14 + $0x18] sm:$0xff]  ;;  %v999_v5 = vld [vmem:[%s7428_s14 + $0x10] sm:$0xff]  ;;  %v998_v8 = vld [vmem:[%s7428_s14 + $0x8] sm:$0xff] }
  0x61   : > { %5471 = vmatpush.msra.mxu2 %v1000_v4  ;;  %5472 = vmatpush.msra.mxu3 %v1000_v4  ;;  %v850_v6 = vld [vmem:[%s7429_s9] sm:$0x7] }
  0x62   : > { %1029 = vmatpush.msra.mxu0 %v1000_v4  ;;  %5470 = vmatpush.msra.mxu1 %v1000_v4  ;;  %v865_v9 = vperm.slane %v850_v6, 1  ;;  %v851_v10 = vperm.slane %v850_v6, 0  ;;  %v997_v15 = vld [vmem:[%s7428_s14] sm:$0xff]  ;;  %v886_v26 = vperm.slane %v850_v6, 2  ;;  %v904_v49 = vstv %s903_s27 }
  0x63   : > { %5474 = vmatpush.msra.mxu2 %v999_v5  ;;  %5475 = vmatpush.msra.mxu3 %v999_v5  ;;  %v5535_v42 = vld [vmem:[%s7430_s30] ss:$0 sm:$0xff] }
  0x64   : > { %1030 = vmatpush.msra.mxu0 %v999_v5  ;;  %5473 = vmatpush.msra.mxu1 %v999_v5  ;;  %v867_v12 = vmul.f32 %v865_v9, %v6094_v1  ;;  %v854_v13 = vmul.f32 %v851_v10, %v6094_v1  ;;  %v852_v14 = vmul.f32 0.0, %v851_v10  ;;  %v868_v21 = vmul.f32 %v865_v9, %v6099_v2 }
  0x65   : > { %5477 = vmatpush.msra.mxu2 %v998_v8  ;;  %5478 = vmatpush.msra.mxu3 %v998_v8  ;;  %v866_v22 = vmul.f32 %v865_v9, %v6089_v0  ;;  %v853_v23 = vmul.f32 %v851_v10, %v6089_v0  ;;  %v888_v28 = vmul.f32 %v886_v26, %v6113_v3  ;;  %v889_v34 = vmul.f32 0.0, %v886_v26 }
  0x66   : > { %v873_v17 = vsel %vm855_vm0, %v867_v12, 0.0  ;;  %v862_v18 = vsel %vm855_vm0, %v854_v13, 0.0  ;;  %v856_v19 = vsel %vm855_vm0, %v852_v14, 0.0  ;;  %1031 = vmatpush.msra.mxu0 %v998_v8  ;;  %5476 = vmatpush.msra.mxu1 %v998_v8  ;;  %v876_v24 = vsel %vm855_vm0, %v868_v21, 0.0 }
  0x67   : > { %874 = vadd.xlane.f32.xlu2 %v873_v17  ;;  %863 = vadd.xlane.f32.xlu1 %v862_v18  ;;  %v870_v25 = vsel %vm855_vm0, %v866_v22, 0.0  ;;  %v859_v27 = vsel %vm855_vm0, %v853_v23, 0.0  ;;  %v887_v29 = vmul.f32 %v886_v26, %v6099_v2  ;;  %v869_v30 = vmul.f32 %v865_v9, %v6113_v3 }
  0x68   : > { %857 = vadd.xlane.f32.xlu0 %v856_v19  ;;  %5480 = vmatpush.msra.mxu2 %v997_v15  ;;  %v893_v31 = vsel %vm855_vm0, %v888_v28, 0.0  ;;  %v896_v35 = vsel %vm855_vm0, %v889_v34, 0.0 }
  0x69   : > { %5481 = vmatpush.msra.mxu3 %v997_v15  ;;  %5240 = vmatmul.msk.f32.vlgmr.msra.gmra.mxu2 %vm855_vm0, %v993_v16  ;;  %v890_v32 = vsel %vm855_vm0, %v887_v29, 0.0  ;;  %v879_v33 = vsel %vm855_vm0, %v869_v30, 0.0 }
  0x6a   : > { %5241 = vmatmul.msk.f32.vlgmr.msra.gmra.mxu3 %vm855_vm0, %v994_v20  ;;  %1032 = vmatpush.msra.mxu0 %v997_v15 }
  0x6b   : > { %5479 = vmatpush.msra.mxu1 %v997_v15  ;;  %5238 = vmatmul.msk.f32.vlgmr.msra.gmra.mxu0 %vm855_vm0, %v993_v16 }
  0x6c   : > { %5239 = vmatmul.msk.f32.vlgmr.msra.gmra.mxu1 %vm855_vm0, %v994_v20 }
  0x6f   : > { %877 = vadd.xlane.f32.xlu2 %v876_v24  ;;  %871 = vadd.xlane.f32.xlu1 %v870_v25 }
  0x70   : > { %860 = vadd.xlane.f32.xlu0 %v859_v27 }
  0x77   : > { %894 = vadd.xlane.f32.xlu2 %v893_v31  ;;  %891 = vadd.xlane.f32.xlu1 %v890_v32 }
  0x78   : > { %880 = vadd.xlane.f32.xlu0 %v879_v33 }
  0x80   : > { %897 = vadd.xlane.f32.xlu0 %v896_v35 }
  0xda   : > { %v875_v36 = vpop.xlane.xlu2 %874  ;;  %v864_v37 = vpop.xlane.xlu1 %863 }
  0xdb   : > { %v858_v38 = vpop.xlane.xlu0 %857 }
  0xdc   : > { %v883_v44 = vadd.f32 %v875_v36, %v858_v38 }
  0xe2   : > { %v878_v39 = vpop.xlane.xlu2 %877  ;;  %v872_v40 = vpop.xlane.xlu1 %871 }
  0xe3   : > { %v861_v41 = vpop.xlane.xlu0 %860  ;;  %v882_v45 = vadd.f32 %v872_v40, %v858_v38 }
  0xe4   : > { %v884_v18 = vadd.f32 %v878_v39, %v861_v41 }
  0xe8   : > { %v1034_v43 = vpop.f32.mrf.mxu0 }
  0xe9   : > { %v1035_v46 = vadd.f32 %v5535_v42, %v1034_v43  ;;  %v1037_v47 = vpop.f32.mrf.mxu1 }
  0xea   : > { %v1038_v48 = vadd.f32 %v5535_v42, %v1037_v47  ;;  %v895_v50 = vpop.xlane.xlu2 %894  ;;  %v892_v51 = vpop.xlane.xlu1 %891 }
  0xeb   : > { %v1046_v52 = vsub.f32 0.0, %v1035_v46  ;;  %v900_v53 = vadd.f32 %v895_v50, %v883_v44  ;;  %v899_v54 = vadd.f32 %v892_v51, %v882_v45  ;;  %v881_v60 = vpop.xlane.xlu0 %880 }
  0xec   : > { %v1047_v55 = vsub.f32 0.0, %v1038_v48  ;;  %v1040_v56 = vpop.f32.mrf.mxu2  ;;  %v885_v20 = vadd.f32 %v881_v60, %v864_v37 }
  0xed   : > { %v1050_v57 = vmul.f32 1.442695, %v1046_v52  ;;  %v906_v58 = vadd.f32 %v904_v49, %v900_v53  ;;  %v905_v59 = vadd.f32 %v904_v49, %v899_v54  ;;  %v1043_v61 = vpop.f32.mrf.mxu3  ;;  %v1041_v63 = vadd.f32 %v5535_v42, %v1040_v56 }
  0xee   : > { %v1052_v62 = vmul.f32 1.442695, %v1047_v55  ;;  %v1044_v6 = vadd.f32 %v5535_v42, %v1043_v61 }
  0xef   : > { %5536 = vpow2.f32 %v1050_v57  ;;  %v910_v4 = vsub.f32 0.0, %v906_v58  ;;  %v909_v5 = vsub.f32 0.0, %v905_v59  ;;  %v1048_v9 = vsub.f32 0.0, %v1041_v63 }
  0xf0   : > { %5538 = vpow2.f32 %v1052_v62  ;;  %v1049_v10 = vsub.f32 0.0, %v1044_v6 }
  0xf1   : > { %v915_v7 = vmul.f32 1.442695, %v910_v4  ;;  %v913_v8 = vmul.f32 1.442695, %v909_v5  ;;  %v1054_v14 = vmul.f32 1.442695, %v1048_v9 }
  0xf2   : > { %v1056_v16 = vmul.f32 1.442695, %v1049_v10 }
  0xf3   : > { %5540 = vpow2.f32 %v915_v7  ;;  %v898_v17 = vpop.xlane.xlu0 %897 }
  0xf4   : > { %5542 = vpow2.f32 %v913_v8  ;;  %v901_v23 = vadd.f32 %v898_v17, %v884_v18  ;;  %v902_v25 = vadd.f32 %v898_v17, %v885_v20 }
  0xf5   : > { %v5537_v11 = vpop.eup %5536 }
  0xf6   : > { %v5539_v12 = vpop.eup %5538  ;;  %v6208_v13 = vadd.f32 1.0, %v5537_v11  ;;  %v907_v29 = vadd.f32 %v904_v49, %v901_v23  ;;  %v908_v33 = vadd.f32 %v904_v49, %v902_v25 }
  0xf7   : > { %v1059_v15 = vadd.f32 1.0, %v5539_v12 }
  0xf8   : > { %5544 = vrcp.f32 %v6208_v13  ;;  %v1073_v27 = vand.u32 2147483648, %v6208_v13  ;;  %v1071_v35 = vand.u32 2147483647, %v6208_v13  ;;  %vm1067_vm1 = vweird.f32 %v6208_v13 }
  0xf9   : > { %v5541_v19 = vpop.eup %5540  ;;  %5546 = vrcp.f32 %v1059_v15  ;;  %v1088_v28 = vand.u32 2147483648, %v1059_v15  ;;  %v1086_v32 = vand.u32 2147483647, %v1059_v15  ;;  %vm1082_vm2 = vweird.f32 %v1059_v15 }
  0xfa   : > { %v5543_v21 = vpop.eup %5542  ;;  %v6211_v22 = vadd.f32 1.0, %v5541_v19  ;;  %5548 = vpow2.f32 %v1054_v14  ;;  %v1074_v40 = vor.u32 1.1754944e-38, %v1073_v27  ;;  %v911_v43 = vsub.f32 0.0, %v907_v29 }
  0xfb   : > { %v6213_v24 = vadd.f32 1.0, %v5543_v21  ;;  %5550 = vpow2.f32 %v1056_v16  ;;  %v1089_v42 = vor.u32 1.1754944e-38, %v1088_v28  ;;  %vm6227_vm3 = vcmp.eq.f32.partialorder %v1086_v32, 8.507059e+37 }
  0xfc   : > { %5552 = vrcp.f32 %v6211_v22  ;;  %v949_v47 = vand.u32 2147483647, %v6211_v22  ;;  %v951_v48 = vand.u32 2147483648, %v6211_v22  ;;  %v912_v49 = vsub.f32 0.0, %v908_v33 }
  0xfd   : > { %5554 = vrcp.f32 %v6213_v24  ;;  %vm6235_vm4 = vcmp.eq.f32.partialorder %v1071_v35, 8.507059e+37  ;;  %v934_v56 = vand.u32 2147483647, %v6213_v24  ;;  %v936_v59 = vand.u32 2147483648, %v6213_v24 }
  0xfe   : > { %v6217_v26 = vpop.eup %5544  ;;  %v917_v60 = vmul.f32 1.442695, %v911_v43  ;;  %v919_v63 = vmul.f32 1.442695, %v912_v49  ;;  %vm945_vm11 = vweird.f32 %v6211_v22  ;;  %vm930_vm12 = vweird.f32 %v6213_v24 }
  0xff   : > { %v6220_v30 = vpop.eup %5546  ;;  %v1063_v31 = vmul.f32 %v6217_v26, %v6208_v13  ;;  %vm1068_vm6 = vweird.f32 %v6217_v26  ;;  %vm950_vm14 = vcmp.eq.f32.partialorder %v949_v47, 8.507059e+37  ;;  %v952_v9 = vor.u32 1.1754944e-38, %v951_v48 }
 0x100   : > { %v5549_v34 = vpop.eup %5548  ;;  %v1078_v36 = vmul.f32 %v6220_v30, %v1059_v15  ;;  %vm1083_vm5 = vweird.f32 %v6220_v30  ;;  %vm6259_vm10 = vmor %vm1067_vm1, %vm1068_vm6  ;;  %v937_v13 = vor.u32 1.1754944e-38, %v936_v59  ;;  %vm935_vm1 = vcmp.eq.f32.partialorder %v934_v56, 8.507059e+37 }
 0x101   : > { %v5551_v37 = vpop.eup %5550  ;;  %v1064_v38 = vsub.f32 1.0, %v1063_v31  ;;  %v6241_v54 = vadd.f32 1.0, %v5549_v34  ;;  %vm6252_vm8 = vmor %vm1082_vm2, %vm1083_vm5 }
 0x102   : > { %v5553_v39 = vpop.eup %5552  ;;  %v1079_v41 = vsub.f32 1.0, %v1078_v36  ;;  %v6245_v57 = vadd.f32 1.0, %v5551_v37 }
 0x103   : > { %v5555_v44 = vpop.eup %5554  ;;  %v941_v46 = vmul.f32 %v5553_v39, %v6211_v22  ;;  %v1065_v50 = vmul.f32 %v6217_v26, %v1064_v38  ;;  %vm946_vm7 = vweird.f32 %v5553_v39  ;;  %5556 = vrcp.f32 %v6241_v54 }
 0x104   : > { %v1080_v52 = vmul.f32 %v6220_v30, %v1079_v41  ;;  %v926_v53 = vmul.f32 %v5555_v44, %v6213_v24  ;;  %vm931_vm9 = vweird.f32 %v5555_v44  ;;  %5558 = vrcp.f32 %v6245_v57  ;;  %vm947_vm13 = vmor %vm945_vm11, %vm946_vm7 }
 0x105   : > { %v942_v55 = vsub.f32 1.0, %v941_v46  ;;  %v1066_v4 = vadd.f32 %v6217_v26, %v1065_v50  ;;  %5560 = vpow2.f32 %v917_v60  ;;  %vm932_vm15 = vmor %vm930_vm12, %vm931_vm9  ;;  %vm1097_vm2 = vweird.f32 %v6241_v54 }
 0x106   : > { %v927_v58 = vsub.f32 1.0, %v926_v53  ;;  %v1081_v61 = vadd.f32 %v6220_v30, %v1080_v52  ;;  %5562 = vpow2.f32 %v919_v63  ;;  %v1101_v38 = vand.u32 2147483647, %v6241_v54 }
 0x107   : > { %v943_v62 = vmul.f32 %v5553_v39, %v942_v55  ;;  %v1070_v14 = vsel %vm6259_vm10, %v6217_v26, %v1066_v4  ;;  %v1103_v41 = vand.u32 2147483648, %v6241_v54  ;;  %v1116_v55 = vand.u32 2147483647, %v6245_v57 }
 0x108   : > { %v928_v6 = vmul.f32 %v5555_v44, %v927_v58  ;;  %v1085_v11 = vsel %vm6252_vm8, %v6220_v30, %v1081_v61  ;;  %v1075_v23 = vsel %vm6235_vm4, %v1074_v40, %v1070_v14  ;;  %vm1112_vm4 = vweird.f32 %v6245_v57 }
 0x109   : > { %v944_v8 = vadd.f32 %v5553_v39, %v943_v62  ;;  %v6273_v19 = vpop.eup %5556  ;;  %v1090_v20 = vsel %vm6227_vm3, %v1089_v42, %v1085_v11  ;;  %v1118_v56 = vand.u32 2147483648, %v6245_v57  ;;  %v1104_v58 = vor.u32 1.1754944e-38, %v1103_v41 }
 0x10a   : > { %v929_v10 = vadd.f32 %v5555_v44, %v928_v6  ;;  %v6278_v22 = vpop.eup %5558  ;;  %v1093_v28 = vmul.f32 %v6273_v19, %v6241_v54  ;;  %vm1098_vm3 = vweird.f32 %v6273_v19 }
 0x10b   : > { %v948_v12 = vsel %vm947_vm13, %v5553_v39, %v944_v8  ;;  %v5561_v25 = vpop.eup %5560  ;;  %v1108_v31 = vmul.f32 %v6278_v22, %v6245_v57  ;;  %vm1113_vm5 = vweird.f32 %v6278_v22  ;;  %vm6299_vm7 = vmor %vm1097_vm2, %vm1098_vm3  ;;  %v1119_v6 = vor.u32 1.1754944e-38, %v1118_v56 }
 0x10c   : > { %v953_v15 = vsel %vm950_vm14, %v952_v9, %v948_v12  ;;  %v933_v16 = vsel %vm932_vm15, %v5555_v44, %v929_v10  ;;  %v5563_v27 = vpop.eup %5562  ;;  %v923_v29 = vadd.f32 1.0, %v5561_v25  ;;  %v1094_v32 = vsub.f32 1.0, %v1093_v28  ;;  %vm6306_vm9 = vmor %vm1112_vm4, %vm1113_vm5 }
 0x10d   : > { %v1123_v17 = vmul.f32 %v953_v15, %v6094_v1  ;;  %v938_v18 = vsel %vm935_vm1, %v937_v13, %v933_v16  ;;  %v924_v30 = vadd.f32 1.0, %v5563_v27  ;;  %v1109_v33 = vsub.f32 1.0, %v1108_v31 }
 0x10e   : > { %v1122_v21 = vmul.f32 %v938_v18, %v6089_v0  ;;  %5564 = vrcp.f32 %v923_v29  ;;  %v1095_v35 = vmul.f32 %v6273_v19, %v1094_v32  ;;  %v966_v44 = vand.u32 2147483648, %v923_v29 }
 0x10f   : > { %v1127_v24 = vmul.f32 %v1123_v17, %v1090_v20  ;;  %5566 = vrcp.f32 %v924_v30  ;;  %v1110_v39 = vmul.f32 %v6278_v22, %v1109_v33  ;;  %v964_v47 = vand.u32 2147483647, %v923_v29 }
 0x110   : > { %v1126_v26 = vmul.f32 %v1122_v21, %v1075_v23  ;;  %v1096_v43 = vadd.f32 %v6273_v19, %v1095_v35  ;;  %v981_v48 = vand.u32 2147483648, %v924_v30  ;;  %v979_v52 = vand.u32 2147483647, %v924_v30 }
 0x111   : > { %1131 = vst.msk [vmem:[#allocation2 + $0x8] sm:$0xff] %vm855_vm0, %v1127_v24  ;;  %v1111_v50 = vadd.f32 %v6278_v22, %v1110_v39  ;;  %vm960_vm10 = vweird.f32 %v923_v29  ;;  %v967_v59 = vor.u32 1.1754944e-38, %v966_v44  ;;  %vm975_vm12 = vweird.f32 %v924_v30 }
 0x112   : > { %1130 = vst.msk [vmem:[#allocation2] sm:$0xff] %vm855_vm0, %v1126_v26  ;;  %v1100_v61 = vsel %vm6299_vm7, %v6273_v19, %v1096_v43  ;;  %vm965_vm13 = vcmp.eq.f32.partialorder %v964_v47, 8.507059e+37  ;;  %v982_v63 = vor.u32 1.1754944e-38, %v981_v48  ;;  %vm980_vm15 = vcmp.eq.f32.partialorder %v979_v52, 8.507059e+37 }
 0x113   : > { %v1115_v57 = vsel %vm6306_vm9, %v6278_v22, %v1111_v50  ;;  %vm1102_vm1 = vcmp.eq.f32.partialorder %v1101_v38, 8.507059e+37  ;;  %vm1117_vm2 = vcmp.eq.f32.partialorder %v1116_v55, 8.507059e+37 }
 0x114   : > { %v5565_v34 = vpop.eup %5564  ;;  %v1105_v9 = vsel %vm1102_vm1, %v1104_v58, %v1100_v61  ;;  %v1120_v11 = vsel %vm1117_vm2, %v1119_v6, %v1115_v57 }
 0x115   : > { %v5567_v36 = vpop.eup %5566  ;;  %v956_v37 = vmul.f32 %v5565_v34, %v923_v29  ;;  %vm961_vm6 = vweird.f32 %v5565_v34 }
 0x116   : > { %v971_v40 = vmul.f32 %v5567_v36, %v924_v30  ;;  %vm976_vm8 = vweird.f32 %v5567_v36  ;;  %vm962_vm11 = vmor %vm960_vm10, %vm961_vm6 }
 0x117   : > { %v957_v42 = vsub.f32 1.0, %v956_v37  ;;  %vm977_vm14 = vmor %vm975_vm12, %vm976_vm8 }
 0x118   : > { %v972_v45 = vsub.f32 1.0, %v971_v40 }
 0x119   : > { %v958_v46 = vmul.f32 %v5565_v34, %v957_v42 }
 0x11a   : > { %v973_v51 = vmul.f32 %v5567_v36, %v972_v45 }
 0x11b   : > { %v959_v54 = vadd.f32 %v5565_v34, %v958_v46 }
 0x11c   : > { %v974_v60 = vadd.f32 %v5567_v36, %v973_v51 }
 0x11d   : > { %v963_v62 = vsel %vm962_vm11, %v5565_v34, %v959_v54 }
 0x11e   : > { %v968_v4 = vsel %vm965_vm13, %v967_v59, %v963_v62  ;;  %v978_v5 = vsel %vm977_vm14, %v5567_v36, %v974_v60 }
 0x11f   : > { %v983_v7 = vsel %vm980_vm15, %v982_v63, %v978_v5  ;;  %v1124_v8 = vmul.f32 %v968_v4, %v6099_v2 }
 0x120   : > { %v1125_v10 = vmul.f32 %v983_v7, %v6113_v3 }
 0x121   : > { %v1128_v12 = vmul.f32 %v1124_v8, %v1105_v9 }
 0x122   : > { %v1129_v13 = vmul.f32 %v1125_v10, %v1120_v11 }
 0x123   : > { %1132 = vst.msk [vmem:[#allocation2 + $0x10] sm:$0xff] %vm855_vm0, %v1128_v12 }
 0x124   : > { %1133 = vst.msk [vmem:[#allocation2 + $0x18] sm:$0xff] %vm855_vm0, %v1129_v13 }
 0x125 PF: > { %1137 = sbr.rel (%p258_p5) target bundleno = 308 (0x134), region = 108 }
 0x12a   : > { %v1138_v14 = vlaneseq  ;;  %vm1145_vm3 = vcmask 261120  }
 0x12c   : > { %v1139_v15 = vand.u32 127, %v1138_v14 }
 0x12e   : > { %vm1140_vm4 = vcmp.lt.s32.totalorder %v1139_v15, 24 }
 0x12f   : > { %v1141_v16 = vsel %vm1140_vm4, %v6089_v0, 0.0  ;;  %v1142_v17 = vsel %vm1140_vm4, %v6094_v1, 0.0  ;;  %v1143_v18 = vsel %vm1140_vm4, %v6099_v2, 0.0  ;;  %v1144_v19 = vsel %vm1140_vm4, %v6113_v3, 0.0 }
 0x130   : > { %1146 = vst.msk [vmem:[#allocation2] sm:$0xff] %vm1145_vm3, %v1141_v16 }
 0x131   : > { %1147 = vst.msk [vmem:[#allocation2 + $0x8] sm:$0xff] %vm1145_vm3, %v1142_v17 }
 0x132   : > { %1148 = vst.msk [vmem:[#allocation2 + $0x10] sm:$0xff] %vm1145_vm3, %v1143_v18 }
 0x133   : > { %1149 = vst.msk [vmem:[#allocation2 + $0x18] sm:$0xff] %vm1145_vm3, %v1144_v19 }
 0x134 PF: > { %s7443_s23 = sld [smem:[#allocation11_spill]]  ;;  %v5250_v0 = vld [vmem:[%s6060_s19 + $0x38] sm:$0xff]  ;;  %v5249_v1 = vld [vmem:[%s6060_s19 + $0x30] sm:$0xff]  ;;  %v5248_v3 = vld [vmem:[%s6060_s19 + $0x28] sm:$0xff]  ;;  %s7444_s7 = scalar_lea.vmem %s7369_s8, %s6083_s21  ;;  %vm1162_vm0 = vcmask 261120   ;;  %vm1291_vm5 = vcmask 64512  }
 0x135   : > { %1250 = vmatpush.msra.mxu2 %v5250_v0  ;;  %v1200_v2 = vld [vmem:[%s6060_s19 + $0x18] sm:$0xff]  ;;  %v1199_v20 = vld [vmem:[%s6060_s19 + $0x10] sm:$0xff]  ;;  %v5247_v21 = vld [vmem:[%s6060_s19 + $0x20] sm:$0xff]  ;;  %s5877_s21 = smov 112   ;;  %s5878_s9 = smov 120  }
 0x136   : > { %1218 = vmatpush.msra.mxu1 %v1200_v2  ;;  %5482 = vmatpush.msra.mxu3 %v1200_v2  ;;  %v1198_v22 = vld [vmem:[%s6060_s19 + $0x8] sm:$0xff]  ;;  %v6342_v24 = vld [vmem:[%s7444_s7] sm:$0xff]  ;;  %s5879_s13 = smov 104   ;;  %v5256_v43 = vld [vmem:[%s6060_s19 + $0x58] sm:$0xff]  ;;  %s7449_s29 = sld [smem:[#allocation12_spill]] }
 0x137   : > { %1251 = vmatpush.msra.mxu2 %v5249_v1  ;;  %v1197_v25 = vld [vmem:[%s6060_s19] sm:$0xff]  ;;  %v5255_v44 = vld [vmem:[%s6060_s19 + $0x50] sm:$0xff]  ;;  %v5254_v46 = vld [vmem:[%s6060_s19 + $0x48] sm:$0xff]  ;;  %s7450_s27 = sld [smem:[#allocation18_spill]]  ;;  %s5880_s0 = smov 8  }
 0x138   : > { %1219 = vmatpush.msra.mxu1 %v1199_v20  ;;  %5483 = vmatpush.msra.mxu3 %v1199_v20  ;;  %v1150_v29 = vld [vmem:[#allocation2] sm:$0xff]  ;;  %s5881_s24 = smov 16   ;;  %s5882_s30 = smov 24  }
 0x139   : > { %1252 = vmatpush.msra.mxu2 %v5248_v3  ;;  %v1152_v30 = vld [vmem:[#allocation2 + $0x10] sm:$0xff]  ;;  %v5609_v31 = vld [vmem:[%s6108_s25] ss:$0 sm:$0xff]  ;;  %v5608_v34 = vld [vmem:[%s6108_s25 + $0x1] ss:$0 sm:$0xff] }
 0x13a   : > { %v1159_v23 = vld [vmem:[%s7443_s23 + $0x18] sm:$0xff]  ;;  %v1158_v26 = vld [vmem:[%s7443_s23 + $0x10] sm:$0xff]  ;;  %v1157_v27 = vld [vmem:[%s7443_s23 + $0x8] sm:$0xff]  ;;  %1220 = vmatpush.msra.mxu1 %v1198_v22  ;;  %5484 = vmatpush.msra.mxu3 %v1198_v22 }
 0x13b   : > { %1181 = vmatpush.msra.mxu0 %v1159_v23  ;;  %1253 = vmatpush.msra.mxu2 %v5247_v21  ;;  %v1156_v28 = vld [vmem:[%s7443_s23] sm:$0xff] }
 0x13c   : > { %5251 = vmatmul.msk.f32.vlgmr.msra.gmra.mxu2 %vm1162_vm0, %v6342_v24  ;;  %1221 = vmatpush.msra.mxu1 %v1197_v25  ;;  %v5253_v47 = vld [vmem:[%s6060_s19 + $0x40] sm:$0xff] }
 0x13d   : > { %1182 = vmatpush.msra.mxu0 %v1158_v26  ;;  %5245 = vmatmul.msk.f32.vlgmr.msra.gmra.mxu1 %vm1162_vm0, %v6342_v24  ;;  %v5611_v5 = vld [vmem:[%s6108_s25 + $0x2] ss:$0 sm:$0xff] }
 0x13e   : > { %5485 = vmatpush.msra.mxu3 %v1197_v25 }
 0x13f   : > { %5246 = vmatmul.msk.f32.vlgmr.msra.gmra.mxu3 %vm1162_vm0, %v6342_v24  ;;  %1183 = vmatpush.msra.mxu0 %v1157_v27 }
 0x140   : > { %1280 = vmatpush.msrb.mxu3 %v5256_v43 }
 0x141   : > { %1184 = vmatpush.msra.mxu0 %v1156_v28 }
 0x142   : > { %5243 = vmatmul.msk.f32.vlgmr.msra.gmra.mxu0 %vm1162_vm0, %v1150_v29  ;;  %1281 = vmatpush.msrb.mxu3 %v5255_v44 }
 0x144   : > { %5252 = vmatmul.msk.f32.gmra.mxu2 %vm1162_vm0, %v6342_v24  ;;  %1282 = vmatpush.msrb.mxu3 %v5254_v46 }
 0x146   : > { %1283 = vmatpush.msrb.mxu3 %v5253_v47 }
 0x147   : > { %5257 = vmatmul.msk.f32.vlgmr.msrb.gmra.mxu3 %vm1162_vm0, %v6342_v24 }
 0x14a   : > { %5244 = vmatmul.msk.f32.gmra.mxu0 %vm1162_vm0, %v1152_v30 }
 0x14f   : > { %5258 = vmatmul.msk.f32.gmra.mxu3 %vm1162_vm0, %v6342_v24 }
 0x1ba   : > { %v1223_v32 = vpop.f32.mrf.mxu1 }
 0x1bb   : > { %v1224_v33 = vadd.f32 %v5609_v31, %v1223_v32 }
 0x1bd   : > { %v1229_v35 = vmul.f32 0.35355338, %v1224_v33 }
 0x1bf   : > { %v1255_v36 = vpop.f32.mrf.mxu2  ;;  %1596 = vrot.lane.b32.xlu2 %v1229_v35, %s5877_s21  ;;  %v6378_v45 = vpop.f32.mrf.mxu0 }
 0x1c0   : > { %v1256_v37 = vadd.f32 %v5608_v34, %v1255_v36 }
 0x1c2   : > { %v1226_v38 = vpop.f32.mrf.mxu3  ;;  %1598 = vrot.lane.b32.xlu1 %v1256_v37, %s5877_s21  ;;  %1440 = vrot.lane.b32.xlu0 %v1256_v37, %s5878_s9 }
 0x1c3   : > { %v1227_v39 = vadd.f32 %v5609_v31, %v1226_v38  ;;  %5259 = vmatpush.xpose.msk.msrb.mxu0 %vm1291_vm5, %v1256_v37 }
 0x1c5   : > { %v1230_v40 = vmul.f32 0.35355338, %v1227_v39 }
 0x1c6   : > { %5260 = vmatmul.msk.f32.vlgmr.msrb.gmra.mxu0 %vm1291_vm5, %v1229_v35 }
 0x1c7   : > { %v1258_v41 = vpop.f32.mrf.mxu2  ;;  %1466 = vrot.lane.b32.xlu2 %v1230_v40, %s5878_s9  ;;  %v6386_v51 = vpop.f32.mrf.mxu0 }
 0x1c8   : > { %v1259_v42 = vadd.f32 %v5608_v34, %v1258_v41 }
 0x1ca   : > { %5261 = vmatpush.xpose.msk.msrb.mxu1 %vm1291_vm5, %v1259_v42  ;;  %1468 = vrot.lane.b32.xlu1 %v1259_v42, %s5878_s9  ;;  %v1285_v7 = vpop.f32.mrf.mxu3 }
 0x1cb   : > { %1438 = vrot.lane.b32.xlu0 %v1229_v35, %s5878_s9  ;;  %v6403_v9 = vadd.f32 %v5611_v5, %v1285_v7 }
 0x1cd   : > { %5262 = vmatmul.msk.f32.vlgmr.msrb.gmra.mxu1 %vm1291_vm5, %v1230_v40  ;;  %1410 = vmatpush.msrb.mxu2 %v6403_v9 }
 0x1cf   : > { %1624 = vrot.lane.b32.xlu2 %v1230_v40, %s5877_s21 }
 0x1d2   : > { %1754 = vrot.lane.b32.xlu1 %v1256_v37, %s5879_s13  ;;  %v1288_v14 = vpop.f32.mrf.mxu3 }
 0x1d3   : > { %1626 = vrot.lane.b32.xlu0 %v1259_v42, %s5877_s21  ;;  %v6407_v15 = vadd.f32 %v5611_v5, %v1288_v14 }
 0x1d5   : > { %1433 = vmatpush.msra.mxu3 %v6407_v15  ;;  %v5568_v23 = vpack.i.bf16 %v6407_v15, %v6403_v9 }
 0x1d7   : > { %1780 = vrot.lane.b32.xlu2 %v1230_v40, %s5879_s13 }
 0x1da   : > { %1782 = vrot.lane.b32.xlu1 %v1259_v42, %s5879_s13 }
 0x1db   : > { %1752 = vrot.lane.b32.xlu0 %v1229_v35, %s5879_s13 }
 0x219   : > { %v1597_v48 = vpop.permute.xlu2 %1596 }
 0x221   : > { %v1467_v52 = vpop.permute.xlu2 %1466 }
 0x229   : > { %v1625_v60 = vpop.permute.xlu2 %1624 }
 0x231   : > { %v1781_v4 = vpop.permute.xlu2 %1780 }
 0x234   : > { %v1599_v49 = vpop.permute.xlu1 %1598  ;;  %v1441_v50 = vpop.permute.xlu0 %1440 }
 0x235   : > { %5265 = vmatpush.xpose.msk.msra.mxu0 %vm1291_vm5, %v1441_v50 }
 0x239   : > { %5271 = vmatpush.xpose.msk.msrb.mxu0 %vm1291_vm5, %v1599_v49 }
 0x23c   : > { %v1469_v53 = vpop.permute.xlu1 %1468 }
 0x23d   : > { %v1439_v55 = vpop.permute.xlu0 %1438  ;;  %5267 = vmatpush.xpose.msk.msra.mxu1 %vm1291_vm5, %v1469_v53 }
 0x23e   : > { %5266 = vmatmul.msk.f32.vlgmr.msra.gmra.mxu0 %vm1291_vm5, %v1439_v55 }
 0x240   : > { %5268 = vmatmul.msk.f32.vlgmr.msra.gmra.mxu1 %vm1291_vm5, %v1467_v52 }
 0x243   : > { %v1315_v56 = vpop.f32.mrf.mxu0 }
 0x244   : > { %v1755_v54 = vpop.permute.xlu1 %1754  ;;  %v1344_v58 = vsel %vm1291_vm5, %v1315_v56, -inf }
 0x245   : > { %v1627_v59 = vpop.permute.xlu0 %1626  ;;  %1345 = vmax.xlane.f32.xlu0 %v1344_v58  ;;  %5277 = vmatpush.xpose.msk.msra.mxu0 %vm1291_vm5, %v1755_v54 }
 0x246   : > { %5272 = vmatmul.msk.f32.vlgmr.msrb.gmra.mxu0 %vm1291_vm5, %v1597_v48  ;;  %5273 = vmatpush.xpose.msk.msrb.mxu1 %vm1291_vm5, %v1627_v59 }
 0x249   : > { %5274 = vmatmul.msk.f32.vlgmr.msrb.gmra.mxu1 %vm1291_vm5, %v1625_v60 }
 0x24a   : > { %v1341_v61 = vpop.f32.mrf.mxu1 }
 0x24b   : > { %v1347_v62 = vsel %vm1291_vm5, %v1341_v61, -inf }
 0x24c   : > { %v1783_v63 = vpop.permute.xlu1 %1782  ;;  %1348 = vmax.xlane.f32.xlu1 %v1347_v62 }
 0x24d   : > { %v1753_v57 = vpop.permute.xlu0 %1752  ;;  %5279 = vmatpush.xpose.msk.msra.mxu1 %vm1291_vm5, %v1783_v63 }
 0x24e   : > { %5278 = vmatmul.msk.f32.vlgmr.msra.gmra.mxu0 %vm1291_vm5, %v1753_v57 }
 0x251   : > { %5280 = vmatmul.msk.f32.vlgmr.msra.gmra.mxu1 %vm1291_vm5, %v1781_v4 }
 0x2b8   : > { %v1346_v6 = vpop.xlane.xlu0 %1345 }
 0x2b9   : > { %v1350_v8 = vsub.f32 %v1315_v56, %v1346_v6 }
 0x2bb   : > { %v1352_v10 = vmul.f32 1.442695, %v1350_v8  ;;  %v1463_v11 = vpop.f32.mrf.mxu0 }
 0x2bc   : > { %v1494_v12 = vsel %vm1291_vm5, %v1463_v11, -inf }
 0x2bd   : > { %5647 = vpow2.f32 %v1352_v10  ;;  %1495 = vmax.xlane.f32.xlu2 %v1494_v12  ;;  %v1491_v13 = vpop.f32.mrf.mxu1 }
 0x2be   : > { %v1497_v16 = vsel %vm1291_vm5, %v1491_v13, -inf }
 0x2bf   : > { %v1349_v25 = vpop.xlane.xlu1 %1348 }
 0x2c0   : > { %v1351_v26 = vsub.f32 %v1341_v61, %v1349_v25 }
 0x2c2   : > { %v1354_v27 = vmul.f32 1.442695, %v1351_v26 }
 0x2c3   : > { %v6410_v17 = vpop.eup %5647  ;;  %v1621_v18 = vpop.f32.mrf.mxu0 }
 0x2c4   : > { %v1652_v19 = vsel %vm1291_vm5, %v1621_v18, -inf  ;;  %v1356_v0 = vsel %vm1291_vm5, %v6410_v17, 0.0  ;;  %5649 = vpow2.f32 %v1354_v27 }
 0x2c5   : > { %1498 = vmax.xlane.f32.xlu2 %v1497_v16  ;;  %1653 = vmax.xlane.f32.xlu0 %v1652_v19 }
 0x2c6   : > { %1357 = vadd.xlane.f32.xlu1 %v1356_v0  ;;  %v1649_v1 = vpop.f32.mrf.mxu1 }
 0x2c7   : > { %v1655_v20 = vsel %vm1291_vm5, %v1649_v1, -inf }
 0x2ca   : > { %v6424_v28 = vpop.eup %5649 }
 0x2cb   : > { %v1777_v2 = vpop.f32.mrf.mxu0  ;;  %v1359_v29 = vsel %vm1291_vm5, %v6424_v28, 0.0 }
 0x2cc   : > { %v1808_v3 = vsel %vm1291_vm5, %v1777_v2, -inf }
 0x2cd   : > { %1809 = vmax.xlane.f32.xlu2 %v1808_v3 }
 0x2ce   : > { %1656 = vmax.xlane.f32.xlu1 %v1655_v20  ;;  %v1805_v21 = vpop.f32.mrf.mxu1 }
 0x2cf   : > { %v1811_v22 = vsel %vm1291_vm5, %v1805_v21, -inf }
 0x2d0   : > { %1812 = vmax.xlane.f32.xlu0 %v1811_v22 }
 0x2e5   : > { %5569 = vrot.lane.b32.xlu2 %v5568_v23, %s5878_s9 }
 0x2e7   : > { %1700 = vrot.lane.b32.xlu1 %v6403_v9, %s5877_s21 }
 0x30e   : > { %1360 = vadd.xlane.f32.xlu2 %v1359_v29 }
 0x330   : > { %v1496_v30 = vpop.xlane.xlu2 %1495 }
 0x331   : > { %v1500_v31 = vsub.f32 %v1463_v11, %v1496_v30 }
 0x333   : > { %v1502_v32 = vmul.f32 1.442695, %v1500_v31 }
 0x335   : > { %5651 = vpow2.f32 %v1502_v32 }
 0x338   : > { %v1499_v33 = vpop.xlane.xlu2 %1498  ;;  %v1654_v34 = vpop.xlane.xlu0 %1653 }
 0x339   : > { %v1501_v35 = vsub.f32 %v1491_v13, %v1499_v33  ;;  %v1358_v36 = vpop.xlane.xlu1 %1357  ;;  %v1658_v37 = vsub.f32 %v1621_v18, %v1654_v34 }
 0x33a   : > { %5653 = vrcp.f32 %v1358_v36  ;;  %v1373_v52 = vand.u32 2147483648, %v1358_v36  ;;  %v1371_v60 = vand.u32 2147483647, %v1358_v36  ;;  %vm1367_vm7 = vweird.f32 %v1358_v36 }
 0x33b   : > { %v6428_v38 = vpop.eup %5651  ;;  %v1504_v39 = vmul.f32 1.442695, %v1501_v35  ;;  %v1660_v40 = vmul.f32 1.442695, %v1658_v37 }
 0x33c   : > { %v1506_v41 = vsel %vm1291_vm5, %v6428_v38, 0.0  ;;  %v1374_v57 = vor.u32 1.1754944e-38, %v1373_v52  ;;  %vm1372_vm9 = vcmp.eq.f32.partialorder %v1371_v60, 8.507059e+37 }
 0x33d   : > { %5655 = vpow2.f32 %v1504_v39  ;;  %1507 = vadd.xlane.f32.xlu0 %v1506_v41 }
 0x33e   : > { %5657 = vpow2.f32 %v1660_v40 }
 0x340   : > { %v5654_v42 = vpop.eup %5653  ;;  %v1810_v43 = vpop.xlane.xlu2 %1809 }
 0x341   : > { %v1363_v44 = vmul.f32 %v5654_v42, %v1358_v36  ;;  %v1814_v46 = vsub.f32 %v1777_v2, %v1810_v43  ;;  %v1657_v47 = vpop.xlane.xlu1 %1656  ;;  %vm1368_vm6 = vweird.f32 %v5654_v42 }
 0x342   : > { %v1659_v48 = vsub.f32 %v1649_v1, %v1657_v47  ;;  %vm1369_vm8 = vmor %vm1367_vm7, %vm1368_vm6 }
 0x343   : > { %v6432_v49 = vpop.eup %5655  ;;  %v1364_v50 = vsub.f32 1.0, %v1363_v44  ;;  %v1816_v53 = vmul.f32 1.442695, %v1814_v46  ;;  %v1813_v55 = vpop.xlane.xlu0 %1812 }
 0x344   : > { %v6434_v56 = vpop.eup %5657  ;;  %v1662_v54 = vmul.f32 1.442695, %v1659_v48  ;;  %v1815_v58 = vsub.f32 %v1805_v21, %v1813_v55  ;;  %v1509_v59 = vsel %vm1291_vm5, %v6432_v49, 0.0 }
 0x345   : > { %v1365_v61 = vmul.f32 %v5654_v42, %v1364_v50  ;;  %5659 = vpow2.f32 %v1816_v53  ;;  %1510 = vadd.xlane.f32.xlu1 %v1509_v59  ;;  %v1664_v62 = vsel %vm1291_vm5, %v6434_v56, 0.0 }
 0x346   : > { %5661 = vpow2.f32 %v1662_v54  ;;  %1665 = vadd.xlane.f32.xlu2 %v1664_v62  ;;  %v1818_v4 = vmul.f32 1.442695, %v1815_v58 }
 0x347   : > { %v1366_v63 = vadd.f32 %v5654_v42, %v1365_v61 }
 0x348   : > { %v5570_v7 = vpop.permute.xlu2 %5569  ;;  %5663 = vpow2.f32 %v1818_v4 }
 0x349   : > { %v1370_v5 = vsel %vm1369_vm8, %v5654_v42, %v1366_v63  ;;  %v5572_v11 = vunpack.i.h.bf16 %v5570_v7  ;;  %v5571_v12 = vunpack.i.l.bf16 %v5570_v7 }
 0x34a   : > { %v1375_v6 = vsel %vm1372_vm9, %v1374_v57, %v1370_v5  ;;  %v5286_v57 = vld [vmem:[%s6060_s19 + $0x78] sm:$0xff] }
 0x34b   : > { %v6440_v8 = vpop.eup %5659  ;;  %v1376_v10 = vmul.f32 %v6410_v17, %v1375_v6  ;;  %1564 = vmatpush.msra.mxu2 %v5571_v12  ;;  %1591 = vmatpush.msrb.mxu3 %v5572_v11 }
 0x34c   : > { %v6443_v13 = vpop.eup %5661  ;;  %v1820_v14 = vsel %vm1291_vm5, %v6440_v8, 0.0  ;;  %1965 = vmatpush.msrb.mxu0 %v5286_v57 }
 0x34d   : > { %5263 = vmatmul.msk.f32.vlgmr.msrb.gmra.mxu2 %vm1291_vm5, %v1376_v10  ;;  %1821 = vadd.xlane.f32.xlu1 %v1820_v14  ;;  %v1667_v16 = vsel %vm1291_vm5, %v6443_v13, 0.0 }
 0x34e   : > { %1668 = vadd.xlane.f32.xlu0 %v1667_v16  ;;  %v6450_v18 = vpop.eup %5663 }
 0x34f   : > { %v1823_v17 = vsel %vm1291_vm5, %v6450_v18, 0.0 }
 0x356   : > { %1824 = vadd.xlane.f32.xlu0 %v1823_v17 }
 0x359   : > { %v1701_v19 = vpop.permute.xlu1 %1700 }
 0x35a   : > { %1721 = vmatpush.msrb.mxu2 %v1701_v19 }
 0x35e   : > { %1856 = vrot.lane.b32.xlu2 %v6403_v9, %s5879_s13 }
 0x366   : > { %1882 = vrot.lane.b32.xlu1 %v6407_v15, %s5879_s13 }
 0x36a   : > { %1726 = vrot.lane.b32.xlu0 %v6407_v15, %s5877_s21 }
 0x381   : > { %v1361_v0 = vpop.xlane.xlu2 %1360 }
 0x382   : > { %5665 = vrcp.f32 %v1361_v0  ;;  %v1388_v20 = vand.u32 2147483648, %v1361_v0  ;;  %v1386_v22 = vand.u32 2147483647, %v1361_v0  ;;  %vm1382_vm11 = vweird.f32 %v1361_v0 }
 0x384   : > { %v1389_v9 = vor.u32 1.1754944e-38, %v1388_v20  ;;  %vm1387_vm13 = vcmp.eq.f32.partialorder %v1386_v22, 8.507059e+37 }
 0x388   : > { %v5666_v1 = vpop.eup %5665 }
 0x389   : > { %v1378_v2 = vmul.f32 %v5666_v1, %v1361_v0  ;;  %vm1383_vm10 = vweird.f32 %v5666_v1 }
 0x38a   : > { %vm1384_vm12 = vmor %vm1382_vm11, %vm1383_vm10 }
 0x38b   : > { %v1379_v3 = vsub.f32 1.0, %v1378_v2 }
 0x38d   : > { %v1380_v21 = vmul.f32 %v5666_v1, %v1379_v3 }
 0x38f   : > { %v1381_v23 = vadd.f32 %v5666_v1, %v1380_v21 }
 0x391   : > { %v1385_v25 = vsel %vm1384_vm12, %v5666_v1, %v1381_v23  ;;  %v5298_v23 = vld [vmem:[%s6060_s19 + $0xb8] sm:$0xff] }
 0x392   : > { %v1390_v26 = vsel %vm1387_vm13, %v1389_v9, %v1385_v25 }
 0x393   : > { %v1391_v27 = vmul.f32 %v6424_v28, %v1390_v26 }
 0x395   : > { %5264 = vmatmul.msk.f32.vlgmr.msra.gmra.mxu3 %vm1291_vm5, %v1391_v27 }
 0x3b0   : > { %v1508_v15 = vpop.xlane.xlu0 %1507 }
 0x3b1   : > { %5667 = vrcp.f32 %v1508_v15  ;;  %v1523_v36 = vand.u32 2147483648, %v1508_v15  ;;  %vm1517_vm15 = vweird.f32 %v1508_v15  ;;  %v1521_v39 = vand.u32 2147483647, %v1508_v15 }
 0x3b3   : > { %v1524_v47 = vor.u32 1.1754944e-38, %v1523_v36  ;;  %vm1522_vm2 = vcmp.eq.f32.partialorder %v1521_v39, 8.507059e+37  ;;  %v5295_v36 = vld [vmem:[%s6060_s19 + $0xa0] sm:$0xff] }
 0x3b7   : > { %v5668_v29 = vpop.eup %5667 }
 0x3b8   : > { %v1513_v30 = vmul.f32 %v5668_v29, %v1508_v15  ;;  %v1511_v31 = vpop.xlane.xlu1 %1510  ;;  %vm1518_vm14 = vweird.f32 %v5668_v29 }
 0x3b9   : > { %5669 = vrcp.f32 %v1511_v31  ;;  %v1666_v32 = vpop.xlane.xlu2 %1665  ;;  %vm6462_vm1 = vmor %vm1517_vm15, %vm1518_vm14  ;;  %v1538_v50 = vand.u32 2147483648, %v1511_v31  ;;  %v1536_v55 = vand.u32 2147483647, %v1511_v31  ;;  %vm1532_vm6 = vweird.f32 %v1511_v31 }
 0x3ba   : > { %v1514_v33 = vsub.f32 1.0, %v1513_v30  ;;  %5671 = vrcp.f32 %v1666_v32  ;;  %v1681_v59 = vand.u32 2147483648, %v1666_v32  ;;  %v1679_v62 = vand.u32 2147483647, %v1666_v32 }
 0x3bb   : > { %v1539_v4 = vor.u32 1.1754944e-38, %v1538_v50  ;;  %vm1675_vm8 = vweird.f32 %v1666_v32  ;;  %vm1537_vm9 = vcmp.eq.f32.partialorder %v1536_v55, 8.507059e+37 }
 0x3bc   : > { %v1515_v34 = vmul.f32 %v5668_v29, %v1514_v33  ;;  %v1682_v12 = vor.u32 1.1754944e-38, %v1681_v59  ;;  %vm1680_vm11 = vcmp.eq.f32.partialorder %v1679_v62, 8.507059e+37  ;;  %v5303_v59 = vld [vmem:[%s6060_s19 + $0xd0] sm:$0xff]  ;;  %v5301_v62 = vld [vmem:[%s6060_s19 + $0xc0] sm:$0xff] }
 0x3be   : > { %v1516_v35 = vadd.f32 %v5668_v29, %v1515_v34 }
 0x3bf   : > { %v5670_v37 = vpop.eup %5669 }
 0x3c0   : > { %v5672_v40 = vpop.eup %5671  ;;  %v1528_v41 = vmul.f32 %v5670_v37, %v1511_v31  ;;  %v6466_v42 = vpop.xlane.xlu1 %1821  ;;  %v1520_v43 = vsel %vm6462_vm1, %v5668_v29, %v1516_v35  ;;  %vm1533_vm3 = vweird.f32 %v5670_v37  ;;  %v5610_v29 = vld [vmem:[%s7449_s29] ss:$0 sm:$0xff]  ;;  %v5296_v31 = vld [vmem:[%s6060_s19 + $0xa8] sm:$0xff] }
 0x3c1   : > { %v1671_v44 = vmul.f32 %v5672_v40, %v1666_v32  ;;  %5673 = vrcp.f32 %v6466_v42  ;;  %v6471_v46 = vpop.xlane.xlu0 %1668  ;;  %v1525_v54 = vsel %vm1522_vm2, %v1524_v47, %v1520_v43  ;;  %vm1676_vm4 = vweird.f32 %v5672_v40  ;;  %vm6475_vm7 = vmor %vm1532_vm6, %vm1533_vm3  ;;  %v1857_v6 = vpop.permute.xlu2 %1856 }
 0x3c2   : > { %v1529_v48 = vsub.f32 1.0, %v1528_v41  ;;  %5675 = vrcp.f32 %v6471_v46  ;;  %v1526_v60 = vmul.f32 %v6428_v38, %v1525_v54  ;;  %vm1677_vm10 = vmor %vm1675_vm8, %vm1676_vm4  ;;  %v1837_v0 = vand.u32 2147483648, %v6466_v42 }
 0x3c3   : > { %v1672_v52 = vsub.f32 1.0, %v1671_v44  ;;  %v1835_v21 = vand.u32 2147483647, %v6466_v42  ;;  %vm1831_vm13 = vweird.f32 %v6466_v42  ;;  %v1696_v33 = vand.u32 2147483648, %v6471_v46 }
 0x3c4   : > { %v1530_v53 = vmul.f32 %v5670_v37, %v1529_v48  ;;  %5269 = vmatmul.msk.f32.vlgmr.msra.gmra.mxu2 %vm1291_vm5, %v1526_v60  ;;  %v1838_v26 = vor.u32 1.1754944e-38, %v1837_v0  ;;  %vm1690_vm2 = vweird.f32 %v6471_v46  ;;  %v1187_v39 = vadd.f32 %v5610_v29, %v6378_v45  ;;  %v5302_v60 = vld [vmem:[%s6060_s19 + $0xc8] sm:$0xff]  ;;  %v5612_v0 = vld [vmem:[%s6108_s25 + $0x5] ss:$0 sm:$0xff] }
 0x3c5   : > { %v1673_v58 = vmul.f32 %v5672_v40, %v1672_v52  ;;  %1877 = vmatpush.msra.mxu2 %v1857_v6  ;;  %vm1836_vm15 = vcmp.eq.f32.partialorder %v1835_v21, 8.507059e+37  ;;  %v1697_v41 = vor.u32 1.1754944e-38, %v1696_v33  ;;  %v1190_v52 = vadd.f32 %v5610_v29, %v6386_v51  ;;  %v5283_v6 = vld [vmem:[%s6060_s19 + $0x60] sm:$0xff] }
 0x3c6   : > { %v1531_v61 = vadd.f32 %v5670_v37, %v1530_v53  ;;  %v5304_v53 = vld [vmem:[%s6060_s19 + $0xd8] sm:$0xff] }
 0x3c7   : > { %v5674_v63 = vpop.eup %5673  ;;  %v1674_v5 = vadd.f32 %v5672_v40, %v1673_v58 }
 0x3c8   : > { %v5676_v7 = vpop.eup %5675  ;;  %v1535_v10 = vsel %vm6475_vm7, %v5670_v37, %v1531_v61  ;;  %v1827_v38 = vmul.f32 %v5674_v63, %v6466_v42  ;;  %vm1832_vm12 = vweird.f32 %v5674_v63  ;;  %v1694_v37 = vand.u32 2147483647, %v6471_v46 }
 0x3c9   : > { %v1678_v11 = vsel %vm1677_vm10, %v5672_v40, %v1674_v5  ;;  %v1686_v14 = vmul.f32 %v5676_v7, %v6471_v46  ;;  %v6485_v16 = vpop.xlane.xlu0 %1824  ;;  %v1540_v17 = vsel %vm1537_vm9, %v1539_v4, %v1535_v10  ;;  %vm1833_vm14 = vmor %vm1831_vm13, %vm1832_vm12  ;;  %vm1691_vm1 = vweird.f32 %v5676_v7  ;;  %v5285_v4 = vld [vmem:[%s6060_s19 + $0x70] sm:$0xff] }
 0x3ca   : > { %v1828_v19 = vsub.f32 1.0, %v1827_v38  ;;  %5677 = vrcp.f32 %v6485_v16  ;;  %v1541_v2 = vmul.f32 %v6432_v49, %v1540_v17  ;;  %v1683_v3 = vsel %vm1680_vm11, %v1682_v12, %v1678_v11  ;;  %v5297_v49 = vld [vmem:[%s6060_s19 + $0xb0] sm:$0xff]  ;;  %vm1692_vm3 = vmor %vm1690_vm2, %vm1691_vm1  ;;  %1966 = vmatpush.msrb.mxu0 %v5285_v4  ;;  %v5290_v38 = vld [vmem:[%s6060_s19 + $0x88] sm:$0xff] }
 0x3cb   : > { %v1687_v1 = vsub.f32 1.0, %v1686_v14  ;;  %v1684_v22 = vmul.f32 %v6434_v56, %v1683_v3  ;;  %vm1695_vm4 = vcmp.eq.f32.partialorder %v1694_v37, 8.507059e+37  ;;  %v1192_v42 = vmax.f32 %v1187_v39, 0.0  ;;  %v5291_v10 = vld [vmem:[%s6060_s19 + $0x90] sm:$0xff]  ;;  %v5289_v14 = vld [vmem:[%s6060_s19 + $0x80] sm:$0xff] }
 0x3cc   : > { %v1829_v20 = vmul.f32 %v5674_v63, %v1828_v19  ;;  %5270 = vmatmul.msk.f32.vlgmr.msrb.gmra.mxu3 %vm1291_vm5, %v1541_v2  ;;  %v1852_v46 = vand.u32 2147483648, %v6485_v16  ;;  %vm1846_vm7 = vweird.f32 %v6485_v16  ;;  %v1850_v45 = vand.u32 2147483647, %v6485_v16  ;;  %v5614_v39 = vld [vmem:[%s6108_s25 + $0x3] ss:$0 sm:$0xff] }
 0x3cd   : > { %v1688_v25 = vmul.f32 %v5676_v7, %v1687_v1  ;;  %5275 = vmatmul.msk.f32.vlgmr.msrb.gmra.mxu2 %vm1291_vm5, %v1684_v22  ;;  %vm1934_vm10 = vcmask 130048   ;;  %vm1937_vm11 = vcmask 195584  }
 0x3ce   : > { %v1830_v9 = vadd.f32 %v5674_v63, %v1829_v20  ;;  %2100 = vmatpush.msrb.mxu2 %v5298_v23  ;;  %v1853_v58 = vor.u32 1.1754944e-38, %v1852_v46  ;;  %vm1851_vm9 = vcmp.eq.f32.partialorder %v1850_v45, 8.507059e+37  ;;  %v5613_v23 = vld [vmem:[%s6108_s25 + $0x6] ss:$0 sm:$0xff]  ;;  %v5883_v45 = vmov 32.0  }
 0x3cf   : > { %v1689_v32 = vadd.f32 %v5676_v7, %v1688_v25  ;;  %5679 = vrcp.f32 %v5883_v45 }
 0x3d0   : > { %v5678_v27 = vpop.eup %5677  ;;  %v1834_v15 = vsel %vm1833_vm14, %v5674_v63, %v1830_v9  ;;  %2101 = vmatpush.msrb.mxu2 %v5297_v49  ;;  %v1412_v5 = vpop.f32.mrf.mxu2 }
 0x3d1   : > { %v1842_v56 = vmul.f32 %v5678_v27, %v6485_v16  ;;  %v1839_v30 = vsel %vm1836_vm15, %v1838_v26, %v1834_v15  ;;  %v1693_v40 = vsel %vm1692_vm3, %v5676_v7, %v1689_v32  ;;  %vm1847_vm6 = vweird.f32 %v5678_v27  ;;  %v5292_v7 = vld [vmem:[%s6060_s19 + $0x98] sm:$0xff] }
 0x3d2   : > { %v1840_v35 = vmul.f32 %v6440_v8, %v1839_v30  ;;  %2102 = vmatpush.msrb.mxu2 %v5296_v31  ;;  %v1698_v43 = vsel %vm1695_vm4, %v1697_v41, %v1693_v40  ;;  %v1154_v8 = vld [vmem:[%s7450_s27] sm:$0xff]  ;;  %vm1848_vm8 = vmor %vm1846_vm7, %vm1847_vm6  ;;  %2062 = vmatpush.msrb.mxu1 %v5292_v7 }
 0x3d3   : > { %v1843_v34 = vsub.f32 1.0, %v1842_v56  ;;  %v1699_v48 = vmul.f32 %v6443_v13, %v1698_v43  ;;  %v1194_v50 = vadd.f32 %v1192_v42, %v1154_v8  ;;  %v1193_v13 = vmax.f32 %v1190_v52, 0.0 }
 0x3d4   : > { %2103 = vmatpush.msrb.mxu2 %v5295_v36  ;;  %2063 = vmatpush.msrb.mxu1 %v5291_v10 }
 0x3d5   : > { %v1844_v28 = vmul.f32 %v5678_v27, %v1843_v34  ;;  %5281 = vmatmul.msk.f32.vlgmr.msra.gmra.mxu2 %vm1291_vm5, %v1840_v35  ;;  %v1195_v63 = vadd.f32 %v1193_v13, %v1154_v8 }
 0x3d6   : > { %2064 = vmatpush.msrb.mxu1 %v5290_v38 }
 0x3d7   : > { %v1845_v44 = vadd.f32 %v5678_v27, %v1844_v28 }
 0x3d8   : > { %v1883_v54 = vpop.permute.xlu1 %1882  ;;  %2065 = vmatpush.msrb.mxu1 %v5289_v14 }
 0x3d9   : > { %v1849_v55 = vsel %vm1848_vm8, %v5678_v27, %v1845_v44 }
 0x3da   : > { %v1854_v51 = vsel %vm1851_vm9, %v1853_v58, %v1849_v55 }
 0x3db   : > { %v1855_v61 = vmul.f32 %v6450_v18, %v1854_v51  ;;  %v5284_v18 = vld [vmem:[%s6060_s19 + $0x68] sm:$0xff] }
 0x3dc   : > { %v1727_v47 = vpop.permute.xlu0 %1726  ;;  %1967 = vmatpush.msrb.mxu0 %v5284_v18 }
 0x3dd   : > { %1747 = vmatpush.msra.mxu3 %v1727_v47  ;;  %5299 = vmatmul.msk.f32.vlgmr.msrb.gmra.mxu2 %vm1162_vm0, %v1194_v50  ;;  %v5680_v47 = vpop.eup %5679 }
 0x3de   : > { %5276 = vmatmul.msk.f32.vlgmr.msra.gmra.mxu3 %vm1291_vm5, %v1699_v48  ;;  %1968 = vmatpush.msrb.mxu0 %v5283_v6  ;;  %v1985_v48 = vmul.f32 32.0, %v5680_v47  ;;  %vm1989_vm12 = vweird.f32 %v5680_v47 }
 0x3df   : > { %1903 = vmatpush.msrb.mxu3 %v1883_v54 }
 0x3e1   : > { %2130 = vmatpush.msra.mxu3 %v5304_v53 }
 0x3e3   : > { %2131 = vmatpush.msra.mxu3 %v5303_v59 }
 0x3e5   : > { %2132 = vmatpush.msra.mxu3 %v5302_v60  ;;  %5300 = vmatmul.msk.f32.gmra.mxu2 %vm1162_vm0, %v1195_v63 }
 0x3e6   : > { %5282 = vmatmul.msk.f32.vlgmr.msrb.gmra.mxu3 %vm1291_vm5, %v1855_v61 }
 0x3e7   : > { %2133 = vmatpush.msra.mxu3 %v5301_v62 }
 0x3ee   : > { %5305 = vmatmul.msk.f32.vlgmr.msra.gmra.mxu3 %vm1162_vm0, %v1194_v50  ;;  %v1986_v50 = vsub.f32 1.0, %v1985_v48 }
 0x3f0   : > { %v1987_v52 = vmul.f32 %v5680_v47, %v1986_v50 }
 0x3f2   : > { %v1988_v53 = vadd.f32 %v5680_v47, %v1987_v52 }
 0x3f6   : > { %5306 = vmatmul.msk.f32.gmra.mxu3 %vm1162_vm0, %v1195_v63 }
 0x418   : > { %v1435_v11 = vpop.f32.mrf.mxu3 }
 0x447   : > { %v1566_v12 = vpop.f32.mrf.mxu2 }
 0x448   : > { %1910 = vrot.lane.b32.xlu0 %v1566_v12, %s5880_s0 }
 0x44f   : > { %v1593_v16 = vpop.f32.mrf.mxu3 }
 0x450   : > { %v1723_v17 = vpop.f32.mrf.mxu2  ;;  %1912 = vrot.lane.b32.xlu0 %v1593_v16, %s5880_s0 }
 0x451   : > { %1918 = vrot.lane.b32.xlu2 %v1723_v17, %s5881_s24 }
 0x458   : > { %v1879_v19 = vpop.f32.mrf.mxu2 }
 0x459   : > { %1926 = vrot.lane.b32.xlu1 %v1879_v19, %s5882_s30  ;;  %v5615_v19 = vld [vmem:[%s6140_s5] ss:$0 sm:$0xff] }
 0x460   : > { %v2105_v2 = vpop.f32.mrf.mxu2 }
 0x461   : > { %v1749_v1 = vpop.f32.mrf.mxu3  ;;  %v6540_v3 = vadd.f32 %v5612_v0, %v2105_v2  ;;  %v5616_v2 = vld [vmem:[%s6146_s20] ss:$0 sm:$0xff] }
 0x462   : > { %1920 = vrot.lane.b32.xlu2 %v1749_v1, %s5881_s24 }
 0x463   : > { %5307 = vmatpush.xpose.msk.msra.mxu0 %vm1291_vm5, %v6540_v3 }
 0x468   : > { %v2108_v21 = vpop.f32.mrf.mxu2 }
 0x469   : > { %v1905_v20 = vpop.f32.mrf.mxu3  ;;  %v6545_v22 = vadd.f32 %v5612_v0, %v2108_v21 }
 0x46a   : > { %1928 = vrot.lane.b32.xlu1 %v1905_v20, %s5882_s30 }
 0x46b   : > { %5309 = vmatpush.xpose.msk.msra.mxu1 %vm1291_vm5, %v6545_v22 }
 0x471   : > { %v2135_v9 = vpop.f32.mrf.mxu3 }
 0x472   : > { %v6550_v25 = vadd.f32 %v5613_v23, %v2135_v9 }
 0x474   : > { %2259 = vmatpush.msra.mxu2 %v6550_v25 }
 0x479   : > { %v2138_v26 = vpop.f32.mrf.mxu3 }
 0x47a   : > { %v6553_v49 = vadd.f32 %v5613_v23, %v2138_v26 }
 0x47c   : > { %2282 = vmatpush.msrb.mxu3 %v6553_v49 }
 0x4ab   : > { %v1919_v29 = vpop.permute.xlu2 %1918 }
 0x4ba   : > { %v1911_v27 = vpop.permute.xlu0 %1910 }
 0x4bb   : > { %v1932_v15 = vsel %vm1291_vm5, %v1412_v5, %v1911_v27 }
 0x4bc   : > { %v1935_v30 = vsel %vm1934_vm10, %v1932_v15, %v1919_v29  ;;  %v1921_v34 = vpop.permute.xlu2 %1920 }
 0x4c2   : > { %v1913_v32 = vpop.permute.xlu0 %1912 }
 0x4c3   : > { %v1933_v33 = vsel %vm1291_vm5, %v1435_v11, %v1913_v32 }
 0x4c4   : > { %v1936_v36 = vsel %vm1934_vm10, %v1933_v33, %v1921_v34  ;;  %v5617_v34 = vld [vmem:[%s6108_s25 + $0x4] ss:$0 sm:$0xff] }
 0x4cb   : > { %v1927_v56 = vpop.permute.xlu1 %1926 }
 0x4cc   : > { %v1938_v31 = vsel %vm1937_vm11, %v1935_v30, %v1927_v56 }
 0x4cd   : > { %5287 = vmatmul.msk.f32.vlgmr.msrb.gmra.mxu0 %vm1162_vm0, %v1938_v31 }
 0x4dc   : > { %v1929_v35 = vpop.permute.xlu1 %1928 }
 0x4dd   : > { %v1939_v37 = vsel %vm1937_vm11, %v1936_v36, %v1929_v35 }
 0x4de   : > { %5288 = vmatmul.msk.f32.gmra.mxu0 %vm1162_vm0, %v1939_v37 }
 0x54a   : > { %v1970_v40 = vpop.f32.mrf.mxu0 }
 0x54b   : > { %v1971_v28 = vadd.f32 %v5614_v39, %v1970_v40 }
 0x54d   : > { %v1976_v41 = vadd.f32 %v1971_v28, %v6342_v24 }
 0x54f   : > { %v1978_v42 = vsel %vm1162_vm0, %v1976_v41, 0.0 }
 0x550   : > { %1979 = vadd.xlane.f32.xlu0 %v1978_v42 }
 0x55b   : > { %v1973_v43 = vpop.f32.mrf.mxu0 }
 0x55c   : > { %v1974_v8 = vadd.f32 %v5614_v39, %v1973_v43 }
 0x55e   : > { %v1977_v44 = vadd.f32 %v1974_v8, %v6342_v24  ;;  %v6575_v24 = vsel %vm1989_vm12, %v5680_v47, %v1988_v53 }
 0x560   : > { %v1981_v46 = vsel %vm1162_vm0, %v1977_v44, 0.0 }
 0x561   : > { %1982 = vadd.xlane.f32.xlu2 %v1981_v46 }
 0x579   : > { %2289 = vrot.lane.b32.xlu2 %v6540_v3, %s5878_s9 }
 0x581   : > { %2447 = vrot.lane.b32.xlu2 %v6540_v3, %s5877_s21 }
 0x589   : > { %2475 = vrot.lane.b32.xlu2 %v6545_v22, %s5877_s21 }
 0x5c3   : > { %v1980_v55 = vpop.xlane.xlu0 %1979 }
 0x5c4   : > { %v1991_v54 = vmul.f32 %v6575_v24, %v1980_v55 }
 0x5c6   : > { %v1993_v58 = vsub.f32 %v1976_v41, %v1991_v54 }
 0x5c8   : > { %v1995_v59 = vmul.f32 %v1993_v58, %v1993_v58 }
 0x5ca   : > { %v1997_v13 = vsel %vm1162_vm0, %v1995_v59, 0.0 }
 0x5cb   : > { %1998 = vadd.xlane.f32.xlu1 %v1997_v13 }
 0x5d4   : > { %v1983_v51 = vpop.xlane.xlu2 %1982 }
 0x5d5   : > { %v1992_v60 = vmul.f32 %v6575_v24, %v1983_v51 }
 0x5d7   : > { %v1994_v61 = vsub.f32 %v1977_v44, %v1992_v60 }
 0x5d9   : > { %v1996_v62 = vmul.f32 %v1994_v61, %v1994_v61 }
 0x5db   : > { %v2000_v63 = vsel %vm1162_vm0, %v1996_v62, 0.0 }
 0x5dc   : > { %2001 = vadd.xlane.f32.xlu0 %v2000_v63  ;;  %v2290_v57 = vpop.permute.xlu2 %2289 }
 0x5dd   : > { %5313 = vmatpush.xpose.msk.msrb.mxu0 %vm1291_vm5, %v2290_v57 }
 0x5e4   : > { %v2448_v39 = vpop.permute.xlu2 %2447 }
 0x5ec   : > { %v2476_v42 = vpop.permute.xlu2 %2475 }
 0x5f0   : > { %2317 = vrot.lane.b32.xlu0 %v6545_v22, %s5878_s9 }
 0x63e   : > { %v1999_v4 = vpop.xlane.xlu1 %1998 }
 0x63f   : > { %v2003_v18 = vmul.f32 %v1999_v4, %v6575_v24 }
 0x641   : > { %v2005_v5 = vadd.f32 1e-05, %v2003_v18 }
 0x643   : > { %5681 = vrsqrt.f32 %v2005_v5  ;;  %vm2013_vm14 = vweird.f32 %v2005_v5 }
 0x649   : > { %v5682_v6 = vpop.eup %5681 }
 0x64a   : > { %v2008_v7 = vmul.f32 %v5682_v6, %v2005_v5  ;;  %vm2014_vm13 = vweird.f32 %v5682_v6 }
 0x64b   : > { %vm2015_vm15 = vmor %vm2013_vm14, %vm2014_vm13 }
 0x64c   : > { %v2009_v10 = vmul.f32 %v5682_v6, %v2008_v7 }
 0x64e   : > { %v2010_v11 = vmul.f32 0.5, %v2009_v10 }
 0x64f   : > { %v2002_v38 = vpop.xlane.xlu0 %2001 }
 0x650   : > { %v2004_v12 = vmul.f32 %v2002_v38, %v6575_v24  ;;  %v2011_v14 = vsub.f32 1.5, %v2010_v11  ;;  %v5573_v38 = vpack.i.bf16 %v6553_v49, %v6550_v25 }
 0x652   : > { %v2006_v16 = vadd.f32 1e-05, %v2004_v12  ;;  %v2012_v17 = vmul.f32 %v5682_v6, %v2011_v14 }
 0x654   : > { %5683 = vrsqrt.f32 %v2006_v16  ;;  %v2016_v0 = vsel %vm2015_vm15, %v5682_v6, %v2012_v17  ;;  %vm2023_vm2 = vweird.f32 %v2006_v16 }
 0x655   : > { %v2027_v1 = vmul.f32 %v2016_v0, %v1993_v58 }
 0x657   : > { %v2031_v20 = vmul.f32 %v5615_v19, %v2027_v1 }
 0x659   : > { %v6588_v9 = vadd.f32 %v5616_v2, %v2031_v20 }
 0x65a   : > { %v5684_v21 = vpop.eup %5683 }
 0x65b   : > { %v2018_v23 = vmul.f32 %v5684_v21, %v2006_v16  ;;  %5293 = vmatmul.msk.f32.vlgmr.msrb.gmra.mxu1 %vm1162_vm0, %v6588_v9  ;;  %vm2024_vm1 = vweird.f32 %v5684_v21 }
 0x65c   : > { %vm2025_vm3 = vmor %vm2023_vm2, %vm2024_vm1 }
 0x65d   : > { %v2019_v26 = vmul.f32 %v5684_v21, %v2018_v23 }
 0x65f   : > { %v2020_v27 = vmul.f32 0.5, %v2019_v26 }
 0x661   : > { %v2021_v15 = vsub.f32 1.5, %v2020_v27 }
 0x662   : > { %v2318_v29 = vpop.permute.xlu0 %2317 }
 0x663   : > { %v2022_v56 = vmul.f32 %v5684_v21, %v2021_v15  ;;  %5315 = vmatpush.xpose.msk.msrb.mxu1 %vm1291_vm5, %v2318_v29 }
 0x665   : > { %v2026_v30 = vsel %vm2025_vm3, %v5684_v21, %v2022_v56 }
 0x666   : > { %v2028_v31 = vmul.f32 %v2026_v30, %v1994_v61 }
 0x668   : > { %v2032_v32 = vmul.f32 %v5615_v19, %v2028_v31 }
 0x66a   : > { %v6593_v33 = vadd.f32 %v5616_v2, %v2032_v32 }
 0x66c   : > { %5294 = vmatmul.msk.f32.gmra.mxu1 %vm1162_vm0, %v6593_v33 }
 0x6d8   : > { %v2067_v35 = vpop.f32.mrf.mxu1 }
 0x6d9   : > { %v2068_v36 = vadd.f32 %v5617_v34, %v2067_v35 }
 0x6db   : > { %v2073_v37 = vmul.f32 0.35355338, %v2068_v36 }
 0x6dd   : > { %2287 = vrot.lane.b32.xlu1 %v2073_v37, %s5878_s9  ;;  %2601 = vrot.lane.b32.xlu2 %v2073_v37, %s5879_s13 }
 0x6de   : > { %5308 = vmatmul.msk.f32.vlgmr.msra.gmra.mxu0 %vm1291_vm5, %v2073_v37 }
 0x6df   : > { %5319 = vmatpush.xpose.msk.msra.mxu0 %vm1291_vm5, %v2448_v39 }
 0x6e5   : > { %2445 = vrot.lane.b32.xlu1 %v2073_v37, %s5877_s21 }
 0x6e9   : > { %v2070_v40 = vpop.f32.mrf.mxu1 }
 0x6ea   : > { %v2071_v28 = vadd.f32 %v5617_v34, %v2070_v40 }
 0x6ec   : > { %v2074_v41 = vmul.f32 0.35355338, %v2071_v28 }
 0x6ee   : > { %2315 = vrot.lane.b32.xlu0 %v2074_v41, %s5878_s9  ;;  %5310 = vmatmul.msk.f32.vlgmr.msra.gmra.mxu1 %vm1291_vm5, %v2074_v41 }
 0x6ef   : > { %2473 = vrot.lane.b32.xlu1 %v2074_v41, %s5877_s21  ;;  %5321 = vmatpush.xpose.msk.msra.mxu1 %vm1291_vm5, %v2476_v42 }
 0x6f6   : > { %2603 = vrot.lane.b32.xlu0 %v6540_v3, %s5879_s13 }
 0x6f7   : > { %2629 = vrot.lane.b32.xlu1 %v2074_v41, %s5879_s13 }
 0x6fe   : > { %2631 = vrot.lane.b32.xlu0 %v6545_v22, %s5879_s13 }
 0x737   : > { %v2602_v22 = vpop.permute.xlu2 %2601 }
 0x74f   : > { %v2288_v43 = vpop.permute.xlu1 %2287 }
 0x750   : > { %5314 = vmatmul.msk.f32.vlgmr.msrb.gmra.mxu0 %vm1291_vm5, %v2288_v43 }
 0x757   : > { %v2446_v8 = vpop.permute.xlu1 %2445 }
 0x758   : > { %5320 = vmatmul.msk.f32.vlgmr.msra.gmra.mxu0 %vm1291_vm5, %v2446_v8 }
 0x75b   : > { %v2164_v44 = vpop.f32.mrf.mxu0 }
 0x75c   : > { %v2193_v46 = vsel %vm1291_vm5, %v2164_v44, -inf }
 0x75d   : > { %2194 = vmax.xlane.f32.xlu2 %v2193_v46 }
 0x760   : > { %v2316_v45 = vpop.permute.xlu0 %2315 }
 0x761   : > { %5316 = vmatmul.msk.f32.vlgmr.msrb.gmra.mxu1 %vm1291_vm5, %v2316_v45  ;;  %v2474_v47 = vpop.permute.xlu1 %2473 }
 0x768   : > { %v2604_v3 = vpop.permute.xlu0 %2603 }
 0x769   : > { %5322 = vmatmul.msk.f32.vlgmr.msra.gmra.mxu1 %vm1291_vm5, %v2474_v47  ;;  %5325 = vmatpush.xpose.msk.msrb.mxu0 %vm1291_vm5, %v2604_v3  ;;  %v2630_v53 = vpop.permute.xlu1 %2629 }
 0x76b   : > { %v2190_v48 = vpop.f32.mrf.mxu1 }
 0x76c   : > { %5326 = vmatmul.msk.f32.vlgmr.msrb.gmra.mxu0 %vm1291_vm5, %v2602_v22  ;;  %v2196_v50 = vsel %vm1291_vm5, %v2190_v48, -inf }
 0x76d   : > { %2197 = vmax.xlane.f32.xlu0 %v2196_v50 }
 0x770   : > { %v2632_v52 = vpop.permute.xlu0 %2631 }
 0x771   : > { %5327 = vmatpush.xpose.msk.msrb.mxu1 %vm1291_vm5, %v2632_v52 }
 0x774   : > { %5328 = vmatmul.msk.f32.vlgmr.msrb.gmra.mxu1 %vm1291_vm5, %v2630_v53 }
 0x7cd   : > { %v2312_v55 = vpop.f32.mrf.mxu0 }
 0x7ce   : > { %v2343_v54 = vsel %vm1291_vm5, %v2312_v55, -inf }
 0x7cf   : > { %2344 = vmax.xlane.f32.xlu1 %v2343_v54 }
 0x7d0   : > { %v2195_v58 = vpop.xlane.xlu2 %2194 }
 0x7d1   : > { %v2199_v59 = vsub.f32 %v2164_v44, %v2195_v58 }
 0x7d3   : > { %v2201_v13 = vmul.f32 1.442695, %v2199_v59 }
 0x7d5   : > { %5685 = vpow2.f32 %v2201_v13  ;;  %v2470_v51 = vpop.f32.mrf.mxu0 }
 0x7d6   : > { %v2501_v60 = vsel %vm1291_vm5, %v2470_v51, -inf }
 0x7d7   : > { %2502 = vmax.xlane.f32.xlu0 %v2501_v60 }
 0x7db   : > { %v6624_v61 = vpop.eup %5685 }
 0x7dc   : > { %v2205_v62 = vsel %vm1291_vm5, %v6624_v61, 0.0 }
 0x7dd   : > { %2206 = vadd.xlane.f32.xlu1 %v2205_v62 }
 0x7de   : > { %v2340_v63 = vpop.f32.mrf.mxu1 }
 0x7df   : > { %v2346_v57 = vsel %vm1291_vm5, %v2340_v63, -inf }
 0x7e0   : > { %2347 = vmax.xlane.f32.xlu2 %v2346_v57  ;;  %v2198_v11 = vpop.xlane.xlu0 %2197 }
 0x7e1   : > { %v2200_v12 = vsub.f32 %v2190_v48, %v2198_v11 }
 0x7e3   : > { %v2203_v14 = vmul.f32 1.442695, %v2200_v12 }
 0x7e5   : > { %5687 = vpow2.f32 %v2203_v14 }
 0x7e6   : > { %v2498_v4 = vpop.f32.mrf.mxu1 }
 0x7e7   : > { %v2504_v18 = vsel %vm1291_vm5, %v2498_v4, -inf }
 0x7e8   : > { %2505 = vmax.xlane.f32.xlu1 %v2504_v18 }
 0x7e9   : > { %v2626_v5 = vpop.f32.mrf.mxu0 }
 0x7ea   : > { %v2657_v6 = vsel %vm1291_vm5, %v2626_v5, -inf }
 0x7eb   : > { %2658 = vmax.xlane.f32.xlu2 %v2657_v6  ;;  %v6640_v16 = vpop.eup %5687 }
 0x7ec   : > { %v2208_v17 = vsel %vm1291_vm5, %v6640_v16, 0.0 }
 0x7f1   : > { %v6631_v7 = vpop.f32.mrf.mxu1 }
 0x7f2   : > { %v2660_v10 = vsel %vm1291_vm5, %v6631_v7, -inf }
 0x7f3   : > { %2661 = vmax.xlane.f32.xlu0 %v2660_v10 }
 0x801   : > { %2549 = vrot.lane.b32.xlu1 %v6550_v25, %s5877_s21 }
 0x803   : > { %5574 = vrot.lane.b32.xlu2 %v5573_v38, %s5878_s9 }
 0x82c   : > { %2209 = vadd.xlane.f32.xlu2 %v2208_v17 }
 0x842   : > { %v2345_v19 = vpop.xlane.xlu1 %2344 }
 0x843   : > { %v2349_v0 = vsub.f32 %v2312_v55, %v2345_v19 }
 0x845   : > { %v2351_v1 = vmul.f32 1.442695, %v2349_v0 }
 0x847   : > { %5689 = vpow2.f32 %v2351_v1 }
 0x84a   : > { %v2503_v2 = vpop.xlane.xlu0 %2502 }
 0x84b   : > { %v2507_v20 = vsub.f32 %v2470_v51, %v2503_v2 }
 0x84d   : > { %v6644_v21 = vpop.eup %5689  ;;  %v2509_v23 = vmul.f32 1.442695, %v2507_v20 }
 0x84e   : > { %v2355_v26 = vsel %vm1291_vm5, %v6644_v21, 0.0 }
 0x84f   : > { %5691 = vpow2.f32 %v2509_v23  ;;  %2356 = vadd.xlane.f32.xlu0 %v2355_v26 }
 0x850   : > { %v2207_v27 = vpop.xlane.xlu1 %2206 }
 0x851   : > { %5693 = vrcp.f32 %v2207_v27  ;;  %v2222_v39 = vand.u32 2147483648, %v2207_v27  ;;  %v2220_v41 = vand.u32 2147483647, %v2207_v27  ;;  %vm2216_vm6 = vweird.f32 %v2207_v27 }
 0x853   : > { %v2348_v15 = vpop.xlane.xlu2 %2347  ;;  %v2223_v45 = vor.u32 1.1754944e-38, %v2222_v39  ;;  %vm2221_vm8 = vcmp.eq.f32.partialorder %v2220_v41, 8.507059e+37 }
 0x854   : > { %v2350_v29 = vsub.f32 %v2340_v63, %v2348_v15 }
 0x855   : > { %v6648_v30 = vpop.eup %5691 }
 0x856   : > { %v2353_v56 = vmul.f32 1.442695, %v2350_v29  ;;  %v2513_v31 = vsel %vm1291_vm5, %v6648_v30, 0.0 }
 0x857   : > { %v5694_v32 = vpop.eup %5693  ;;  %2514 = vadd.xlane.f32.xlu2 %v2513_v31 }
 0x858   : > { %5695 = vpow2.f32 %v2353_v56  ;;  %v2212_v34 = vmul.f32 %v5694_v32, %v2207_v27  ;;  %vm2217_vm4 = vweird.f32 %v5694_v32 }
 0x859   : > { %vm2218_vm7 = vmor %vm2216_vm6, %vm2217_vm4 }
 0x85a   : > { %v2213_v36 = vsub.f32 1.0, %v2212_v34 }
 0x85b   : > { %v2506_v35 = vpop.xlane.xlu1 %2505 }
 0x85c   : > { %v2508_v37 = vsub.f32 %v2498_v4, %v2506_v35  ;;  %v2214_v28 = vmul.f32 %v5694_v32, %v2213_v36 }
 0x85e   : > { %v6652_v40 = vpop.eup %5695  ;;  %v2511_v42 = vmul.f32 1.442695, %v2508_v37  ;;  %v2659_v43 = vpop.xlane.xlu2 %2658  ;;  %v2215_v46 = vadd.f32 %v5694_v32, %v2214_v28 }
 0x85f   : > { %v2663_v8 = vsub.f32 %v2626_v5, %v2659_v43  ;;  %v2358_v44 = vsel %vm1291_vm5, %v6652_v40, 0.0 }
 0x860   : > { %5697 = vpow2.f32 %v2511_v42  ;;  %2359 = vadd.xlane.f32.xlu1 %v2358_v44  ;;  %v2219_v3 = vsel %vm2218_vm7, %v5694_v32, %v2215_v46 }
 0x861   : > { %v2665_v47 = vmul.f32 1.442695, %v2663_v8  ;;  %v2224_v22 = vsel %vm2221_vm8, %v2223_v45, %v2219_v3 }
 0x862   : > { %v2225_v48 = vmul.f32 %v6624_v61, %v2224_v22 }
 0x863   : > { %5699 = vpow2.f32 %v2665_v47 }
 0x864   : > { %5311 = vmatmul.msk.f32.vlgmr.msra.gmra.mxu2 %vm1291_vm5, %v2225_v48 }
 0x866   : > { %v6657_v50 = vpop.eup %5697  ;;  %v2662_v52 = vpop.xlane.xlu0 %2661 }
 0x867   : > { %v5575_v53 = vpop.permute.xlu2 %5574  ;;  %v2664_v55 = vsub.f32 %v6631_v7, %v2662_v52  ;;  %v2516_v59 = vsel %vm1291_vm5, %v6657_v50, 0.0 }
 0x868   : > { %v5577_v54 = vunpack.i.h.bf16 %v5575_v53  ;;  %v5576_v58 = vunpack.i.l.bf16 %v5575_v53  ;;  %2517 = vadd.xlane.f32.xlu0 %v2516_v59 }
 0x869   : > { %v6663_v13 = vpop.eup %5699  ;;  %v2667_v51 = vmul.f32 1.442695, %v2664_v55 }
 0x86a   : > { %2413 = vmatpush.msrb.mxu2 %v5576_v58  ;;  %2440 = vmatpush.msra.mxu3 %v5577_v54  ;;  %v2669_v60 = vsel %vm1291_vm5, %v6663_v13, 0.0 }
 0x86b   : > { %5701 = vpow2.f32 %v2667_v51  ;;  %2670 = vadd.xlane.f32.xlu1 %v2669_v60 }
 0x86f   : > { %2705 = vrot.lane.b32.xlu2 %v6550_v25, %s5879_s13 }
 0x871   : > { %v6667_v61 = vpop.eup %5701 }
 0x872   : > { %v2672_v62 = vsel %vm1291_vm5, %v6667_v61, 0.0 }
 0x873   : > { %2673 = vadd.xlane.f32.xlu0 %v2672_v62  ;;  %v2550_v63 = vpop.permute.xlu1 %2549 }
 0x874   : > { %2570 = vmatpush.msra.mxu2 %v2550_v63 }
 0x884   : > { %2731 = vrot.lane.b32.xlu1 %v6553_v49, %s5879_s13 }
 0x887   : > { %2575 = vrot.lane.b32.xlu0 %v6553_v49, %s5877_s21 }
 0x89f   : > { %v2210_v57 = vpop.xlane.xlu2 %2209 }
 0x8a0   : > { %5703 = vrcp.f32 %v2210_v57  ;;  %v2237_v6 = vand.u32 2147483648, %v2210_v57  ;;  %v2235_v25 = vand.u32 2147483647, %v2210_v57  ;;  %vm2231_vm12 = vweird.f32 %v2210_v57 }
 0x8a2   : > { %v2238_v38 = vor.u32 1.1754944e-38, %v2237_v6  ;;  %vm2236_vm14 = vcmp.eq.f32.partialorder %v2235_v25, 8.507059e+37 }
 0x8a6   : > { %v5704_v4 = vpop.eup %5703 }
 0x8a7   : > { %v2227_v18 = vmul.f32 %v5704_v4, %v2210_v57  ;;  %vm2232_vm9 = vweird.f32 %v5704_v4 }
 0x8a8   : > { %vm2233_vm13 = vmor %vm2231_vm12, %vm2232_vm9 }
 0x8a9   : > { %v2228_v5 = vsub.f32 1.0, %v2227_v18 }
 0x8ab   : > { %v2229_v7 = vmul.f32 %v5704_v4, %v2228_v5 }
 0x8ad   : > { %v2230_v10 = vadd.f32 %v5704_v4, %v2229_v7 }
 0x8af   : > { %v2234_v11 = vsel %vm2233_vm13, %v5704_v4, %v2230_v10 }
 0x8b0   : > { %v2239_v12 = vsel %vm2236_vm14, %v2238_v38, %v2234_v11 }
 0x8b1   : > { %v2240_v14 = vmul.f32 %v6640_v16, %v2239_v12 }
 0x8b3   : > { %5312 = vmatmul.msk.f32.vlgmr.msrb.gmra.mxu3 %vm1291_vm5, %v2240_v14 }
 0x8c2   : > { %v2357_v49 = vpop.xlane.xlu0 %2356 }
 0x8c3   : > { %5705 = vrcp.f32 %v2357_v49  ;;  %v2372_v2 = vand.u32 2147483648, %v2357_v49  ;;  %v2370_v23 = vand.u32 2147483647, %v2357_v49  ;;  %vm2366_vm1 = vweird.f32 %v2357_v49 }
 0x8c5   : > { %v2373_v15 = vor.u32 1.1754944e-38, %v2372_v2  ;;  %vm2371_vm3 = vcmp.eq.f32.partialorder %v2370_v23, 8.507059e+37 }
 0x8c9   : > { %v5706_v17 = vpop.eup %5705 }
 0x8ca   : > { %v2362_v19 = vmul.f32 %v5706_v17, %v2357_v49  ;;  %v2515_v0 = vpop.xlane.xlu2 %2514  ;;  %vm2367_vm15 = vweird.f32 %v5706_v17 }
 0x8cb   : > { %5707 = vrcp.f32 %v2515_v0  ;;  %vm2368_vm2 = vmor %vm2366_vm1, %vm2367_vm15  ;;  %v2530_v35 = vand.u32 2147483648, %v2515_v0  ;;  %v2528_v37 = vand.u32 2147483647, %v2515_v0  ;;  %vm2524_vm6 = vweird.f32 %v2515_v0 }
 0x8cc   : > { %v2363_v1 = vsub.f32 1.0, %v2362_v19 }
 0x8cd   : > { %v2531_v42 = vor.u32 1.1754944e-38, %v2530_v35  ;;  %vm2529_vm8 = vcmp.eq.f32.partialorder %v2528_v37, 8.507059e+37 }
 0x8ce   : > { %v2364_v20 = vmul.f32 %v5706_v17, %v2363_v1 }
 0x8d0   : > { %v2365_v26 = vadd.f32 %v5706_v17, %v2364_v20 }
 0x8d1   : > { %v5708_v27 = vpop.eup %5707 }
 0x8d2   : > { %v2369_v16 = vsel %vm2368_vm2, %v5706_v17, %v2365_v26  ;;  %v2520_v56 = vmul.f32 %v5708_v27, %v2515_v0  ;;  %vm2525_vm4 = vweird.f32 %v5708_v27  ;;  %v2706_v39 = vpop.permute.xlu2 %2705 }
 0x8d3   : > { %v2360_v29 = vpop.xlane.xlu1 %2359  ;;  %v2374_v31 = vsel %vm2371_vm3, %v2373_v15, %v2369_v16  ;;  %vm2526_vm7 = vmor %vm2524_vm6, %vm2525_vm4 }
 0x8d4   : > { %5709 = vrcp.f32 %v2360_v29  ;;  %v2521_v32 = vsub.f32 1.0, %v2520_v56  ;;  %v2375_v34 = vmul.f32 %v6644_v21, %v2374_v31  ;;  %v2387_v45 = vand.u32 2147483648, %v2360_v29 }
 0x8d5   : > { %v2385_v48 = vand.u32 2147483647, %v2360_v29  ;;  %vm2381_vm12 = vweird.f32 %v2360_v29 }
 0x8d6   : > { %v2522_v36 = vmul.f32 %v5708_v27, %v2521_v32  ;;  %5317 = vmatmul.msk.f32.vlgmr.msrb.gmra.mxu2 %vm1291_vm5, %v2375_v34  ;;  %v2388_v55 = vor.u32 1.1754944e-38, %v2387_v45 }
 0x8d7   : > { %2726 = vmatpush.msrb.mxu2 %v2706_v39  ;;  %vm2386_vm14 = vcmp.eq.f32.partialorder %v2385_v48, 8.507059e+37 }
 0x8d8   : > { %v2523_v41 = vadd.f32 %v5708_v27, %v2522_v36 }
 0x8da   : > { %v5710_v28 = vpop.eup %5709  ;;  %v2527_v44 = vsel %vm2526_vm7, %v5708_v27, %v2523_v41  ;;  %v5334_v41 = vld [vmem:[%s6060_s19 + $0xf8] sm:$0xff] }
 0x8db   : > { %v2377_v43 = vmul.f32 %v5710_v28, %v2360_v29  ;;  %v2518_v8 = vpop.xlane.xlu0 %2517  ;;  %v2532_v46 = vsel %vm2529_vm8, %v2531_v42, %v2527_v44  ;;  %vm2382_vm9 = vweird.f32 %v5710_v28  ;;  %v5333_v42 = vld [vmem:[%s6060_s19 + $0xf0] sm:$0xff]  ;;  %2812 = vmatpush.msra.mxu0 %v5334_v41 }
 0x8dc   : > { %5711 = vrcp.f32 %v2518_v8  ;;  %v2533_v3 = vmul.f32 %v6648_v30, %v2532_v46  ;;  %vm2383_vm13 = vmor %vm2381_vm12, %vm2382_vm9  ;;  %v2545_v14 = vand.u32 2147483648, %v2518_v8  ;;  %vm2539_vm6 = vweird.f32 %v2518_v8 }
 0x8dd   : > { %v2378_v21 = vsub.f32 1.0, %v2377_v43  ;;  %v2543_v19 = vand.u32 2147483647, %v2518_v8  ;;  %v5332_v43 = vld [vmem:[%s6060_s19 + $0xe8] sm:$0xff]  ;;  %2813 = vmatpush.msra.mxu0 %v5333_v42 }
 0x8de   : > { %v2671_v47 = vpop.xlane.xlu1 %2670  ;;  %5323 = vmatmul.msk.f32.vlgmr.msra.gmra.mxu2 %vm1291_vm5, %v2533_v3  ;;  %v2546_v2 = vor.u32 1.1754944e-38, %v2545_v14 }
 0x8df   : > { %v2379_v22 = vmul.f32 %v5710_v28, %v2378_v21  ;;  %5713 = vrcp.f32 %v2671_v47  ;;  %v2686_v4 = vand.u32 2147483648, %v2671_v47  ;;  %v2684_v5 = vand.u32 2147483647, %v2671_v47  ;;  %2814 = vmatpush.msra.mxu0 %v5332_v43 }
 0x8e0   : > { %vm2680_vm1 = vweird.f32 %v2671_v47  ;;  %vm2544_vm8 = vcmp.eq.f32.partialorder %v2543_v19, 8.507059e+37 }
 0x8e1   : > { %v2380_v52 = vadd.f32 %v5710_v28, %v2379_v22  ;;  %v2687_v10 = vor.u32 1.1754944e-38, %v2686_v4  ;;  %vm2685_vm3 = vcmp.eq.f32.partialorder %v2684_v5, 8.507059e+37  ;;  %v5343_v5 = vld [vmem:[%s7443_s23 + $0x30] sm:$0xff] }
 0x8e2   : > { %v5712_v53 = vpop.eup %5711 }
 0x8e3   : > { %v2384_v54 = vsel %vm2383_vm13, %v5710_v28, %v2380_v52  ;;  %v2535_v58 = vmul.f32 %v5712_v53, %v2518_v8  ;;  %vm2540_vm4 = vweird.f32 %v5712_v53  ;;  %v5331_v8 = vld [vmem:[%s6060_s19 + $0xe0] sm:$0xff] }
 0x8e4   : > { %v2389_v59 = vsel %vm2386_vm14, %v2388_v55, %v2384_v54  ;;  %vm2541_vm7 = vmor %vm2539_vm6, %vm2540_vm4  ;;  %2815 = vmatpush.msra.mxu0 %v5331_v8 }
 0x8e5   : > { %v5714_v51 = vpop.eup %5713  ;;  %v2390_v60 = vmul.f32 %v6652_v40, %v2389_v59  ;;  %v2536_v63 = vsub.f32 1.0, %v2535_v58  ;;  %v5618_v58 = vld [vmem:[%s6108_s25 + $0x7] ss:$0 sm:$0xff] }
 0x8e6   : > { %v2676_v62 = vmul.f32 %v5714_v51, %v2671_v47  ;;  %v2674_v30 = vpop.xlane.xlu0 %2673  ;;  %vm2681_vm15 = vweird.f32 %v5714_v51 }
 0x8e7   : > { %5715 = vrcp.f32 %v2674_v30  ;;  %5318 = vmatmul.msk.f32.vlgmr.msra.gmra.mxu3 %vm1291_vm5, %v2390_v60  ;;  %v2537_v6 = vmul.f32 %v5712_v53, %v2536_v63  ;;  %vm2682_vm2 = vmor %vm2680_vm1, %vm2681_vm15  ;;  %v2701_v26 = vand.u32 2147483648, %v2674_v30  ;;  %vm2695_vm12 = vweird.f32 %v2674_v30  ;;  %v2261_v34 = vpop.f32.mrf.mxu2 }
 0x8e8   : > { %v2677_v57 = vsub.f32 1.0, %v2676_v62  ;;  %v2699_v27 = vand.u32 2147483647, %v2674_v30 }
 0x8e9   : > { %v2538_v11 = vadd.f32 %v5712_v53, %v2537_v6  ;;  %v2702_v56 = vor.u32 1.1754944e-38, %v2701_v26  ;;  %v5342_v6 = vld [vmem:[%s7443_s23 + $0x28] sm:$0xff]  ;;  %v5349_v26 = vld [vmem:[%s6060_s19 + $0x110] sm:$0xff] }
 0x8ea   : > { %v2678_v18 = vmul.f32 %v5714_v51, %v2677_v57  ;;  %vm2700_vm14 = vcmp.eq.f32.partialorder %v2699_v27, 8.507059e+37  ;;  %v2879_v27 = vld [vmem:[%s6118_s26 + $0x10] sm:$0xff] }
 0x8eb   : > { %v2542_v0 = vsel %vm2541_vm7, %v5712_v53, %v2538_v11  ;;  %vm2924_vm7 = vcmask 523264  }
 0x8ec   : > { %v2679_v7 = vadd.f32 %v5714_v51, %v2678_v18  ;;  %v2547_v20 = vsel %vm2544_vm8, %v2546_v2, %v2542_v0  ;;  %v5344_v18 = vld [vmem:[%s7443_s23 + $0x38] sm:$0xff]  ;;  %v5620_v0 = vld [vmem:[%s7449_s29 + $0x1] ss:$0 sm:$0xff] }
 0x8ed   : > { %v5716_v25 = vpop.eup %5715  ;;  %v2548_v29 = vmul.f32 %v6657_v50, %v2547_v20  ;;  %v2880_v2 = vld [vmem:[%s6118_s26 + $0x18] sm:$0xff] }
 0x8ee   : > { %v2683_v38 = vsel %vm2682_vm2, %v5714_v51, %v2679_v7  ;;  %v2691_v40 = vmul.f32 %v5716_v25, %v2674_v30  ;;  %vm2696_vm9 = vweird.f32 %v5716_v25  ;;  %v5341_v7 = vld [vmem:[%s7443_s23 + $0x20] sm:$0xff]  ;;  %2901 = vmatpush.msra.mxu1 %v2880_v2 }
 0x8ef   : > { %v2688_v12 = vsel %vm2685_vm3, %v2687_v10, %v2683_v38  ;;  %vm2697_vm13 = vmor %vm2695_vm12, %vm2696_vm9 }
 0x8f0   : > { %v2692_v49 = vsub.f32 1.0, %v2691_v40  ;;  %v2689_v17 = vmul.f32 %v6663_v13, %v2688_v12  ;;  %2902 = vmatpush.msra.mxu1 %v2879_v27 }
 0x8f2   : > { %5329 = vmatmul.msk.f32.vlgmr.msrb.gmra.mxu2 %vm1291_vm5, %v2689_v17  ;;  %v2693_v1 = vmul.f32 %v5716_v25, %v2692_v49 }
 0x8f4   : > { %v2694_v23 = vadd.f32 %v5716_v25, %v2693_v1  ;;  %v5350_v1 = vld [vmem:[%s6060_s19 + $0x118] sm:$0xff] }
 0x8f5   : > { %3131 = vmatpush.msrb.mxu0 %v5350_v1 }
 0x8f6   : > { %v2698_v13 = vsel %vm2697_vm13, %v5716_v25, %v2694_v23  ;;  %v2732_v16 = vpop.permute.xlu1 %2731  ;;  %v1151_v25 = vld [vmem:[#allocation2 + $0x8] sm:$0xff] }
 0x8f7   : > { %v2703_v31 = vsel %vm2700_vm14, %v2702_v56, %v2698_v13  ;;  %3132 = vmatpush.msrb.mxu0 %v5349_v26  ;;  %v1155_v13 = vld [vmem:[%s7450_s27 + $0x8] sm:$0xff] }
 0x8f8   : > { %v2704_v32 = vmul.f32 %v6667_v61, %v2703_v31  ;;  %v5347_v31 = vld [vmem:[%s6060_s19 + $0x100] sm:$0xff]  ;;  %v5624_v26 = vld [vmem:[%s6108_s25 + $0xa] ss:$0 sm:$0xff] }
 0x8f9   : > { %v2576_v15 = vpop.permute.xlu0 %2575 }
 0x8fa   : > { %2596 = vmatpush.msrb.mxu3 %v2576_v15 }
 0x8fb   : > { %5324 = vmatmul.msk.f32.vlgmr.msrb.gmra.mxu3 %vm1291_vm5, %v2548_v29  ;;  %v5348_v29 = vld [vmem:[%s6060_s19 + $0x108] sm:$0xff] }
 0x8fc   : > { %2752 = vmatpush.msra.mxu3 %v2732_v16  ;;  %v2878_v16 = vld [vmem:[%s6118_s26 + $0x8] sm:$0xff]  ;;  %3133 = vmatpush.msrb.mxu0 %v5348_v29 }
 0x8fd   : > { %2903 = vmatpush.msra.mxu1 %v2878_v16 }
 0x8fe   : > { %3085 = vmatpush.msrb.mxu3 %v5344_v18  ;;  %3134 = vmatpush.msrb.mxu0 %v5347_v31  ;;  %v2920_v18 = vld [vmem:[%s6134_s3 + $0x30] sm:$0xff] }
 0x900   : > { %3086 = vmatpush.msrb.mxu3 %v5343_v5 }
 0x902   : > { %3087 = vmatpush.msrb.mxu3 %v5342_v6  ;;  %v2919_v6 = vld [vmem:[%s6134_s3 + $0x28] sm:$0xff] }
 0x903   : > { %5330 = vmatmul.msk.f32.vlgmr.msra.gmra.mxu3 %vm1291_vm5, %v2704_v32  ;;  %v2877_v32 = vld [vmem:[%s6118_s26] sm:$0xff] }
 0x904   : > { %3088 = vmatpush.msrb.mxu3 %v5341_v7  ;;  %2904 = vmatpush.msra.mxu1 %v2877_v32  ;;  %v5622_v32 = vld [vmem:[%s6123_s6] ss:$0 sm:$0xff] }
 0x90b   : > { %5345 = vmatmul.msk.f32.vlgmr.msrb.gmra.mxu3 %vm1162_vm0, %v1151_v25  ;;  %v2918_v25 = vld [vmem:[%s6134_s3 + $0x20] sm:$0xff] }
 0x936   : > { %v2284_v50 = vpop.f32.mrf.mxu3 }
 0x959   : > { %v2415_v35 = vpop.f32.mrf.mxu2 }
 0x95a   : > { %2759 = vrot.lane.b32.xlu0 %v2415_v35, %s5880_s0  ;;  %v5362_v35 = vld [vmem:[%s6060_s19 + $0x158] sm:$0xff] }
 0x95b   : > { %3193 = vmatpush.msra.mxu3 %v5362_v35 }
 0x961   : > { %v2572_v36 = vpop.f32.mrf.mxu2 }
 0x962   : > { %2767 = vrot.lane.b32.xlu2 %v2572_v36, %s5881_s24  ;;  %v5361_v36 = vld [vmem:[%s6060_s19 + $0x150] sm:$0xff] }
 0x963   : > { %3194 = vmatpush.msra.mxu3 %v5361_v36 }
 0x96a   : > { %v2442_v37 = vpop.f32.mrf.mxu3 }
 0x96b   : > { %2761 = vrot.lane.b32.xlu0 %v2442_v37, %s5880_s0 }
 0x975   : > { %v2728_v39 = vpop.f32.mrf.mxu2 }
 0x976   : > { %2775 = vrot.lane.b32.xlu1 %v2728_v39, %s5882_s30  ;;  %v5360_v39 = vld [vmem:[%s6060_s19 + $0x148] sm:$0xff] }
 0x977   : > { %3195 = vmatpush.msra.mxu3 %v5360_v39 }
 0x97e   : > { %v2598_v61 = vpop.f32.mrf.mxu3 }
 0x97f   : > { %2769 = vrot.lane.b32.xlu2 %v2598_v61, %s5881_s24  ;;  %v5359_v61 = vld [vmem:[%s6060_s19 + $0x140] sm:$0xff] }
 0x980   : > { %3196 = vmatpush.msra.mxu3 %v5359_v61  ;;  %v5625_v61 = vld [vmem:[%s6108_s25 + $0x9] ss:$0 sm:$0xff] }
 0x986   : > { %v2754_v28 = vpop.f32.mrf.mxu3 }
 0x987   : > { %2777 = vrot.lane.b32.xlu1 %v2754_v28, %s5882_s30 }
 0x98e   : > { %v3090_v20 = vpop.f32.mrf.mxu3 }
 0x98f   : > { %v3091_v23 = vadd.f32 %v5620_v0, %v3090_v20 }
 0x991   : > { %v3096_v15 = vmax.f32 %v3091_v23, 0.0 }
 0x993   : > { %v6742_v56 = vadd.f32 %v3096_v15, %v1155_v13 }
 0x9bc   : > { %v2768_v21 = vpop.permute.xlu2 %2767 }
 0x9cc   : > { %v2760_v44 = vpop.permute.xlu0 %2759 }
 0x9cd   : > { %v2781_v46 = vsel %vm1291_vm5, %v2261_v34, %v2760_v44 }
 0x9ce   : > { %v2783_v45 = vsel %vm1934_vm10, %v2781_v46, %v2768_v21  ;;  %v5356_v21 = vld [vmem:[%s6060_s19 + $0x138] sm:$0xff] }
 0x9cf   : > { %3163 = vmatpush.msrb.mxu1 %v5356_v21 }
 0x9d9   : > { %v2770_v52 = vpop.permute.xlu2 %2769 }
 0x9dd   : > { %v2762_v22 = vpop.permute.xlu0 %2761 }
 0x9de   : > { %v2782_v48 = vsel %vm1291_vm5, %v2284_v50, %v2762_v22 }
 0x9df   : > { %v2784_v55 = vsel %vm1934_vm10, %v2782_v48, %v2770_v52 }
 0x9e8   : > { %v2776_v47 = vpop.permute.xlu1 %2775 }
 0x9e9   : > { %v2785_v3 = vsel %vm1937_vm11, %v2783_v45, %v2776_v47  ;;  %v5355_v45 = vld [vmem:[%s6060_s19 + $0x130] sm:$0xff] }
 0x9ea   : > { %5335 = vmatmul.msk.f32.vlgmr.msra.gmra.mxu0 %vm1162_vm0, %v2785_v3  ;;  %v5354_v3 = vld [vmem:[%s6060_s19 + $0x128] sm:$0xff]  ;;  %3164 = vmatpush.msrb.mxu1 %v5355_v45 }
 0x9ec   : > { %3165 = vmatpush.msrb.mxu1 %v5354_v3 }
 0x9f9   : > { %v2778_v53 = vpop.permute.xlu1 %2777 }
 0x9fa   : > { %v2786_v54 = vsel %vm1937_vm11, %v2784_v55, %v2778_v53  ;;  %v5353_v53 = vld [vmem:[%s6060_s19 + $0x120] sm:$0xff] }
 0x9fb   : > { %5336 = vmatmul.msk.f32.gmra.mxu0 %vm1162_vm0, %v2786_v54  ;;  %3166 = vmatpush.msrb.mxu1 %v5353_v53 }
 0xa03   : > { %5351 = vmatmul.msk.f32.vlgmr.msrb.gmra.mxu0 %vm1162_vm0, %v6742_v56 }
 0xa67   : > { %v2817_v59 = vpop.f32.mrf.mxu0 }
 0xa68   : > { %v2818_v51 = vadd.f32 %v5618_v58, %v2817_v59 }
 0xa6a   : > { %v2823_v60 = vadd.f32 %v2818_v51, %v6588_v9  ;;  %v1153_v9 = vld [vmem:[#allocation2 + $0x18] sm:$0xff] }
 0xa6b   : > { %5346 = vmatmul.msk.f32.gmra.mxu3 %vm1162_vm0, %v1153_v9 }
 0xa6c   : > { %v2825_v62 = vsel %vm1162_vm0, %v2823_v60, 0.0 }
 0xa6d   : > { %2826 = vadd.xlane.f32.xlu0 %v2825_v62 }
 0xa73   : > { %5363 = vmatmul.msk.f32.vlgmr.msra.gmra.mxu3 %vm1162_vm0, %v6742_v56 }
 0xa78   : > { %v2820_v30 = vpop.f32.mrf.mxu0 }
 0xa79   : > { %v2821_v63 = vadd.f32 %v5618_v58, %v2820_v30  ;;  %v5619_v58 = vld [vmem:[%s6140_s5 + $0x1] ss:$0 sm:$0xff] }
 0xa7b   : > { %v2824_v57 = vadd.f32 %v2821_v63, %v6593_v33 }
 0xa7d   : > { %v2828_v4 = vsel %vm1162_vm0, %v2824_v57, 0.0 }
 0xa7e   : > { %2829 = vadd.xlane.f32.xlu2 %v2828_v4  ;;  %v2921_v4 = vld [vmem:[%s6134_s3 + $0x38] sm:$0xff] }
 0xa7f   : > { %2939 = vmatpush.msra.mxu2 %v2921_v4 }
 0xa81   : > { %2940 = vmatpush.msra.mxu2 %v2920_v18 }
 0xa83   : > { %2941 = vmatpush.msra.mxu2 %v2919_v6 }
 0xa85   : > { %2942 = vmatpush.msra.mxu2 %v2918_v25 }
 0xae0   : > { %v2827_v33 = vpop.xlane.xlu0 %2826 }
 0xae1   : > { %v2831_v10 = vmul.f32 %v2827_v33, %v6575_v24  ;;  %v2917_v33 = vld [vmem:[%s6134_s3 + $0x18] sm:$0xff] }
 0xae2   : > { %2943 = vmatpush.msra.mxu2 %v2917_v33 }
 0xae3   : > { %v6721_v38 = vsub.f32 %v2823_v60, %v2831_v10  ;;  %v5621_v60 = vld [vmem:[%s6146_s20 + $0x1] ss:$0 sm:$0xff] }
 0xae5   : > { %v2835_v40 = vmul.f32 %v6721_v38, %v6721_v38 }
 0xae7   : > { %v2837_v11 = vsel %vm1162_vm0, %v2835_v40, 0.0 }
 0xae8   : > { %2838 = vadd.xlane.f32.xlu1 %v2837_v11 }
 0xaee   : > { %v3093_v28 = vpop.f32.mrf.mxu3 }
 0xaef   : > { %v3094_v41 = vadd.f32 %v5620_v0, %v3093_v28  ;;  %v3136_v0 = vpop.f32.mrf.mxu0 }
 0xaf1   : > { %v2830_v12 = vpop.xlane.xlu2 %2829  ;;  %v3097_v42 = vmax.f32 %v3094_v41, 0.0 }
 0xaf2   : > { %v2832_v14 = vmul.f32 %v2830_v12, %v6575_v24 }
 0xaf3   : > { %v6755_v44 = vadd.f32 %v3097_v42, %v1155_v13 }
 0xaf4   : > { %v6727_v49 = vsub.f32 %v2824_v57, %v2832_v14  ;;  %v5623_v14 = vld [vmem:[%s6108_s25 + $0x8] ss:$0 sm:$0xff] }
 0xaf5   : > { %5352 = vmatmul.msk.f32.gmra.mxu0 %vm1162_vm0, %v6755_v44  ;;  %5364 = vmatmul.msk.f32.gmra.mxu3 %vm1162_vm0, %v6755_v44  ;;  %v3137_v1 = vadd.f32 %v5623_v14, %v3136_v0 }
 0xaf6   : > { %v2836_v17 = vmul.f32 %v6727_v49, %v6727_v49  ;;  %v3198_v20 = vpop.f32.mrf.mxu3 }
 0xaf7   : > { %v3142_v2 = vmul.f32 0.35355338, %v3137_v1  ;;  %v3199_v15 = vadd.f32 %v5624_v26, %v3198_v20 }
 0xaf8   : > { %v2840_v19 = vsel %vm1162_vm0, %v2836_v17, 0.0  ;;  %v2916_v17 = vld [vmem:[%s6134_s3 + $0x10] sm:$0xff] }
 0xaf9   : > { %2841 = vadd.xlane.f32.xlu0 %v2840_v19  ;;  %v2915_v19 = vld [vmem:[%s6134_s3 + $0x8] sm:$0xff]  ;;  %2944 = vmatpush.msra.mxu2 %v2916_v17 }
 0xafb   : > { %2945 = vmatpush.msra.mxu2 %v2915_v19 }
 0xb01   : > { %3350 = vrot.lane.b32.xlu1 %v3142_v2, %s5878_s9 }
 0xb09   : > { %3508 = vrot.lane.b32.xlu1 %v3142_v2, %s5877_s21 }
 0xb5b   : > { %v2839_v34 = vpop.xlane.xlu1 %2838 }
 0xb5c   : > { %v2843_v50 = vmul.f32 %v2839_v34, %v6575_v24 }
 0xb5e   : > { %v2845_v37 = vadd.f32 1e-05, %v2843_v50 }
 0xb60   : > { %5717 = vrsqrt.f32 %v2845_v37  ;;  %vm2853_vm1 = vweird.f32 %v2845_v37 }
 0xb66   : > { %v5718_v43 = vpop.eup %5717 }
 0xb67   : > { %v2848_v8 = vmul.f32 %v5718_v43, %v2845_v37  ;;  %vm2854_vm15 = vweird.f32 %v5718_v43 }
 0xb68   : > { %vm2855_vm2 = vmor %vm2853_vm1, %vm2854_vm15 }
 0xb69   : > { %v2849_v46 = vmul.f32 %v5718_v43, %v2848_v8 }
 0xb6b   : > { %v2850_v47 = vmul.f32 0.5, %v2849_v46 }
 0xb6c   : > { %v2842_v22 = vpop.xlane.xlu0 %2841 }
 0xb6d   : > { %v2851_v48 = vsub.f32 1.5, %v2850_v47  ;;  %v2844_v52 = vmul.f32 %v2842_v22, %v6575_v24  ;;  %v3100_v22 = vlaneseq }
 0xb6f   : > { %v2852_v55 = vmul.f32 %v5718_v43, %v2851_v48  ;;  %v2846_v54 = vadd.f32 1e-05, %v2844_v52 }
 0xb71   : > { %v2856_v59 = vsel %vm2855_vm2, %v5718_v43, %v2852_v55  ;;  %5719 = vrsqrt.f32 %v2846_v54  ;;  %vm2863_vm4 = vweird.f32 %v2846_v54  ;;  %v3101_v55 = vshrl.u32 %v3100_v22, 7 }
 0xb72   : > { %v2867_v51 = vmul.f32 %v2856_v59, %v6721_v38  ;;  %v3139_v23 = vpop.f32.mrf.mxu0 }
 0xb73   : > { %v3140_v27 = vadd.f32 %v5623_v14, %v3139_v23  ;;  %v3351_v46 = vpop.permute.xlu1 %3350 }
 0xb74   : > { %v2871_v62 = vmul.f32 %v5619_v58, %v2867_v51  ;;  %v5884_v51 = vmov -1e+30  }
 0xb75   : > { %v3143_v29 = vmul.f32 0.35355338, %v3140_v27 }
 0xb76   : > { %v6769_v30 = vadd.f32 %v5621_v60, %v2871_v62 }
 0xb77   : > { %v5720_v63 = vpop.eup %5719  ;;  %3536 = vrot.lane.b32.xlu1 %v3143_v29, %s5877_s21  ;;  %3378 = vrot.lane.b32.xlu0 %v3143_v29, %s5878_s9 }
 0xb78   : > { %v2858_v57 = vmul.f32 %v5720_v63, %v2846_v54  ;;  %5337 = vmatmul.msk.f32.vlgmr.msra.gmra.mxu1 %vm1162_vm0, %v6769_v30  ;;  %vm2864_vm3 = vweird.f32 %v5720_v63  ;;  %v3201_v13 = vpop.f32.mrf.mxu3  ;;  %v3103_v54 = vand.u32 127, %v3100_v22 }
 0xb79   : > { %vm2865_vm6 = vmor %vm2863_vm4, %vm2864_vm3  ;;  %3322 = vmatpush.msra.mxu1 %v3199_v15  ;;  %v3202_v16 = vadd.f32 %v5624_v26, %v3201_v13 }
 0xb7a   : > { %v2859_v5 = vmul.f32 %v5720_v63, %v2858_v57  ;;  %vm3104_vm8 = vcmp.ge.s32.totalorder %v3101_v55, %v3103_v54 }
 0xb7b   : > { %v6796_v31 = vpack.i.bf16 %v3202_v16, %v3199_v15  ;;  %v3509_v45 = vpop.permute.xlu1 %3508 }
 0xb7c   : > { %v2860_v7 = vmul.f32 0.5, %v2859_v5 }
 0xb7e   : > { %v2861_v9 = vsub.f32 1.5, %v2860_v7 }
 0xb7f   : > { %3692 = vrot.lane.b32.xlu1 %v3143_v29, %s5879_s13 }
 0xb80   : > { %v2862_v10 = vmul.f32 %v5720_v63, %v2861_v9 }
 0xb82   : > { %v2866_v38 = vsel %vm2865_vm6, %v5720_v63, %v2862_v10 }
 0xb83   : > { %v2868_v40 = vmul.f32 %v2866_v38, %v6727_v49  ;;  %v2914_v49 = vld [vmem:[%s6134_s3] sm:$0xff] }
 0xb84   : > { %2946 = vmatpush.msra.mxu2 %v2914_v49 }
 0xb85   : > { %v2872_v11 = vmul.f32 %v5619_v58, %v2868_v40 }
 0xb87   : > { %v6779_v12 = vadd.f32 %v5621_v60, %v2872_v11  ;;  %v3105_v60 = vsel %vm3104_vm8, 0.0, %v5884_v51 }
 0xb89   : > { %5338 = vmatmul.msk.f32.gmra.mxu1 %vm1162_vm0, %v6779_v12 }
 0xb91   : > { %5357 = vmatmul.msk.f32.vlgmr.msrb.gmra.mxu1 %vm1162_vm0, %v6742_v56 }
 0xb99   : > { %5358 = vmatmul.msk.f32.gmra.mxu1 %vm1162_vm0, %v6755_v44 }
 0xbe9   : > { %v3379_v47 = vpop.permute.xlu0 %3378  ;;  %v3537_v59 = vpop.permute.xlu1 %3536 }
 0xbf1   : > { %v3693_v25 = vpop.permute.xlu1 %3692 }
 0xbf5   : > { %v2906_v34 = vpop.f32.mrf.mxu1 }
 0xbf6   : > { %v2907_v35 = vadd.f32 %v5622_v32, %v2906_v34 }
 0xbf8   : > { %v2912_v50 = vmax.f32 %v2907_v35, 0.0 }
 0xbfa   : > { %5339 = vmatmul.msk.f32.vlgmr.msra.gmra.mxu2 %vm2924_vm7, %v2912_v50 }
 0xc06   : > { %v2909_v36 = vpop.f32.mrf.mxu1 }
 0xc07   : > { %v2910_v37 = vadd.f32 %v5622_v32, %v2909_v36 }
 0xc09   : > { %v2913_v39 = vmax.f32 %v2910_v37, 0.0 }
 0xc0b   : > { %5340 = vmatmul.msk.f32.gmra.mxu2 %vm2924_vm7, %v2913_v39 }
 0xc0e   : > { %v3168_v28 = vpop.f32.mrf.mxu1 }
 0xc0f   : > { %v3169_v41 = vadd.f32 %v5625_v61, %v3168_v28 }
 0xc11   : > { %3352 = vrot.lane.b32.xlu2 %v3169_v41, %s5878_s9  ;;  %5365 = vmatpush.xpose.msk.msrb.mxu2 %vm1291_vm5, %v3169_v41 }
 0xc14   : > { %5366 = vmatmul.msk.f32.vlgmr.msrb.gmra.mxu2 %vm1291_vm5, %v3142_v2 }
 0xc15   : > { %3345 = vmatpush.msra.mxu2 %v3202_v16 }
 0xc16   : > { %v3171_v42 = vpop.f32.mrf.mxu1 }
 0xc17   : > { %v3172_v43 = vadd.f32 %v5625_v61, %v3171_v42 }
 0xc19   : > { %3380 = vrot.lane.b32.xlu0 %v3172_v43, %s5878_s9  ;;  %5367 = vmatpush.xpose.msk.msra.mxu0 %vm1291_vm5, %v3172_v43 }
 0xc1a   : > { %3510 = vrot.lane.b32.xlu2 %v3169_v41, %s5877_s21 }
 0xc1c   : > { %5368 = vmatmul.msk.f32.vlgmr.msra.gmra.mxu0 %vm1291_vm5, %v3143_v29 }
 0xc21   : > { %3666 = vrot.lane.b32.xlu0 %v3169_v41, %s5879_s13 }
 0xc22   : > { %3538 = vrot.lane.b32.xlu2 %v3172_v43, %s5877_s21 }
 0xc29   : > { %3694 = vrot.lane.b32.xlu0 %v3172_v43, %s5879_s13 }
 0xc2a   : > { %3664 = vrot.lane.b32.xlu2 %v3142_v2, %s5879_s13 }
 0xc6b   : > { %v3353_v8 = vpop.permute.xlu2 %3352 }
 0xc6c   : > { %5371 = vmatpush.xpose.msk.msrb.mxu3 %vm1291_vm5, %v3353_v8 }
 0xc6f   : > { %5372 = vmatmul.msk.f32.vlgmr.msrb.gmra.mxu3 %vm1291_vm5, %v3351_v46 }
 0xc74   : > { %v3511_v21 = vpop.permute.xlu2 %3510 }
 0xc75   : > { %5377 = vmatpush.xpose.msk.msra.mxu3 %vm1291_vm5, %v3511_v21 }
 0xc78   : > { %5378 = vmatmul.msk.f32.vlgmr.msra.gmra.mxu3 %vm1291_vm5, %v3509_v45 }
 0xc7c   : > { %v3539_v52 = vpop.permute.xlu2 %3538 }
 0xc7d   : > { %v6818_v3 = vpop.f32.mrf.mxu2 }
 0xc84   : > { %v3665_v62 = vpop.permute.xlu2 %3664 }
 0xc8b   : > { %v3381_v48 = vpop.permute.xlu0 %3380 }
 0xc8c   : > { %5373 = vmatpush.xpose.msk.msrb.mxu0 %vm1291_vm5, %v3381_v48 }
 0xc8e   : > { %v6822_v53 = vpop.f32.mrf.mxu2 }
 0xc8f   : > { %5374 = vmatmul.msk.f32.vlgmr.msrb.gmra.mxu0 %vm1291_vm5, %v3379_v47 }
 0xc90   : > { %5379 = vmatpush.xpose.msk.msra.mxu0 %vm1291_vm5, %v3539_v52 }
 0xc93   : > { %v3667_v58 = vpop.permute.xlu0 %3666 }
 0xc94   : > { %5383 = vmatpush.xpose.msk.msrb.mxu3 %vm1291_vm5, %v3667_v58 }
 0xc97   : > { %v3227_v63 = vpop.f32.mrf.mxu2  ;;  %5380 = vmatmul.msk.f32.vlgmr.msra.gmra.mxu0 %vm1291_vm5, %v3537_v59  ;;  %5384 = vmatmul.msk.f32.vlgmr.msrb.gmra.mxu3 %vm1291_vm5, %v3665_v62 }
 0xc98   : > { %v3228_v57 = vadd.f32 %v3227_v63, %v3105_v60 }
 0xc99   : > { %v3253_v4 = vpop.f32.mrf.mxu0 }
 0xc9a   : > { %v3254_v18 = vadd.f32 %v3253_v4, %v3105_v60  ;;  %v3256_v5 = vsel %vm1291_vm5, %v3228_v57, -inf }
 0xc9b   : > { %v3695_v6 = vpop.permute.xlu0 %3694  ;;  %3257 = vmax.xlane.f32.xlu2 %v3256_v5 }
 0xc9c   : > { %5385 = vmatpush.xpose.msk.msrb.mxu0 %vm1291_vm5, %v3695_v6  ;;  %v3259_v7 = vsel %vm1291_vm5, %v3254_v18, -inf }
 0xc9d   : > { %3260 = vmax.xlane.f32.xlu0 %v3259_v7 }
 0xc9f   : > { %5386 = vmatmul.msk.f32.vlgmr.msrb.gmra.mxu0 %vm1291_vm5, %v3693_v25 }
 0xcf2   : > { %v3375_v9 = vpop.f32.mrf.mxu3 }
 0xcf3   : > { %v3376_v33 = vadd.f32 %v3375_v9, %v3105_v60 }
 0xcf5   : > { %v3406_v10 = vsel %vm1291_vm5, %v3376_v33, -inf }
 0xcf6   : > { %3407 = vmax.xlane.f32.xlu1 %v3406_v10 }
 0xcfb   : > { %v3533_v38 = vpop.f32.mrf.mxu3 }
 0xcfc   : > { %v3534_v40 = vadd.f32 %v3533_v38, %v3105_v60 }
 0xcfe   : > { %v3564_v11 = vsel %vm1291_vm5, %v3534_v40, -inf }
 0xcff   : > { %3565 = vmax.xlane.f32.xlu0 %v3564_v11 }
 0xd0c   : > { %v3403_v14 = vpop.f32.mrf.mxu0 }
 0xd0d   : > { %v3404_v17 = vadd.f32 %v3403_v14, %v3105_v60 }
 0xd0e   : > { %v3258_v19 = vpop.xlane.xlu2 %3257 }
 0xd0f   : > { %v3262_v0 = vsub.f32 %v3228_v57, %v3258_v19  ;;  %v3409_v1 = vsel %vm1291_vm5, %v3404_v17, -inf }
 0xd10   : > { %3410 = vmax.xlane.f32.xlu2 %v3409_v1  ;;  %v3261_v49 = vpop.xlane.xlu0 %3260 }
 0xd11   : > { %v3264_v2 = vmul.f32 1.442695, %v3262_v0  ;;  %v3263_v20 = vsub.f32 %v3254_v18, %v3261_v49 }
 0xd13   : > { %5721 = vpow2.f32 %v3264_v2  ;;  %v3266_v15 = vmul.f32 1.442695, %v3263_v20 }
 0xd14   : > { %v3561_v23 = vpop.f32.mrf.mxu0 }
 0xd15   : > { %v3562_v26 = vadd.f32 %v3561_v23, %v3105_v60  ;;  %5723 = vpow2.f32 %v3266_v15 }
 0xd17   : > { %v3567_v27 = vsel %vm1291_vm5, %v3562_v26, -inf }
 0xd18   : > { %3568 = vmax.xlane.f32.xlu2 %v3567_v27 }
 0xd19   : > { %v6836_v16 = vpop.eup %5721 }
 0xd1a   : > { %v3689_v29 = vpop.f32.mrf.mxu3  ;;  %v3268_v50 = vsel %vm1291_vm5, %v6836_v16, 0.0 }
 0xd1b   : > { %v3690_v13 = vadd.f32 %v3689_v29, %v3105_v60  ;;  %v6842_v37 = vpop.eup %5723 }
 0xd1c   : > { %v3717_v32 = vpop.f32.mrf.mxu0  ;;  %v3271_v39 = vsel %vm1291_vm5, %v6842_v37, 0.0 }
 0xd1d   : > { %v3718_v34 = vadd.f32 %v3717_v32, %v3105_v60  ;;  %v3720_v35 = vsel %vm1291_vm5, %v3690_v13, -inf }
 0xd1e   : > { %3721 = vmax.xlane.f32.xlu1 %v3720_v35 }
 0xd1f   : > { %v3723_v36 = vsel %vm1291_vm5, %v3718_v34, -inf }
 0xd20   : > { %3269 = vadd.xlane.f32.xlu2 %v3268_v50  ;;  %3724 = vmax.xlane.f32.xlu0 %v3723_v36 }
 0xd26   : > { %3272 = vadd.xlane.f32.xlu1 %v3271_v39 }
 0xd69   : > { %v3408_v61 = vpop.xlane.xlu1 %3407 }
 0xd6a   : > { %v3412_v28 = vsub.f32 %v3376_v33, %v3408_v61 }
 0xd6c   : > { %v3414_v41 = vmul.f32 1.442695, %v3412_v28 }
 0xd6e   : > { %5725 = vpow2.f32 %v3414_v41 }
 0xd72   : > { %v3566_v42 = vpop.xlane.xlu0 %3565 }
 0xd73   : > { %v3570_v43 = vsub.f32 %v3534_v40, %v3566_v42 }
 0xd74   : > { %v6846_v8 = vpop.eup %5725 }
 0xd75   : > { %v3572_v46 = vmul.f32 1.442695, %v3570_v43  ;;  %v3418_v21 = vsel %vm1291_vm5, %v6846_v8, 0.0 }
 0xd76   : > { %3419 = vadd.xlane.f32.xlu0 %v3418_v21 }
 0xd77   : > { %5727 = vpow2.f32 %v3572_v46 }
 0xd7d   : > { %v6850_v45 = vpop.eup %5727 }
 0xd7e   : > { %v3576_v47 = vsel %vm1291_vm5, %v6850_v45, 0.0 }
 0xd7f   : > { %3577 = vadd.xlane.f32.xlu1 %v3576_v47 }
 0xd83   : > { %v3411_v22 = vpop.xlane.xlu2 %3410 }
 0xd84   : > { %v3413_v48 = vsub.f32 %v3404_v17, %v3411_v22 }
 0xd86   : > { %v3416_v52 = vmul.f32 1.442695, %v3413_v48 }
 0xd88   : > { %5729 = vpow2.f32 %v3416_v52 }
 0xd8b   : > { %v3569_v55 = vpop.xlane.xlu2 %3568 }
 0xd8c   : > { %v3571_v54 = vsub.f32 %v3562_v26, %v3569_v55 }
 0xd8e   : > { %v6854_v58 = vpop.eup %5729  ;;  %v3574_v59 = vmul.f32 1.442695, %v3571_v54 }
 0xd8f   : > { %v3421_v51 = vsel %vm1291_vm5, %v6854_v58, 0.0 }
 0xd90   : > { %5731 = vpow2.f32 %v3574_v59  ;;  %3422 = vadd.xlane.f32.xlu2 %v3421_v51 }
 0xd91   : > { %v3722_v60 = vpop.xlane.xlu1 %3721 }
 0xd92   : > { %v3726_v62 = vsub.f32 %v3690_v13, %v3722_v60 }
 0xd93   : > { %v3270_v63 = vpop.xlane.xlu2 %3269  ;;  %v3725_v57 = vpop.xlane.xlu0 %3724 }
 0xd94   : > { %v3728_v4 = vmul.f32 1.442695, %v3726_v62  ;;  %5733 = vrcp.f32 %v3270_v63  ;;  %v3727_v18 = vsub.f32 %v3718_v34, %v3725_v57  ;;  %v3285_v11 = vand.u32 2147483648, %v3270_v63 }
 0xd95   : > { %v3283_v19 = vand.u32 2147483647, %v3270_v63  ;;  %vm3279_vm12 = vweird.f32 %v3270_v63 }
 0xd96   : > { %v6858_v5 = vpop.eup %5731  ;;  %5735 = vpow2.f32 %v3728_v4  ;;  %v3730_v6 = vmul.f32 1.442695, %v3727_v18  ;;  %v3286_v20 = vor.u32 1.1754944e-38, %v3285_v11 }
 0xd97   : > { %v3579_v7 = vsel %vm1291_vm5, %v6858_v5, 0.0  ;;  %vm3284_vm14 = vcmp.eq.f32.partialorder %v3283_v19, 8.507059e+37 }
 0xd98   : > { %3580 = vadd.xlane.f32.xlu0 %v3579_v7  ;;  %5737 = vpow2.f32 %v3730_v6 }
 0xd99   : > { %v3273_v25 = vpop.xlane.xlu1 %3272 }
 0xd9a   : > { %v5734_v9 = vpop.eup %5733  ;;  %5739 = vrcp.f32 %v3273_v25  ;;  %v3300_v15 = vand.u32 2147483648, %v3273_v25  ;;  %v3298_v13 = vand.u32 2147483647, %v3273_v25  ;;  %vm3294_vm1 = vweird.f32 %v3273_v25 }
 0xd9b   : > { %v3275_v33 = vmul.f32 %v5734_v9, %v3270_v63  ;;  %vm3280_vm9 = vweird.f32 %v5734_v9 }
 0xd9c   : > { %v6862_v10 = vpop.eup %5735  ;;  %vm3281_vm13 = vmor %vm3279_vm12, %vm3280_vm9  ;;  %v3301_v35 = vor.u32 1.1754944e-38, %v3300_v15  ;;  %vm3299_vm3 = vcmp.eq.f32.partialorder %v3298_v13, 8.507059e+37 }
 0xd9d   : > { %v3276_v38 = vsub.f32 1.0, %v3275_v33  ;;  %v3732_v40 = vsel %vm1291_vm5, %v6862_v10, 0.0 }
 0xd9e   : > { %3733 = vadd.xlane.f32.xlu2 %v3732_v40  ;;  %v6866_v14 = vpop.eup %5737 }
 0xd9f   : > { %v3277_v17 = vmul.f32 %v5734_v9, %v3276_v38  ;;  %v3735_v1 = vsel %vm1291_vm5, %v6866_v14, 0.0 }
 0xda0   : > { %v5740_v0 = vpop.eup %5739  ;;  %3736 = vadd.xlane.f32.xlu1 %v3735_v1 }
 0xda1   : > { %v3278_v49 = vadd.f32 %v5734_v9, %v3277_v17  ;;  %v3290_v2 = vmul.f32 %v5740_v0, %v3273_v25  ;;  %vm3295_vm15 = vweird.f32 %v5740_v0 }
 0xda2   : > { %vm3296_vm2 = vmor %vm3294_vm1, %vm3295_vm15 }
 0xda3   : > { %v3282_v23 = vsel %vm3281_vm13, %v5734_v9, %v3278_v49  ;;  %v3291_v26 = vsub.f32 1.0, %v3290_v2 }
 0xda4   : > { %v3287_v27 = vsel %vm3284_vm14, %v3286_v20, %v3282_v23 }
 0xda5   : > { %v3292_v29 = vmul.f32 %v5740_v0, %v3291_v26  ;;  %v3288_v32 = vmul.f32 %v6836_v16, %v3287_v27 }
 0xda7   : > { %v3293_v34 = vadd.f32 %v5740_v0, %v3292_v29  ;;  %5369 = vmatmul.msk.f32.vlgmr.msra.gmra.mxu1 %vm1291_vm5, %v3288_v32 }
 0xda9   : > { %v3297_v50 = vsel %vm3296_vm2, %v5740_v0, %v3293_v34 }
 0xdaa   : > { %v3302_v36 = vsel %vm3299_vm3, %v3301_v35, %v3297_v50 }
 0xdab   : > { %v3303_v39 = vmul.f32 %v6842_v37, %v3302_v36 }
 0xdac   : > { %5579 = vrot.lane.b32.xlu0 %v6796_v31, %s5878_s9 }
 0xdad   : > { %5370 = vmatmul.msk.f32.vlgmr.msra.gmra.mxu2 %vm1291_vm5, %v3303_v39 }
 0xdb6   : > { %5584 = vrot.lane.b32.xlu2 %v6796_v31, %s5877_s21 }
 0xdb9   : > { %5589 = vrot.lane.b32.xlu1 %v6796_v31, %s5879_s13 }
 0xde9   : > { %v3420_v16 = vpop.xlane.xlu0 %3419 }
 0xdea   : > { %5741 = vrcp.f32 %v3420_v16  ;;  %vm3429_vm8 = vweird.f32 %v3420_v16  ;;  %v3433_v4 = vand.u32 2147483647, %v3420_v16  ;;  %v3435_v18 = vand.u32 2147483648, %v3420_v16 }
 0xdec   : > { %vm3434_vm14 = vcmp.eq.f32.partialorder %v3433_v4, 8.507059e+37  ;;  %v3436_v1 = vor.u32 1.1754944e-38, %v3435_v18 }
 0xdf0   : > { %v5742_v41 = vpop.eup %5741 }
 0xdf1   : > { %v3425_v42 = vmul.f32 %v5742_v41, %v3420_v16  ;;  %vm3430_vm4 = vweird.f32 %v5742_v41 }
 0xdf2   : > { %v6880_v28 = vpop.xlane.xlu1 %3577  ;;  %vm6902_vm9 = vmor %vm3429_vm8, %vm3430_vm4 }
 0xdf3   : > { %v3426_v47 = vsub.f32 1.0, %v3425_v42  ;;  %vm3587_vm15 = vweird.f32 %v6880_v28  ;;  %v3593_v2 = vand.u32 2147483648, %v6880_v28  ;;  %v3591_v35 = vand.u32 2147483647, %v6880_v28 }
 0xdf5   : > { %v3427_v55 = vmul.f32 %v5742_v41, %v3426_v47 }
 0xdf7   : > { %v3428_v62 = vadd.f32 %v5742_v41, %v3427_v55 }
 0xdf9   : > { %v3432_v40 = vsel %vm6902_vm9, %v5742_v41, %v3428_v62  ;;  %vm3592_vm9 = vcmp.eq.f32.partialorder %v3591_v35, 8.507059e+37  ;;  %v5389_v35 = vld [vmem:[%s6060_s19 + $0x160] sm:$0xff] }
 0xdfa   : > { %v3437_v23 = vsel %vm3434_vm14, %v3436_v1, %v3432_v40 }
 0xdfb   : > { %v3438_v41 = vmul.f32 %v6846_v8, %v3437_v23 }
 0xe03   : > { %v3423_v61 = vpop.xlane.xlu2 %3422 }
 0xe04   : > { %5743 = vrcp.f32 %v3423_v61  ;;  %v3450_v6 = vand.u32 2147483648, %v3423_v61  ;;  %vm3444_vm12 = vweird.f32 %v3423_v61  ;;  %v3448_v9 = vand.u32 2147483647, %v3423_v61 }
 0xe05   : > { %5745 = vrcp.f32 %v6880_v28 }
 0xe06   : > { %v3451_v49 = vor.u32 1.1754944e-38, %v3450_v6  ;;  %vm3449_vm1 = vcmp.eq.f32.partialorder %v3448_v9, 8.507059e+37 }
 0xe0a   : > { %v5744_v37 = vpop.eup %5743 }
 0xe0b   : > { %v3440_v43 = vmul.f32 %v5744_v37, %v3423_v61  ;;  %v6883_v46 = vpop.xlane.xlu0 %3580  ;;  %v6886_v21 = vpop.eup %5745  ;;  %vm3445_vm6 = vweird.f32 %v5744_v37 }
 0xe0c   : > { %5747 = vrcp.f32 %v6883_v46  ;;  %v3583_v22 = vmul.f32 %v6886_v21, %v6880_v28  ;;  %vm6907_vm13 = vmor %vm3444_vm12, %vm3445_vm6  ;;  %vm3588_vm2 = vweird.f32 %v6886_v21  ;;  %v3608_v50 = vand.u32 2147483648, %v6883_v46 }
 0xe0d   : > { %v3441_v31 = vsub.f32 1.0, %v3440_v43  ;;  %vm6932_vm4 = vmor %vm3587_vm15, %vm3588_vm2  ;;  %vm3602_vm6 = vweird.f32 %v6883_v46  ;;  %v3606_v61 = vand.u32 2147483647, %v6883_v46 }
 0xe0e   : > { %v3584_v60 = vsub.f32 1.0, %v3583_v22 }
 0xe0f   : > { %v3442_v54 = vmul.f32 %v5744_v37, %v3441_v31  ;;  %v3594_v31 = vor.u32 1.1754944e-38, %v3593_v2  ;;  %vm3607_vm12 = vcmp.eq.f32.partialorder %v3606_v61, 8.507059e+37  ;;  %v5626_v2 = vld [vmem:[%s6129_s1] ss:$0 sm:$0xff] }
 0xe10   : > { %v3585_v33 = vmul.f32 %v6886_v21, %v3584_v60 }
 0xe11   : > { %v6890_v48 = vpop.xlane.xlu2 %3733  ;;  %v3443_v63 = vadd.f32 %v5744_v37, %v3442_v54 }
 0xe12   : > { %v6892_v52 = vpop.eup %5747  ;;  %5749 = vrcp.f32 %v6890_v48  ;;  %v3586_v26 = vadd.f32 %v6886_v21, %v3585_v33  ;;  %vm3743_vm15 = vweird.f32 %v6890_v48 }
 0xe13   : > { %v3598_v59 = vmul.f32 %v6892_v52, %v6883_v46  ;;  %v6897_v51 = vpop.xlane.xlu1 %3736  ;;  %v3447_v11 = vsel %vm6907_vm13, %v5744_v37, %v3443_v63  ;;  %vm3603_vm3 = vweird.f32 %v6892_v52 }
 0xe14   : > { %5751 = vrcp.f32 %v6897_v51  ;;  %v3452_v27 = vsel %vm3449_vm1, %v3451_v49, %v3447_v11  ;;  %v3590_v42 = vsel %vm6932_vm4, %v6886_v21, %v3586_v26  ;;  %vm6945_vm8 = vmor %vm3602_vm6, %vm3603_vm3  ;;  %v3609_v21 = vor.u32 1.1754944e-38, %v3608_v50 }
 0xe15   : > { %v3599_v57 = vsub.f32 1.0, %v3598_v59  ;;  %v3453_v37 = vmul.f32 %v6854_v58, %v3452_v27  ;;  %v3595_v22 = vsel %vm3592_vm9, %v3594_v31, %v3590_v42  ;;  %v3749_v59 = vand.u32 2147483648, %v6890_v48 }
 0xe16   : > { %v3764_v60 = vand.u32 2147483648, %v6897_v51  ;;  %v3596_v62 = vmul.f32 %v6850_v45, %v3595_v22  ;;  %vm3758_vm2 = vweird.f32 %v6897_v51  ;;  %v3762_v4 = vand.u32 2147483647, %v6897_v51 }
 0xe17   : > { %v3600_v17 = vmul.f32 %v6892_v52, %v3599_v57  ;;  %v3747_v57 = vand.u32 2147483647, %v6890_v48  ;;  %v3750_v45 = vor.u32 1.1754944e-38, %v3749_v59  ;;  %v2952_v27 = vadd.f32 %v5626_v2, %v6822_v53 }
 0xe18   : > { %v6900_v7 = vpop.eup %5749  ;;  %v3765_v9 = vor.u32 1.1754944e-38, %v3764_v60  ;;  %vm3763_vm6 = vcmp.eq.f32.partialorder %v3762_v4, 8.507059e+37 }
 0xe19   : > { %v3739_v19 = vmul.f32 %v6900_v7, %v6890_v48  ;;  %v3601_v15 = vadd.f32 %v6892_v52, %v3600_v17  ;;  %v5585_v32 = vpop.permute.xlu2 %5584  ;;  %vm3744_vm13 = vweird.f32 %v6900_v7  ;;  %vm3748_vm4 = vcmp.eq.f32.partialorder %v3747_v57, 8.507059e+37 }
 0xe1a   : > { %v6918_v0 = vpop.eup %5751  ;;  %v5587_v43 = vunpack.i.h.bf16 %v5585_v32  ;;  %v5586_v47 = vunpack.i.l.bf16 %v5585_v32  ;;  %vm6964_vm1 = vmor %vm3743_vm15, %vm3744_vm13  ;;  %v5391_v32 = vld [vmem:[%s6060_s19 + $0x170] sm:$0xff] }
 0xe1b   : > { %v3754_v20 = vmul.f32 %v6918_v0, %v6897_v51  ;;  %v3740_v29 = vsub.f32 1.0, %v3739_v19  ;;  %v3605_v8 = vsel %vm6945_vm8, %v6892_v52, %v3601_v15  ;;  %vm3759_vm14 = vweird.f32 %v6918_v0 }
 0xe1c   : > { %v3610_v55 = vsel %vm3607_vm12, %v3609_v21, %v3605_v8  ;;  %vm3760_vm3 = vmor %vm3758_vm2, %vm3759_vm14  ;;  %v2955_v15 = vadd.f32 %v2952_v27, %v6779_v12 }
 0xe1d   : > { %v3755_v13 = vsub.f32 1.0, %v3754_v20  ;;  %v3741_v58 = vmul.f32 %v6900_v7, %v3740_v29  ;;  %v3611_v18 = vmul.f32 %v6858_v5, %v3610_v55  ;;  %v2949_v20 = vadd.f32 %v5626_v2, %v6818_v3 }
 0xe1e   : > { %v5580_v34 = vpop.permute.xlu0 %5579  ;;  %v2959_v29 = vsel %vm1162_vm0, %v2955_v15, 0.0 }
 0xe1f   : > { %v5582_v36 = vunpack.i.h.bf16 %v5580_v34  ;;  %v5581_v39 = vunpack.i.l.bf16 %v5580_v34  ;;  %v3756_v46 = vmul.f32 %v6918_v0, %v3755_v13  ;;  %v3742_v54 = vadd.f32 %v6900_v7, %v3741_v58  ;;  %v5392_v13 = vld [vmem:[%s6060_s19 + $0x178] sm:$0xff]  ;;  %v5390_v34 = vld [vmem:[%s6060_s19 + $0x168] sm:$0xff] }
 0xe20   : > { %v2954_v23 = vadd.f32 %v2949_v20, %v6769_v30  ;;  %3875 = vmatpush.msra.mxu3 %v5392_v13 }
 0xe21   : > { %3476 = vmatpush.msrb.mxu1 %v5581_v39  ;;  %3503 = vmatpush.msrb.mxu2 %v5582_v36  ;;  %v3757_v52 = vadd.f32 %v6918_v0, %v3756_v46  ;;  %v3746_v6 = vsel %vm6964_vm1, %v6900_v7, %v3742_v54  ;;  %v5627_v54 = vld [vmem:[%s6108_s25 + $0xb] ss:$0 sm:$0xff] }
 0xe22   : > { %5375 = vmatmul.msk.f32.vlgmr.msrb.gmra.mxu1 %vm1291_vm5, %v3438_v41  ;;  %5376 = vmatmul.msk.f32.vlgmr.msrb.gmra.mxu2 %vm1291_vm5, %v3453_v37  ;;  %v3751_v33 = vsel %vm3748_vm4, %v3750_v45, %v3746_v6  ;;  %v2956_v26 = vsel %vm1162_vm0, %v2954_v23, 0.0 }
 0xe23   : > { %3633 = vmatpush.msra.mxu1 %v5586_v47  ;;  %3659 = vmatpush.msra.mxu2 %v5587_v43  ;;  %v3761_v25 = vsel %vm3760_vm3, %v6918_v0, %v3757_v52  ;;  %v3752_v40 = vmul.f32 %v6862_v10, %v3751_v33 }
 0xe24   : > { %v3766_v51 = vsel %vm3763_vm6, %v3765_v9, %v3761_v25  ;;  %v3324_v11 = vpop.f32.mrf.mxu1  ;;  %3876 = vmatpush.msra.mxu3 %v5391_v32 }
 0xe25   : > { %v3767_v7 = vmul.f32 %v6866_v14, %v3766_v51 }
 0xe26   : > { %3877 = vmatpush.msra.mxu3 %v5390_v34 }
 0xe28   : > { %3878 = vmatpush.msra.mxu3 %v5389_v35 }
 0xe2a   : > { %5381 = vmatmul.msk.f32.vlgmr.msra.gmra.mxu1 %vm1291_vm5, %v3596_v62  ;;  %5382 = vmatmul.msk.f32.vlgmr.msra.gmra.mxu2 %vm1291_vm5, %v3611_v18 }
 0xe2b   : > { %v5590_v48 = vpop.permute.xlu1 %5589 }
 0xe2c   : > { %v5592_v38 = vunpack.i.h.bf16 %v5590_v48  ;;  %v5591_v5 = vunpack.i.l.bf16 %v5590_v48 }
 0xe2e   : > { %3789 = vmatpush.msrb.mxu1 %v5591_v5  ;;  %3815 = vmatpush.msrb.mxu2 %v5592_v38 }
 0xe30   : > { %v3347_v17 = vpop.f32.mrf.mxu2 }
 0xe32   : > { %5387 = vmatmul.msk.f32.vlgmr.msrb.gmra.mxu1 %vm1291_vm5, %v3752_v40  ;;  %5388 = vmatmul.msk.f32.vlgmr.msrb.gmra.mxu2 %vm1291_vm5, %v3767_v7  ;;  %v5628_v40 = vld [vmem:[%s6140_s5 + $0x2] ss:$0 sm:$0xff] }
 0xe9f   : > { %v3478_v19 = vpop.f32.mrf.mxu1 }
 0xea0   : > { %3822 = vrot.lane.b32.xlu0 %v3478_v19, %s5880_s0  ;;  %v5629_v19 = vld [vmem:[%s6146_s20 + $0x2] ss:$0 sm:$0xff] }
 0xea5   : > { %v3505_v0 = vpop.f32.mrf.mxu2 }
 0xea6   : > { %3824 = vrot.lane.b32.xlu1 %v3505_v0, %s5880_s0 }
 0xea7   : > { %v3635_v1 = vpop.f32.mrf.mxu1 }
 0xea8   : > { %3830 = vrot.lane.b32.xlu2 %v3635_v1, %s5881_s24 }
 0xead   : > { %v3661_v10 = vpop.f32.mrf.mxu2 }
 0xeaf   : > { %v3791_v14 = vpop.f32.mrf.mxu1 }
 0xeb0   : > { %3832 = vrot.lane.b32.xlu2 %v3661_v10, %s5881_s24  ;;  %3838 = vrot.lane.b32.xlu0 %v3791_v14, %s5882_s30 }
 0xeb5   : > { %v3817_v49 = vpop.f32.mrf.mxu2 }
 0xeb8   : > { %3840 = vrot.lane.b32.xlu0 %v3817_v49, %s5882_s30 }
 0xed0   : > { %2957 = vadd.xlane.f32.xlu1 %v2956_v26 }
 0xed9   : > { %2960 = vadd.xlane.f32.xlu2 %v2959_v29 }
 0xf02   : > { %v3831_v30 = vpop.permute.xlu2 %3830 }
 0xf0a   : > { %v3833_v61 = vpop.permute.xlu2 %3832 }
 0xf12   : > { %v3823_v3 = vpop.permute.xlu0 %3822 }
 0xf13   : > { %v3844_v50 = vsel %vm1291_vm5, %v3324_v11, %v3823_v3 }
 0xf14   : > { %v3846_v53 = vsel %vm1934_vm10, %v3844_v50, %v3831_v30 }
 0xf18   : > { %v3825_v39 = vpop.permute.xlu1 %3824 }
 0xf19   : > { %v3845_v16 = vsel %vm1291_vm5, %v3347_v17, %v3825_v39 }
 0xf1a   : > { %v3847_v37 = vsel %vm1934_vm10, %v3845_v16, %v3833_v61 }
 0xf22   : > { %v3839_v36 = vpop.permute.xlu0 %3838 }
 0xf23   : > { %v3848_v12 = vsel %vm1937_vm11, %v3846_v53, %v3839_v36 }
 0xf24   : > { %5393 = vmatmul.msk.f32.vlgmr.msra.gmra.mxu3 %vm1162_vm0, %v3848_v12 }
 0xf2a   : > { %v3841_v41 = vpop.permute.xlu0 %3840 }
 0xf2b   : > { %v3849_v42 = vsel %vm1937_vm11, %v3847_v37, %v3841_v41 }
 0xf2c   : > { %5394 = vmatmul.msk.f32.gmra.mxu3 %vm1162_vm0, %v3849_v42 }
 0xf43   : > { %v2958_v28 = vpop.xlane.xlu1 %2957 }
 0xf44   : > { %v2962_v43 = vmul.f32 %v2958_v28, %v6575_v24 }
 0xf46   : > { %v2964_v47 = vsub.f32 %v2954_v23, %v2962_v43 }
 0xf48   : > { %v2966_v31 = vmul.f32 %v2964_v47, %v2964_v47 }
 0xf4a   : > { %v2968_v8 = vsel %vm1162_vm0, %v2966_v31, 0.0 }
 0xf4b   : > { %2969 = vadd.xlane.f32.xlu0 %v2968_v8 }
 0xf4c   : > { %v2961_v58 = vpop.xlane.xlu2 %2960 }
 0xf4d   : > { %v2963_v46 = vmul.f32 %v2961_v58, %v6575_v24 }
 0xf4f   : > { %v2965_v21 = vsub.f32 %v2955_v15, %v2963_v46  ;;  %v5398_v46 = vld [vmem:[%s6060_s19 + $0x198] sm:$0xff] }
 0xf50   : > { %3965 = vmatpush.msra.mxu0 %v5398_v46 }
 0xf51   : > { %v2967_v22 = vmul.f32 %v2965_v21, %v2965_v21 }
 0xf53   : > { %v2971_v55 = vsel %vm1162_vm0, %v2967_v22, 0.0  ;;  %v5396_v22 = vld [vmem:[%s6060_s19 + $0x188] sm:$0xff] }
 0xf54   : > { %2972 = vadd.xlane.f32.xlu1 %v2971_v55  ;;  %v5395_v55 = vld [vmem:[%s6060_s19 + $0x180] sm:$0xff] }
 0xfa7   : > { %v3880_v52 = vpop.f32.mrf.mxu3 }
 0xfa8   : > { %v3881_v59 = vadd.f32 %v5627_v54, %v3880_v52 }
 0xfaa   : > { %v3886_v60 = vadd.f32 %v3881_v59, %v6742_v56 }
 0xfac   : > { %v3888_v62 = vsel %vm1162_vm0, %v3886_v60, 0.0 }
 0xfad   : > { %3889 = vadd.xlane.f32.xlu0 %v3888_v62 }
 0xfaf   : > { %v3883_v10 = vpop.f32.mrf.mxu3 }
 0xfb0   : > { %v3884_v2 = vadd.f32 %v5627_v54, %v3883_v10 }
 0xfb2   : > { %v3887_v15 = vadd.f32 %v3884_v2, %v6755_v44 }
 0xfb4   : > { %v3891_v32 = vsel %vm1162_vm0, %v3887_v15, 0.0 }
 0xfbe   : > { %v2970_v63 = vpop.xlane.xlu0 %2969 }
 0xfbf   : > { %v2974_v57 = vmul.f32 %v2970_v63, %v6575_v24 }
 0xfc1   : > { %v2976_v4 = vadd.f32 1e-05, %v2974_v57 }
 0xfc3   : > { %5753 = vrsqrt.f32 %v2976_v4  ;;  %vm2984_vm9 = vweird.f32 %v2976_v4 }
 0xfc7   : > { %v2973_v18 = vpop.xlane.xlu1 %2972 }
 0xfc8   : > { %v2975_v6 = vmul.f32 %v2973_v18, %v6575_v24 }
 0xfc9   : > { %v5754_v25 = vpop.eup %5753 }
 0xfca   : > { %v2979_v45 = vmul.f32 %v5754_v25, %v2976_v4  ;;  %v2977_v9 = vadd.f32 1e-05, %v2975_v6  ;;  %vm2985_vm8 = vweird.f32 %v5754_v25  ;;  %v7048_v6 = vld [vmem:[%s6140_s5 + $0x4] ss:$0 sm:$0xff] }
 0xfcb   : > { %vm2986_vm12 = vmor %vm2984_vm9, %vm2985_vm8 }
 0xfcc   : > { %v2980_v48 = vmul.f32 %v5754_v25, %v2979_v45  ;;  %5755 = vrsqrt.f32 %v2977_v9  ;;  %vm2994_vm14 = vweird.f32 %v2977_v9 }
 0xfce   : > { %v2981_v33 = vmul.f32 0.5, %v2980_v48 }
 0xfd0   : > { %v2982_v56 = vsub.f32 1.5, %v2981_v33 }
 0xfd2   : > { %v5756_v51 = vpop.eup %5755  ;;  %v2983_v38 = vmul.f32 %v5754_v25, %v2982_v56  ;;  %v5404_v56 = vld [vmem:[%s6060_s19 + $0x1b8] sm:$0xff] }
 0xfd3   : > { %v2989_v5 = vmul.f32 %v5756_v51, %v2977_v9  ;;  %vm2995_vm13 = vweird.f32 %v5756_v51  ;;  %v7051_v9 = vld [vmem:[%s6146_s20 + $0x4] ss:$0 sm:$0xff]  ;;  %4003 = vmatpush.msra.mxu1 %v5404_v56 }
 0xfd4   : > { %v2987_v7 = vsel %vm2986_vm12, %v5754_v25, %v2983_v38  ;;  %vm2996_vm15 = vmor %vm2994_vm14, %vm2995_vm13  ;;  %v5403_v38 = vld [vmem:[%s6060_s19 + $0x1b0] sm:$0xff] }
 0xfd5   : > { %v2990_v11 = vmul.f32 %v5756_v51, %v2989_v5  ;;  %v2998_v17 = vmul.f32 %v2987_v7, %v2964_v47  ;;  %v5409_v5 = vld [vmem:[%s6060_s19 + $0x1d0] sm:$0xff]  ;;  %4004 = vmatpush.msra.mxu1 %v5403_v38  ;;  %v5408_v7 = vld [vmem:[%s6060_s19 + $0x1c8] sm:$0xff] }
 0xfd7   : > { %v2991_v0 = vmul.f32 0.5, %v2990_v11  ;;  %v3002_v1 = vmul.f32 %v5628_v40, %v2998_v17  ;;  %v5401_v11 = vld [vmem:[%s6060_s19 + $0x1a0] sm:$0xff] }
 0xfd8   : > { %v5407_v17 = vld [vmem:[%s6060_s19 + $0x1c0] sm:$0xff] }
 0xfd9   : > { %v2992_v14 = vsub.f32 1.5, %v2991_v0  ;;  %v3006_v49 = vadd.f32 %v5629_v19, %v3002_v1 }
 0xfdb   : > { %v2993_v20 = vmul.f32 %v5756_v51, %v2992_v14  ;;  %v3008_v23 = vsel %vm1162_vm0, %v3006_v49, 0.0 }
 0xfdc   : > { %3009 = vadd.xlane.f32.xlu2 %v3008_v23 }
 0xfdd   : > { %v2997_v26 = vsel %vm2996_vm15, %v5756_v51, %v2993_v20  ;;  %v5410_v51 = vld [vmem:[%s6060_s19 + $0x1d8] sm:$0xff] }
 0xfde   : > { %v2999_v27 = vmul.f32 %v2997_v26, %v2965_v21  ;;  %v5397_v21 = vld [vmem:[%s6060_s19 + $0x190] sm:$0xff]  ;;  %4033 = vmatpush.msra.mxu2 %v5410_v51 }
 0xfdf   : > { %3966 = vmatpush.msra.mxu0 %v5397_v21 }
 0xfe0   : > { %v3003_v29 = vmul.f32 %v5628_v40, %v2999_v27  ;;  %4034 = vmatpush.msra.mxu2 %v5409_v5  ;;  %v5402_v40 = vld [vmem:[%s6060_s19 + $0x1a8] sm:$0xff] }
 0xfe1   : > { %3967 = vmatpush.msra.mxu0 %v5396_v22  ;;  %4005 = vmatpush.msra.mxu1 %v5402_v40 }
 0xfe2   : > { %v3007_v13 = vadd.f32 %v5629_v19, %v3003_v29  ;;  %4035 = vmatpush.msra.mxu2 %v5408_v7 }
 0xfe3   : > { %3968 = vmatpush.msra.mxu0 %v5395_v55  ;;  %4006 = vmatpush.msra.mxu1 %v5401_v11 }
 0xfe4   : > { %3892 = vadd.xlane.f32.xlu2 %v3891_v32  ;;  %v3011_v34 = vsel %vm1162_vm0, %v3007_v13, 0.0  ;;  %4036 = vmatpush.msra.mxu2 %v5407_v17 }
 0xfe5   : > { %3012 = vadd.xlane.f32.xlu1 %v3011_v34 }
0x1020   : > { %v3890_v35 = vpop.xlane.xlu0 %3889 }
0x1021   : > { %v3894_v3 = vmul.f32 %v3890_v35, %v6575_v24 }
0x1023   : > { %v3896_v30 = vsub.f32 %v3886_v60, %v3894_v3 }
0x1025   : > { %v3898_v50 = vmul.f32 %v3896_v30, %v3896_v30 }
0x1027   : > { %v3900_v53 = vsel %vm1162_vm0, %v3898_v50, 0.0 }
0x1028   : > { %3901 = vadd.xlane.f32.xlu1 %v3900_v53 }
0x104f   : > { %v3010_v36 = vpop.xlane.xlu2 %3009 }
0x1050   : > { %v3014_v12 = vmul.f32 %v3010_v36, %v6575_v24 }
0x1052   : > { %v7025_v44 = vsub.f32 %v3006_v49, %v3014_v12 }
0x1054   : > { %v3018_v39 = vmul.f32 %v7025_v44, %v7025_v44 }
0x1056   : > { %v3020_v16 = vsel %vm1162_vm0, %v3018_v39, 0.0 }
0x1057   : > { %3021 = vadd.xlane.f32.xlu0 %v3020_v16  ;;  %v3893_v61 = vpop.xlane.xlu2 %3892  ;;  %v5633_v16 = vld [vmem:[%s6146_s20 + $0x3] ss:$0 sm:$0xff] }
0x1058   : > { %v3895_v41 = vmul.f32 %v3893_v61, %v6575_v24  ;;  %v3013_v37 = vpop.xlane.xlu1 %3012 }
0x1059   : > { %v3015_v42 = vmul.f32 %v3013_v37, %v6575_v24 }
0x105a   : > { %v7032_v28 = vsub.f32 %v3887_v15, %v3895_v41 }
0x105b   : > { %v7034_v43 = vsub.f32 %v3007_v13, %v3015_v42 }
0x105c   : > { %v3899_v47 = vmul.f32 %v7032_v28, %v7032_v28 }
0x105d   : > { %v3019_v31 = vmul.f32 %v7034_v43, %v7034_v43 }
0x105e   : > { %v3903_v8 = vsel %vm1162_vm0, %v3899_v47, 0.0 }
0x105f   : > { %3904 = vadd.xlane.f32.xlu0 %v3903_v8  ;;  %v3023_v58 = vsel %vm1162_vm0, %v3019_v31, 0.0 }
0x1060   : > { %3024 = vadd.xlane.f32.xlu2 %v3023_v58 }
0x109b   : > { %v3902_v54 = vpop.xlane.xlu1 %3901 }
0x109c   : > { %v3906_v52 = vmul.f32 %v3902_v54, %v6575_v24 }
0x109e   : > { %v3908_v59 = vadd.f32 1e-05, %v3906_v52 }
0x10a0   : > { %5757 = vrsqrt.f32 %v3908_v59  ;;  %vm3916_vm2 = vweird.f32 %v3908_v59 }
0x10a6   : > { %v5758_v60 = vpop.eup %5757 }
0x10a7   : > { %v3911_v62 = vmul.f32 %v5758_v60, %v3908_v59  ;;  %vm3917_vm1 = vweird.f32 %v5758_v60 }
0x10a8   : > { %vm3918_vm3 = vmor %vm3916_vm2, %vm3917_vm1 }
0x10a9   : > { %v3912_v63 = vmul.f32 %v5758_v60, %v3911_v62 }
0x10ab   : > { %v3913_v57 = vmul.f32 0.5, %v3912_v63 }
0x10ad   : > { %v3914_v4 = vsub.f32 1.5, %v3913_v57 }
0x10af   : > { %v3915_v18 = vmul.f32 %v5758_v60, %v3914_v4 }
0x10b1   : > { %v3919_v25 = vsel %vm3918_vm3, %v5758_v60, %v3915_v18  ;;  %v5634_v60 = vld [vmem:[%s6108_s25 + $0xc] ss:$0 sm:$0xff]  ;;  %v5636_v18 = vld [vmem:[%s6108_s25 + $0xe] ss:$0 sm:$0xff] }
0x10b2   : > { %v3930_v45 = vmul.f32 %v3919_v25, %v3896_v30  ;;  %v5632_v30 = vld [vmem:[%s6140_s5 + $0x3] ss:$0 sm:$0xff] }
0x10b4   : > { %v3934_v48 = vmul.f32 %v7048_v6, %v3930_v45 }
0x10b6   : > { %v7055_v33 = vadd.f32 %v7051_v9, %v3934_v48 }
0x10b8   : > { %5399 = vmatmul.msk.f32.vlgmr.msra.gmra.mxu0 %vm1162_vm0, %v7055_v33 }
0x10ca   : > { %v3022_v19 = vpop.xlane.xlu0 %3021 }
0x10cb   : > { %v3026_v0 = vmul.f32 %v3022_v19, %v6575_v24 }
0x10cd   : > { %v3028_v1 = vadd.f32 1e-05, %v3026_v0 }
0x10cf   : > { %5759 = vrsqrt.f32 %v3028_v1  ;;  %vm3036_vm6 = vweird.f32 %v3028_v1 }
0x10d2   : > { %v3905_v10 = vpop.xlane.xlu0 %3904 }
0x10d3   : > { %v3907_v14 = vmul.f32 %v3905_v10, %v6575_v24  ;;  %v3025_v49 = vpop.xlane.xlu2 %3024 }
0x10d4   : > { %v3027_v2 = vmul.f32 %v3025_v49, %v6575_v24 }
0x10d5   : > { %v5760_v20 = vpop.eup %5759  ;;  %v3909_v23 = vadd.f32 1e-05, %v3907_v14 }
0x10d6   : > { %v3031_v26 = vmul.f32 %v5760_v20, %v3028_v1  ;;  %v3029_v27 = vadd.f32 1e-05, %v3027_v2  ;;  %vm3037_vm4 = vweird.f32 %v5760_v20 }
0x10d7   : > { %5761 = vrsqrt.f32 %v3909_v23  ;;  %vm3038_vm8 = vmor %vm3036_vm6, %vm3037_vm4  ;;  %vm3926_vm13 = vweird.f32 %v3909_v23 }
0x10d8   : > { %v3032_v15 = vmul.f32 %v5760_v20, %v3031_v26  ;;  %5763 = vrsqrt.f32 %v3029_v27  ;;  %vm3046_vm15 = vweird.f32 %v3029_v27 }
0x10da   : > { %v3033_v29 = vmul.f32 0.5, %v3032_v15 }
0x10dc   : > { %v3034_v13 = vsub.f32 1.5, %v3033_v29 }
0x10dd   : > { %v5762_v32 = vpop.eup %5761 }
0x10de   : > { %v5764_v34 = vpop.eup %5763  ;;  %v3035_v35 = vmul.f32 %v5760_v20, %v3034_v13  ;;  %v3921_v3 = vmul.f32 %v5762_v32, %v3909_v23  ;;  %vm3927_vm9 = vweird.f32 %v5762_v32 }
0x10df   : > { %v3041_v50 = vmul.f32 %v5764_v34, %v3029_v27  ;;  %vm3047_vm12 = vweird.f32 %v5764_v34  ;;  %vm3928_vm14 = vmor %vm3926_vm13, %vm3927_vm9 }
0x10e0   : > { %v3039_v53 = vsel %vm3038_vm8, %v5760_v20, %v3035_v35  ;;  %v3922_v36 = vmul.f32 %v5762_v32, %v3921_v3  ;;  %vm3048_vm1 = vmor %vm3046_vm15, %vm3047_vm12 }
0x10e1   : > { %v3050_v12 = vmul.f32 %v3039_v53, %v7025_v44  ;;  %v3042_v39 = vmul.f32 %v5764_v34, %v3041_v50 }
0x10e2   : > { %v3923_v61 = vmul.f32 0.5, %v3922_v36 }
0x10e3   : > { %v3054_v41 = vmul.f32 %v5632_v30, %v3050_v12  ;;  %v3043_v37 = vmul.f32 0.5, %v3042_v39 }
0x10e4   : > { %v3924_v42 = vsub.f32 1.5, %v3923_v61 }
0x10e5   : > { %v3044_v47 = vsub.f32 1.5, %v3043_v37  ;;  %v3058_v31 = vadd.f32 %v5633_v16, %v3054_v41 }
0x10e6   : > { %v3925_v8 = vmul.f32 %v5762_v32, %v3924_v42 }
0x10e7   : > { %v3045_v58 = vmul.f32 %v5764_v34, %v3044_v47  ;;  %5405 = vmatmul.msk.f32.vlgmr.msra.gmra.mxu1 %vm1162_vm0, %v3058_v31  ;;  %5411 = vmatmul.msk.f32.vlgmr.msra.gmra.mxu2 %vm1162_vm0, %v3058_v31 }
0x10e8   : > { %v3929_v44 = vsel %vm3928_vm14, %v5762_v32, %v3925_v8 }
0x10e9   : > { %v3049_v46 = vsel %vm3048_vm1, %v5764_v34, %v3045_v58  ;;  %v3931_v21 = vmul.f32 %v3929_v44, %v7032_v28 }
0x10ea   : > { %v3051_v22 = vmul.f32 %v3049_v46, %v7034_v43  ;;  %v5635_v43 = vld [vmem:[%s6108_s25 + $0xd] ss:$0 sm:$0xff] }
0x10eb   : > { %v3935_v55 = vmul.f32 %v7048_v6, %v3931_v21 }
0x10ec   : > { %v3055_v54 = vmul.f32 %v5632_v30, %v3051_v22 }
0x10ed   : > { %v7079_v52 = vadd.f32 %v7051_v9, %v3935_v55 }
0x10ee   : > { %v3059_v59 = vadd.f32 %v5633_v16, %v3055_v54 }
0x10ef   : > { %5400 = vmatmul.msk.f32.gmra.mxu0 %vm1162_vm0, %v7079_v52 }
0x10f0   : > { %5406 = vmatmul.msk.f32.gmra.mxu1 %vm1162_vm0, %v3059_v59  ;;  %5412 = vmatmul.msk.f32.gmra.mxu2 %vm1162_vm0, %v3059_v59 }
0x1135   : > { %v3970_v62 = vpop.f32.mrf.mxu0 }
0x1136   : > { %v3971_v28 = vadd.f32 %v5634_v60, %v3970_v62 }
0x1138   : > { %v3976_v63 = vmul.f32 0.35355338, %v3971_v28 }
0x113a   : > { %4190 = vrot.lane.b32.xlu2 %v3976_v63, %s5878_s9 }
0x1142   : > { %4348 = vrot.lane.b32.xlu2 %v3976_v63, %s5877_s21 }
0x1164   : > { %v4008_v57 = vpop.f32.mrf.mxu1 }
0x1165   : > { %v4009_v4 = vadd.f32 %v5635_v43, %v4008_v57 }
0x1167   : > { %4192 = vrot.lane.b32.xlu1 %v4009_v4, %s5878_s9  ;;  %5413 = vmatpush.xpose.msk.msrb.mxu3 %vm1291_vm5, %v4009_v4 }
0x116a   : > { %v4038_v6 = vpop.f32.mrf.mxu2  ;;  %5414 = vmatmul.msk.f32.vlgmr.msrb.gmra.mxu3 %vm1291_vm5, %v3976_v63 }
0x116b   : > { %v4039_v25 = vadd.f32 %v5636_v18, %v4038_v6 }
0x116c   : > { %v3973_v45 = vpop.f32.mrf.mxu0 }
0x116d   : > { %v3974_v9 = vadd.f32 %v5634_v60, %v3973_v45  ;;  %v4011_v48 = vpop.f32.mrf.mxu1  ;;  %4162 = vmatpush.msrb.mxu1 %v4039_v25 }
0x116e   : > { %v4012_v56 = vadd.f32 %v5635_v43, %v4011_v48 }
0x116f   : > { %v3977_v51 = vmul.f32 0.35355338, %v3974_v9  ;;  %4350 = vrot.lane.b32.xlu1 %v4009_v4, %s5877_s21 }
0x1170   : > { %4220 = vrot.lane.b32.xlu0 %v4012_v56, %s5878_s9  ;;  %5415 = vmatpush.xpose.msk.msrb.mxu0 %vm1291_vm5, %v4012_v56 }
0x1171   : > { %4376 = vrot.lane.b32.xlu2 %v3977_v51, %s5877_s21 }
0x1173   : > { %v4041_v38 = vpop.f32.mrf.mxu2  ;;  %5416 = vmatmul.msk.f32.vlgmr.msrb.gmra.mxu0 %vm1291_vm5, %v3977_v51 }
0x1174   : > { %v4042_v5 = vadd.f32 %v5636_v18, %v4041_v38 }
0x1176   : > { %4185 = vmatpush.msrb.mxu2 %v4042_v5  ;;  %v7098_v40 = vpack.i.bf16 %v4042_v5, %v4039_v25 }
0x1177   : > { %4378 = vrot.lane.b32.xlu1 %v4012_v56, %s5877_s21 }
0x1178   : > { %4218 = vrot.lane.b32.xlu0 %v3977_v51, %s5878_s9 }
0x1179   : > { %4532 = vrot.lane.b32.xlu2 %v3977_v51, %s5879_s13 }
0x117f   : > { %4504 = vrot.lane.b32.xlu1 %v3976_v63, %s5879_s13 }
0x1180   : > { %4506 = vrot.lane.b32.xlu0 %v4009_v4, %s5879_s13 }
0x1188   : > { %4534 = vrot.lane.b32.xlu0 %v4012_v56, %s5879_s13 }
0x1194   : > { %v4191_v11 = vpop.permute.xlu2 %4190 }
0x119c   : > { %v4349_v0 = vpop.permute.xlu2 %4348 }
0x11cb   : > { %v4377_v23 = vpop.permute.xlu2 %4376 }
0x11d3   : > { %v4533_v29 = vpop.permute.xlu2 %4532 }
0x11d9   : > { %v4193_v7 = vpop.permute.xlu1 %4192 }
0x11da   : > { %5419 = vmatpush.xpose.msk.msra.mxu3 %vm1291_vm5, %v4193_v7 }
0x11dd   : > { %5420 = vmatmul.msk.f32.vlgmr.msra.gmra.mxu3 %vm1291_vm5, %v4191_v11 }
0x11e1   : > { %v4351_v17 = vpop.permute.xlu1 %4350 }
0x11e2   : > { %5425 = vmatpush.xpose.msk.msrb.mxu3 %vm1291_vm5, %v4351_v17  ;;  %v4221_v19 = vpop.permute.xlu0 %4220 }
0x11e3   : > { %5421 = vmatpush.xpose.msk.msra.mxu0 %vm1291_vm5, %v4221_v19 }
0x11e5   : > { %5426 = vmatmul.msk.f32.vlgmr.msrb.gmra.mxu3 %vm1291_vm5, %v4349_v0 }
0x11e9   : > { %v4379_v1 = vpop.permute.xlu1 %4378 }
0x11ea   : > { %5427 = vmatpush.xpose.msk.msrb.mxu0 %vm1291_vm5, %v4379_v1  ;;  %v4219_v10 = vpop.permute.xlu0 %4218 }
0x11eb   : > { %5422 = vmatmul.msk.f32.vlgmr.msra.gmra.mxu0 %vm1291_vm5, %v4219_v10 }
0x11ed   : > { %v4067_v14 = vpop.f32.mrf.mxu3 }
0x11ee   : > { %v4096_v49 = vsel %vm1291_vm5, %v4067_v14, -inf }
0x11ef   : > { %4097 = vmax.xlane.f32.xlu1 %v4096_v49 }
0x11f0   : > { %v4093_v2 = vpop.f32.mrf.mxu0 }
0x11f1   : > { %v4099_v20 = vsel %vm1291_vm5, %v4093_v2, -inf  ;;  %v4505_v27 = vpop.permute.xlu1 %4504 }
0x11f2   : > { %4100 = vmax.xlane.f32.xlu0 %v4099_v20  ;;  %v4507_v26 = vpop.permute.xlu0 %4506 }
0x11f3   : > { %5428 = vmatmul.msk.f32.vlgmr.msrb.gmra.mxu0 %vm1291_vm5, %v4377_v23  ;;  %5431 = vmatpush.xpose.msk.msra.mxu3 %vm1291_vm5, %v4507_v26 }
0x11f6   : > { %5432 = vmatmul.msk.f32.vlgmr.msra.gmra.mxu3 %vm1291_vm5, %v4505_v27 }
0x11fa   : > { %v4535_v15 = vpop.permute.xlu0 %4534 }
0x11fb   : > { %5433 = vmatpush.xpose.msk.msra.mxu0 %vm1291_vm5, %v4535_v15 }
0x11fe   : > { %5434 = vmatmul.msk.f32.vlgmr.msra.gmra.mxu0 %vm1291_vm5, %v4533_v29 }
0x1260   : > { %v4215_v13 = vpop.f32.mrf.mxu3 }
0x1261   : > { %v4246_v32 = vsel %vm1291_vm5, %v4215_v13, -inf }
0x1262   : > { %4247 = vmax.xlane.f32.xlu2 %v4246_v32  ;;  %v4098_v34 = vpop.xlane.xlu1 %4097 }
0x1263   : > { %v4102_v35 = vsub.f32 %v4067_v14, %v4098_v34 }
0x1265   : > { %v4104_v36 = vmul.f32 1.442695, %v4102_v35  ;;  %v4101_v12 = vpop.xlane.xlu0 %4100 }
0x1266   : > { %v4103_v16 = vsub.f32 %v4093_v2, %v4101_v12 }
0x1267   : > { %5765 = vpow2.f32 %v4104_v36 }
0x1268   : > { %v4243_v3 = vpop.f32.mrf.mxu0  ;;  %v4373_v30 = vpop.f32.mrf.mxu3  ;;  %v4106_v41 = vmul.f32 1.442695, %v4103_v16 }
0x1269   : > { %v4404_v50 = vsel %vm1291_vm5, %v4373_v30, -inf  ;;  %v4249_v53 = vsel %vm1291_vm5, %v4243_v3, -inf }
0x126a   : > { %4405 = vmax.xlane.f32.xlu0 %v4404_v50  ;;  %4250 = vmax.xlane.f32.xlu1 %v4249_v53  ;;  %5767 = vpow2.f32 %v4106_v41 }
0x126d   : > { %v7124_v37 = vpop.eup %5765 }
0x126e   : > { %v4108_v47 = vsel %vm1291_vm5, %v7124_v37, 0.0 }
0x1270   : > { %v4401_v39 = vpop.f32.mrf.mxu0  ;;  %v7130_v44 = vpop.eup %5767 }
0x1271   : > { %v4407_v61 = vsel %vm1291_vm5, %v4401_v39, -inf  ;;  %v4111_v46 = vsel %vm1291_vm5, %v7130_v44, 0.0 }
0x1272   : > { %4408 = vmax.xlane.f32.xlu2 %v4407_v61 }
0x1279   : > { %v4529_v42 = vpop.f32.mrf.mxu3 }
0x127a   : > { %4109 = vadd.xlane.f32.xlu2 %v4108_v47  ;;  %v4560_v31 = vsel %vm1291_vm5, %v4529_v42, -inf }
0x127b   : > { %4561 = vmax.xlane.f32.xlu1 %v4560_v31  ;;  %v4557_v8 = vpop.f32.mrf.mxu0 }
0x127c   : > { %v4563_v58 = vsel %vm1291_vm5, %v4557_v8, -inf }
0x127d   : > { %4564 = vmax.xlane.f32.xlu0 %v4563_v58 }
0x1283   : > { %4112 = vadd.xlane.f32.xlu1 %v4111_v46 }
0x12d5   : > { %v4248_v21 = vpop.xlane.xlu2 %4247 }
0x12d6   : > { %v4252_v22 = vsub.f32 %v4215_v13, %v4248_v21 }
0x12d8   : > { %v4254_v55 = vmul.f32 1.442695, %v4252_v22 }
0x12da   : > { %5769 = vpow2.f32 %v4254_v55 }
0x12dd   : > { %v4251_v54 = vpop.xlane.xlu1 %4250  ;;  %v4406_v59 = vpop.xlane.xlu0 %4405 }
0x12de   : > { %v4253_v60 = vsub.f32 %v4243_v3, %v4251_v54  ;;  %v4410_v62 = vsub.f32 %v4373_v30, %v4406_v59 }
0x12e0   : > { %v7134_v28 = vpop.eup %5769  ;;  %v4256_v63 = vmul.f32 1.442695, %v4253_v60  ;;  %v4412_v43 = vmul.f32 1.442695, %v4410_v62 }
0x12e1   : > { %v4258_v57 = vsel %vm1291_vm5, %v7134_v28, 0.0 }
0x12e2   : > { %5771 = vpow2.f32 %v4256_v63  ;;  %4259 = vadd.xlane.f32.xlu0 %v4258_v57 }
0x12e3   : > { %5773 = vpow2.f32 %v4412_v43 }
0x12e5   : > { %v4409_v4 = vpop.xlane.xlu2 %4408 }
0x12e6   : > { %v4411_v18 = vsub.f32 %v4401_v39, %v4409_v4 }
0x12e8   : > { %v7138_v6 = vpop.eup %5771  ;;  %v4414_v25 = vmul.f32 1.442695, %v4411_v18 }
0x12e9   : > { %v7140_v45 = vpop.eup %5773  ;;  %v4261_v9 = vsel %vm1291_vm5, %v7138_v6, 0.0 }
0x12ea   : > { %5775 = vpow2.f32 %v4414_v25  ;;  %4262 = vadd.xlane.f32.xlu2 %v4261_v9  ;;  %v4416_v48 = vsel %vm1291_vm5, %v7140_v45, 0.0 }
0x12eb   : > { %4417 = vadd.xlane.f32.xlu1 %v4416_v48 }
0x12ed   : > { %v4110_v56 = vpop.xlane.xlu2 %4109 }
0x12ee   : > { %5777 = vrcp.f32 %v4110_v56  ;;  %v4562_v51 = vpop.xlane.xlu1 %4561  ;;  %v4125_v2 = vand.u32 2147483648, %v4110_v56  ;;  %v4123_v26 = vand.u32 2147483647, %v4110_v56  ;;  %vm4119_vm3 = vweird.f32 %v4110_v56 }
0x12ef   : > { %v4566_v38 = vsub.f32 %v4529_v42, %v4562_v51 }
0x12f0   : > { %v7146_v5 = vpop.eup %5775  ;;  %v4565_v7 = vpop.xlane.xlu0 %4564  ;;  %v4126_v13 = vor.u32 1.1754944e-38, %v4125_v2  ;;  %vm4124_vm6 = vcmp.eq.f32.partialorder %v4123_v26, 8.507059e+37 }
0x12f1   : > { %v4568_v11 = vmul.f32 1.442695, %v4566_v38  ;;  %v4567_v17 = vsub.f32 %v4557_v8, %v4565_v7  ;;  %v4419_v19 = vsel %vm1291_vm5, %v7146_v5, 0.0 }
0x12f2   : > { %4420 = vadd.xlane.f32.xlu0 %v4419_v19 }
0x12f3   : > { %5779 = vpow2.f32 %v4568_v11  ;;  %v4570_v0 = vmul.f32 1.442695, %v4567_v17 }
0x12f4   : > { %v5778_v1 = vpop.eup %5777 }
0x12f5   : > { %v4115_v10 = vmul.f32 %v5778_v1, %v4110_v56  ;;  %5781 = vpow2.f32 %v4570_v0  ;;  %vm4120_vm2 = vweird.f32 %v5778_v1 }
0x12f6   : > { %v4113_v14 = vpop.xlane.xlu1 %4112  ;;  %vm4121_vm4 = vmor %vm4119_vm3, %vm4120_vm2 }
0x12f7   : > { %v4116_v49 = vsub.f32 1.0, %v4115_v10  ;;  %5783 = vrcp.f32 %v4113_v14  ;;  %v4140_v36 = vand.u32 2147483648, %v4113_v14  ;;  %v4138_v39 = vand.u32 2147483647, %v4113_v14 }
0x12f8   : > { %vm4134_vm9 = vweird.f32 %v4113_v14 }
0x12f9   : > { %v7150_v20 = vpop.eup %5779  ;;  %v4117_v23 = vmul.f32 %v5778_v1, %v4116_v49  ;;  %v4141_v61 = vor.u32 1.1754944e-38, %v4140_v36  ;;  %vm4139_vm13 = vcmp.eq.f32.partialorder %v4138_v39, 8.507059e+37 }
0x12fa   : > { %v4572_v27 = vsel %vm1291_vm5, %v7150_v20, 0.0 }
0x12fb   : > { %v7154_v15 = vpop.eup %5781  ;;  %v4118_v29 = vadd.f32 %v5778_v1, %v4117_v23  ;;  %4573 = vadd.xlane.f32.xlu2 %v4572_v27 }
0x12fc   : > { %v4575_v32 = vsel %vm1291_vm5, %v7154_v15, 0.0 }
0x12fd   : > { %v5784_v34 = vpop.eup %5783  ;;  %v4122_v35 = vsel %vm4121_vm4, %v5778_v1, %v4118_v29  ;;  %4576 = vadd.xlane.f32.xlu1 %v4575_v32 }
0x12fe   : > { %v4127_v3 = vsel %vm4124_vm6, %v4126_v13, %v4122_v35  ;;  %v4130_v30 = vmul.f32 %v5784_v34, %v4113_v14  ;;  %vm4135_vm8 = vweird.f32 %v5784_v34 }
0x12ff   : > { %v4128_v50 = vmul.f32 %v7124_v37, %v4127_v3  ;;  %vm4136_vm12 = vmor %vm4134_vm9, %vm4135_vm8 }
0x1300   : > { %v4131_v53 = vsub.f32 1.0, %v4130_v30 }
0x1301   : > { %5417 = vmatmul.msk.f32.vlgmr.msrb.gmra.mxu1 %vm1291_vm5, %v4128_v50 }
0x1302   : > { %v4132_v12 = vmul.f32 %v5784_v34, %v4131_v53 }
0x1304   : > { %v4133_v16 = vadd.f32 %v5784_v34, %v4132_v12 }
0x1306   : > { %v4137_v41 = vsel %vm4136_vm12, %v5784_v34, %v4133_v16  ;;  %5594 = vrot.lane.b32.xlu0 %v7098_v40, %s5878_s9 }
0x1307   : > { %v4142_v42 = vsel %vm4139_vm13, %v4141_v61, %v4137_v41 }
0x1308   : > { %v4143_v47 = vmul.f32 %v7130_v44, %v4142_v42 }
0x130a   : > { %5418 = vmatmul.msk.f32.vlgmr.msrb.gmra.mxu2 %vm1291_vm5, %v4143_v47 }
0x1313   : > { %5599 = vrot.lane.b32.xlu2 %v7098_v40, %s5877_s21 }
0x1316   : > { %5604 = vrot.lane.b32.xlu1 %v7098_v40, %s5879_s13 }
0x1355   : > { %v4260_v37 = vpop.xlane.xlu0 %4259 }
0x1356   : > { %5785 = vrcp.f32 %v4260_v37  ;;  %vm4269_vm14 = vweird.f32 %v4260_v37  ;;  %v4273_v56 = vand.u32 2147483647, %v4260_v37  ;;  %v4275_v51 = vand.u32 2147483648, %v4260_v37 }
0x1358   : > { %vm4274_vm6 = vcmp.eq.f32.partialorder %v4273_v56, 8.507059e+37  ;;  %v4276_v49 = vor.u32 1.1754944e-38, %v4275_v51 }
0x135c   : > { %v5786_v58 = vpop.eup %5785 }
0x135d   : > { %v4263_v31 = vpop.xlane.xlu2 %4262  ;;  %v4265_v21 = vmul.f32 %v5786_v58, %v4260_v37  ;;  %vm4270_vm15 = vweird.f32 %v5786_v58 }
0x135e   : > { %5787 = vrcp.f32 %v4263_v31  ;;  %v7168_v8 = vpop.xlane.xlu1 %4417  ;;  %v4290_v38 = vand.u32 2147483648, %v4263_v31  ;;  %vm7188_vm2 = vmor %vm4269_vm14, %vm4270_vm15  ;;  %vm4284_vm3 = vweird.f32 %v4263_v31  ;;  %v4288_v11 = vand.u32 2147483647, %v4263_v31 }
0x135f   : > { %5789 = vrcp.f32 %v7168_v8  ;;  %v4266_v54 = vsub.f32 1.0, %v4265_v21  ;;  %vm4427_vm8 = vweird.f32 %v7168_v8  ;;  %v4431_v23 = vand.u32 2147483647, %v7168_v8 }
0x1360   : > { %v4291_v2 = vor.u32 1.1754944e-38, %v4290_v38  ;;  %vm4289_vm9 = vcmp.eq.f32.partialorder %v4288_v11, 8.507059e+37  ;;  %v4433_v26 = vand.u32 2147483648, %v7168_v8 }
0x1361   : > { %v4267_v62 = vmul.f32 %v5786_v58, %v4266_v54 }
0x1362   : > { %v4434_v21 = vor.u32 1.1754944e-38, %v4433_v26 }
0x1363   : > { %v4268_v18 = vadd.f32 %v5786_v58, %v4267_v62 }
0x1364   : > { %v5788_v46 = vpop.eup %5787 }
0x1365   : > { %v4280_v44 = vmul.f32 %v5788_v46, %v4263_v31  ;;  %v7171_v22 = vpop.xlane.xlu0 %4420  ;;  %v7174_v55 = vpop.eup %5789  ;;  %vm4285_vm1 = vweird.f32 %v5788_v46  ;;  %v4272_v0 = vsel %vm7188_vm2, %v5786_v58, %v4268_v18  ;;  %vm4432_vm2 = vcmp.eq.f32.partialorder %v4431_v23, 8.507059e+37  ;;  %v5437_v23 = vld [vmem:[%s6060_s19 + $0x1e0] sm:$0xff] }
0x1366   : > { %5791 = vrcp.f32 %v7171_v22  ;;  %v4423_v59 = vmul.f32 %v7174_v55, %v7168_v8  ;;  %vm7192_vm4 = vmor %vm4284_vm3, %vm4285_vm1  ;;  %v4277_v13 = vsel %vm4274_vm6, %v4276_v49, %v4272_v0  ;;  %vm4428_vm12 = vweird.f32 %v7174_v55  ;;  %v5439_v49 = vld [vmem:[%s6060_s19 + $0x1f0] sm:$0xff] }
0x1367   : > { %v4281_v40 = vsub.f32 1.0, %v4280_v44  ;;  %vm4442_vm14 = vweird.f32 %v7171_v22  ;;  %v4448_v36 = vand.u32 2147483648, %v7171_v22  ;;  %vm7221_vm15 = vmor %vm4427_vm8, %vm4428_vm12  ;;  %v4446_v61 = vand.u32 2147483647, %v7171_v22 }
0x1368   : > { %v4424_v4 = vsub.f32 1.0, %v4423_v59  ;;  %v4278_v42 = vmul.f32 %v7134_v28, %v4277_v13 }
0x1369   : > { %v4282_v63 = vmul.f32 %v5788_v46, %v4281_v40  ;;  %v4449_v44 = vor.u32 1.1754944e-38, %v4448_v36  ;;  %vm4447_vm3 = vcmp.eq.f32.partialorder %v4446_v61, 8.507059e+37 }
0x136a   : > { %v4425_v19 = vmul.f32 %v7174_v55, %v4424_v4 }
0x136b   : > { %v4283_v25 = vadd.f32 %v5788_v46, %v4282_v63 }
0x136c   : > { %v7178_v60 = vpop.eup %5791  ;;  %v4426_v34 = vadd.f32 %v7174_v55, %v4425_v19 }
0x136d   : > { %v4438_v43 = vmul.f32 %v7178_v60, %v7171_v22  ;;  %v4287_v1 = vsel %vm7192_vm4, %v5788_v46, %v4283_v25  ;;  %vm4443_vm13 = vweird.f32 %v7178_v60 }
0x136e   : > { %v7182_v57 = vpop.xlane.xlu2 %4573  ;;  %v4292_v32 = vsel %vm4289_vm9, %v4291_v2, %v4287_v1  ;;  %v4430_v37 = vsel %vm7221_vm15, %v7174_v55, %v4426_v34  ;;  %vm7233_vm1 = vmor %vm4442_vm14, %vm4443_vm13  ;;  %v5438_v2 = vld [vmem:[%s6060_s19 + $0x1e8] sm:$0xff] }
0x136f   : > { %5793 = vrcp.f32 %v7182_v57  ;;  %v4439_v9 = vsub.f32 1.0, %v4438_v43  ;;  %v4293_v47 = vmul.f32 %v7138_v6, %v4292_v32  ;;  %v4435_v22 = vsel %vm4432_vm2, %v4434_v21, %v4430_v37 }
0x1370   : > { %v7185_v48 = vpop.xlane.xlu1 %4576  ;;  %vm4583_vm8 = vweird.f32 %v7182_v57  ;;  %v4587_v59 = vand.u32 2147483647, %v7182_v57  ;;  %v4436_v43 = vmul.f32 %v7140_v45, %v4435_v22 }
0x1371   : > { %5795 = vrcp.f32 %v7185_v48  ;;  %v4440_v10 = vmul.f32 %v7178_v60, %v4439_v9  ;;  %v4604_v62 = vand.u32 2147483648, %v7185_v48  ;;  %vm4598_vm12 = vweird.f32 %v7185_v48 }
0x1372   : > { %v4602_v63 = vand.u32 2147483647, %v7185_v48  ;;  %vm4588_vm14 = vcmp.eq.f32.partialorder %v4587_v59, 8.507059e+37  ;;  %v5443_v59 = vld [vmem:[%s6118_s26 + $0x20] sm:$0xff] }
0x1373   : > { %v4441_v35 = vadd.f32 %v7178_v60, %v4440_v10  ;;  %v4605_v9 = vor.u32 1.1754944e-38, %v4604_v62 }
0x1374   : > { %vm4603_vm15 = vcmp.eq.f32.partialorder %v4602_v63, 8.507059e+37 }
0x1375   : > { %v7202_v14 = vpop.eup %5793  ;;  %v4445_v28 = vsel %vm7233_vm1, %v7178_v60, %v4441_v35  ;;  %v4589_v60 = vand.u32 2147483648, %v7182_v57 }
0x1376   : > { %v4579_v27 = vmul.f32 %v7202_v14, %v7182_v57  ;;  %v5600_v50 = vpop.permute.xlu2 %5599  ;;  %v4450_v55 = vsel %vm4447_vm3, %v4449_v44, %v4445_v28  ;;  %vm4584_vm4 = vweird.f32 %v7202_v14 }
0x1377   : > { %v7209_v29 = vpop.eup %5795  ;;  %v5602_v8 = vunpack.i.h.bf16 %v5600_v50  ;;  %v5601_v58 = vunpack.i.l.bf16 %v5600_v50  ;;  %vm4585_vm9 = vmor %vm4583_vm8, %vm4584_vm4  ;;  %v4451_v4 = vmul.f32 %v7146_v5, %v4450_v55  ;;  %v4590_v57 = vor.u32 1.1754944e-38, %v4589_v60  ;;  %v5446_v55 = vld [vmem:[%s6118_s26 + $0x38] sm:$0xff] }
0x1378   : > { %v4580_v3 = vsub.f32 1.0, %v4579_v27  ;;  %v4594_v30 = vmul.f32 %v7209_v29, %v7185_v48  ;;  %v5595_v53 = vpop.permute.xlu0 %5594  ;;  %vm4599_vm6 = vweird.f32 %v7209_v29  ;;  %4805 = vmatpush.msrb.mxu0 %v5446_v55 }
0x1379   : > { %v5597_v12 = vunpack.i.h.bf16 %v5595_v53  ;;  %v5596_v39 = vunpack.i.l.bf16 %v5595_v53  ;;  %vm4600_vm13 = vmor %vm4598_vm12, %vm4599_vm6 }
0x137a   : > { %v4595_v41 = vsub.f32 1.0, %v4594_v30  ;;  %v4581_v6 = vmul.f32 %v7202_v14, %v4580_v3 }
0x137b   : > { %4316 = vmatpush.msra.mxu1 %v5596_v39  ;;  %4343 = vmatpush.msra.mxu2 %v5597_v12  ;;  %v5637_v12 = vld [vmem:[%s6108_s25 + $0xf] ss:$0 sm:$0xff] }
0x137c   : > { %v4596_v46 = vmul.f32 %v7209_v29, %v4595_v41  ;;  %5423 = vmatmul.msk.f32.vlgmr.msra.gmra.mxu1 %vm1291_vm5, %v4278_v42  ;;  %5424 = vmatmul.msk.f32.vlgmr.msra.gmra.mxu2 %vm1291_vm5, %v4293_v47  ;;  %v4582_v54 = vadd.f32 %v7202_v14, %v4581_v6 }
0x137d   : > { %4473 = vmatpush.msrb.mxu1 %v5601_v58  ;;  %4499 = vmatpush.msrb.mxu2 %v5602_v8 }
0x137e   : > { %v4597_v40 = vadd.f32 %v7209_v29, %v4596_v46  ;;  %v4586_v18 = vsel %vm4585_vm9, %v7202_v14, %v4582_v54  ;;  %v4164_v11 = vpop.f32.mrf.mxu1  ;;  %v5440_v14 = vld [vmem:[%s6060_s19 + $0x1f8] sm:$0xff]  ;;  %v5445_v54 = vld [vmem:[%s6118_s26 + $0x30] sm:$0xff] }
0x137f   : > { %v4591_v56 = vsel %vm4588_vm14, %v4590_v57, %v4586_v18  ;;  %4715 = vmatpush.msrb.mxu3 %v5440_v14  ;;  %4806 = vmatpush.msrb.mxu0 %v5445_v54  ;;  %v5454_v18 = vld [vmem:[%s6134_s3 + $0x68] sm:$0xff] }
0x1380   : > { %v4601_v25 = vsel %vm4600_vm13, %v7209_v29, %v4597_v40  ;;  %v4592_v5 = vmul.f32 %v7150_v20, %v4591_v56  ;;  %v5444_v40 = vld [vmem:[%s6118_s26 + $0x28] sm:$0xff] }
0x1381   : > { %v4606_v51 = vsel %vm4603_vm15, %v4605_v9, %v4601_v25  ;;  %4716 = vmatpush.msrb.mxu3 %v5439_v49  ;;  %4807 = vmatpush.msrb.mxu0 %v5444_v40  ;;  %v5453_v9 = vld [vmem:[%s6134_s3 + $0x60] sm:$0xff] }
0x1382   : > { %v4607_v7 = vmul.f32 %v7154_v15, %v4606_v51 }
0x1383   : > { %4717 = vmatpush.msrb.mxu3 %v5438_v2  ;;  %4808 = vmatpush.msrb.mxu0 %v5443_v59 }
0x1384   : > { %5429 = vmatmul.msk.f32.vlgmr.msrb.gmra.mxu1 %vm1291_vm5, %v4436_v43  ;;  %5430 = vmatmul.msk.f32.vlgmr.msrb.gmra.mxu2 %vm1291_vm5, %v4451_v4  ;;  %v5456_v43 = vld [vmem:[%s6134_s3 + $0x78] sm:$0xff]  ;;  %v5455_v4 = vld [vmem:[%s6134_s3 + $0x70] sm:$0xff] }
0x1385   : > { %4718 = vmatpush.msrb.mxu3 %v5437_v23 }
0x1388   : > { %v5605_v48 = vpop.permute.xlu1 %5604 }
0x1389   : > { %v5607_v38 = vunpack.i.h.bf16 %v5605_v48  ;;  %v5606_v45 = vunpack.i.l.bf16 %v5605_v48  ;;  %v5452_v48 = vld [vmem:[%s6134_s3 + $0x58] sm:$0xff] }
0x138b   : > { %4629 = vmatpush.msra.mxu1 %v5606_v45  ;;  %4655 = vmatpush.msra.mxu2 %v5607_v38 }
0x138c   : > { %5435 = vmatmul.msk.f32.vlgmr.msra.gmra.mxu1 %vm1291_vm5, %v4592_v5  ;;  %5436 = vmatmul.msk.f32.vlgmr.msra.gmra.mxu2 %vm1291_vm5, %v4607_v7 }
0x138d   : > { %v4187_v17 = vpop.f32.mrf.mxu2  ;;  %4843 = vmatpush.msrb.mxu1 %v5456_v43 }
0x138f   : > { %4844 = vmatpush.msrb.mxu1 %v5455_v4 }
0x1391   : > { %4845 = vmatpush.msrb.mxu1 %v5454_v18 }
0x1393   : > { %4846 = vmatpush.msrb.mxu1 %v5453_v9 }
0x1395   : > { %4847 = vmatpush.msrb.mxu1 %v5452_v48 }
0x13f9   : > { %v4318_v19 = vpop.f32.mrf.mxu1 }
0x13fa   : > { %4662 = vrot.lane.b32.xlu0 %v4318_v19, %s5880_s0 }
0x13ff   : > { %v4345_v0 = vpop.f32.mrf.mxu2 }
0x1400   : > { %4664 = vrot.lane.b32.xlu1 %v4345_v0, %s5880_s0  ;;  %v5638_v0 = vld [vmem:[%s6140_s5 + $0x5] ss:$0 sm:$0xff] }
0x1401   : > { %v4475_v20 = vpop.f32.mrf.mxu1 }
0x1402   : > { %4670 = vrot.lane.b32.xlu2 %v4475_v20, %s5881_s24 }
0x1407   : > { %v4501_v15 = vpop.f32.mrf.mxu2 }
0x1409   : > { %v4631_v1 = vpop.f32.mrf.mxu1 }
0x140a   : > { %4672 = vrot.lane.b32.xlu2 %v4501_v15, %s5881_s24  ;;  %4678 = vrot.lane.b32.xlu0 %v4631_v1, %s5882_s30  ;;  %v5639_v1 = vld [vmem:[%s6146_s20 + $0x5] ss:$0 sm:$0xff] }
0x140f   : > { %v4657_v10 = vpop.f32.mrf.mxu2 }
0x1412   : > { %4680 = vrot.lane.b32.xlu0 %v4657_v10, %s5882_s30 }
0x145c   : > { %v4671_v27 = vpop.permute.xlu2 %4670 }
0x1464   : > { %v4673_v30 = vpop.permute.xlu2 %4672 }
0x146c   : > { %v4663_v26 = vpop.permute.xlu0 %4662 }
0x146d   : > { %v4684_v29 = vsel %vm1291_vm5, %v4164_v11, %v4663_v26 }
0x146e   : > { %v4686_v13 = vsel %vm1934_vm10, %v4684_v29, %v4671_v27 }
0x1472   : > { %v4665_v35 = vpop.permute.xlu1 %4664 }
0x1473   : > { %v4685_v3 = vsel %vm1291_vm5, %v4187_v17, %v4665_v35  ;;  %v5450_v35 = vld [vmem:[%s6134_s3 + $0x48] sm:$0xff] }
0x1474   : > { %v4687_v50 = vsel %vm1934_vm10, %v4685_v3, %v4673_v30  ;;  %v5449_v3 = vld [vmem:[%s6134_s3 + $0x40] sm:$0xff] }
0x1475   : > { %v5640_v30 = vld [vmem:[%s6123_s6 + $0x1] ss:$0 sm:$0xff] }
0x147c   : > { %v4679_v32 = vpop.permute.xlu0 %4678 }
0x147d   : > { %v4688_v34 = vsel %vm1937_vm11, %v4686_v13, %v4679_v32 }
0x147e   : > { %5441 = vmatmul.msk.f32.vlgmr.msrb.gmra.mxu3 %vm1162_vm0, %v4688_v34  ;;  %v5451_v34 = vld [vmem:[%s6134_s3 + $0x50] sm:$0xff] }
0x147f   : > { %4848 = vmatpush.msrb.mxu1 %v5451_v34 }
0x1481   : > { %4849 = vmatpush.msrb.mxu1 %v5450_v35 }
0x1483   : > { %4850 = vmatpush.msrb.mxu1 %v5449_v3 }
0x1484   : > { %v4681_v53 = vpop.permute.xlu0 %4680 }
0x1485   : > { %v4689_v36 = vsel %vm1937_vm11, %v4687_v50, %v4681_v53 }
0x1486   : > { %5442 = vmatmul.msk.f32.gmra.mxu3 %vm1162_vm0, %v4689_v36 }
0x1501   : > { %v4720_v39 = vpop.f32.mrf.mxu3 }
0x1502   : > { %v4721_v16 = vadd.f32 %v5637_v12, %v4720_v39 }
0x1504   : > { %v4726_v61 = vadd.f32 %v4721_v16, %v7055_v33 }
0x1506   : > { %v4728_v41 = vsel %vm1162_vm0, %v4726_v61, 0.0 }
0x1507   : > { %4729 = vadd.xlane.f32.xlu1 %v4728_v41 }
0x1509   : > { %v4723_v42 = vpop.f32.mrf.mxu3 }
0x150a   : > { %v4724_v47 = vadd.f32 %v5637_v12, %v4723_v42 }
0x150c   : > { %v4727_v37 = vadd.f32 %v4724_v47, %v7079_v52 }
0x150e   : > { %v4731_v31 = vsel %vm1162_vm0, %v4727_v37, 0.0 }
0x150f   : > { %4732 = vadd.xlane.f32.xlu2 %v4731_v31 }
0x157a   : > { %v4730_v8 = vpop.xlane.xlu1 %4729 }
0x157b   : > { %v4734_v58 = vmul.f32 %v4730_v8, %v6575_v24 }
0x157d   : > { %v4736_v28 = vsub.f32 %v4726_v61, %v4734_v58  ;;  %v5641_v61 = vld [vmem:[%s6129_s1 + $0x1] ss:$0 sm:$0xff] }
0x157f   : > { %v4738_v6 = vmul.f32 %v4736_v28, %v4736_v28 }
0x1581   : > { %v4740_v33 = vsel %vm1162_vm0, %v4738_v6, 0.0 }
0x1582   : > { %4741 = vadd.xlane.f32.xlu0 %v4740_v33  ;;  %v4733_v46 = vpop.xlane.xlu2 %4732 }
0x1583   : > { %v4735_v21 = vmul.f32 %v4733_v46, %v6575_v24 }
0x1585   : > { %v4737_v44 = vsub.f32 %v4727_v37, %v4735_v21 }
0x1587   : > { %v4739_v52 = vmul.f32 %v4737_v44, %v4737_v44 }
0x1589   : > { %v4743_v22 = vsel %vm1162_vm0, %v4739_v52, 0.0 }
0x158a   : > { %4744 = vadd.xlane.f32.xlu1 %v4743_v22 }
0x15f5   : > { %v4742_v60 = vpop.xlane.xlu0 %4741 }
0x15f6   : > { %v4746_v62 = vmul.f32 %v4742_v60, %v6575_v24 }
0x15f8   : > { %v4748_v63 = vadd.f32 1e-05, %v4746_v62 }
0x15fa   : > { %5797 = vrsqrt.f32 %v4748_v63  ;;  %vm4756_vm11 = vweird.f32 %v4748_v63 }
0x15fd   : > { %v4745_v25 = vpop.xlane.xlu1 %4744 }
0x15fe   : > { %v4747_v57 = vmul.f32 %v4745_v25, %v6575_v24 }
0x1600   : > { %v5798_v56 = vpop.eup %5797  ;;  %v4749_v51 = vadd.f32 1e-05, %v4747_v57 }
0x1601   : > { %v4751_v38 = vmul.f32 %v5798_v56, %v4748_v63  ;;  %vm4757_vm10 = vweird.f32 %v5798_v56 }
0x1602   : > { %5799 = vrsqrt.f32 %v4749_v51  ;;  %vm4758_vm1 = vmor %vm4756_vm11, %vm4757_vm10  ;;  %vm4766_vm3 = vweird.f32 %v4749_v51 }
0x1603   : > { %v4752_v45 = vmul.f32 %v5798_v56, %v4751_v38 }
0x1605   : > { %v4753_v5 = vmul.f32 0.5, %v4752_v45  ;;  %v5642_v45 = vld [vmem:[%s6140_s5 + $0x6] ss:$0 sm:$0xff] }
0x1607   : > { %v4754_v7 = vsub.f32 1.5, %v4753_v5 }
0x1608   : > { %v5800_v11 = vpop.eup %5799 }
0x1609   : > { %v4755_v17 = vmul.f32 %v5798_v56, %v4754_v7  ;;  %v4761_v19 = vmul.f32 %v5800_v11, %v4749_v51  ;;  %vm4767_vm2 = vweird.f32 %v5800_v11 }
0x160a   : > { %vm4768_vm4 = vmor %vm4766_vm3, %vm4767_vm2 }
0x160b   : > { %v4759_v20 = vsel %vm4758_vm1, %v5798_v56, %v4755_v17  ;;  %v4762_v15 = vmul.f32 %v5800_v11, %v4761_v19  ;;  %v5643_v17 = vld [vmem:[%s6146_s20 + $0x6] ss:$0 sm:$0xff] }
0x160c   : > { %v4770_v10 = vmul.f32 %v4759_v20, %v4736_v28 }
0x160d   : > { %v4763_v14 = vmul.f32 0.5, %v4762_v15 }
0x160e   : > { %v4774_v49 = vmul.f32 %v5638_v0, %v4770_v10 }
0x160f   : > { %v4764_v2 = vsub.f32 1.5, %v4763_v14 }
0x1610   : > { %v4778_v23 = vadd.f32 %v5639_v1, %v4774_v49 }
0x1611   : > { %v4765_v26 = vmul.f32 %v5800_v11, %v4764_v2 }
0x1612   : > { %5447 = vmatmul.msk.f32.vlgmr.msrb.gmra.mxu0 %vm1162_vm0, %v4778_v23 }
0x1613   : > { %v4769_v27 = vsel %vm4768_vm4, %v5800_v11, %v4765_v26 }
0x1614   : > { %v4771_v29 = vmul.f32 %v4769_v27, %v4737_v44 }
0x1616   : > { %v4775_v13 = vmul.f32 %v5638_v0, %v4771_v29 }
0x1618   : > { %v4779_v32 = vadd.f32 %v5639_v1, %v4775_v13 }
0x161a   : > { %5448 = vmatmul.msk.f32.gmra.mxu0 %vm1162_vm0, %v4779_v32 }
0x168f   : > { %v4810_v50 = vpop.f32.mrf.mxu0 }
0x1690   : > { %v4811_v53 = vadd.f32 %v5640_v30, %v4810_v50 }
0x1692   : > { %v4816_v36 = vmax.f32 %v4811_v53, 0.0 }
0x1694   : > { %5457 = vmatmul.msk.f32.vlgmr.msrb.gmra.mxu1 %vm2924_vm7, %v4816_v36  ;;  %v4967_v36 = vld [vmem:[%s6152_s2 + $0x18] sm:$0xff] }
0x1695   : > { %4990 = vmatpush.msrb.mxu2 %v4967_v36 }
0x1697   : > { %v4813_v12 = vpop.f32.mrf.mxu0 }
0x1698   : > { %v4814_v39 = vadd.f32 %v5640_v30, %v4813_v12  ;;  %v4966_v12 = vld [vmem:[%s6152_s2 + $0x10] sm:$0xff] }
0x1699   : > { %4991 = vmatpush.msrb.mxu2 %v4966_v12 }
0x169a   : > { %v4817_v16 = vmax.f32 %v4814_v39, 0.0  ;;  %v4965_v39 = vld [vmem:[%s6152_s2 + $0x8] sm:$0xff] }
0x169b   : > { %4992 = vmatpush.msrb.mxu2 %v4965_v39 }
0x169c   : > { %5458 = vmatmul.msk.f32.gmra.mxu1 %vm2924_vm7, %v4817_v16  ;;  %v4964_v16 = vld [vmem:[%s6152_s2] sm:$0xff] }
0x169d   : > { %4993 = vmatpush.msrb.mxu2 %v4964_v16 }
0x1711   : > { %v4852_v41 = vpop.f32.mrf.mxu1 }
0x1712   : > { %v4853_v42 = vadd.f32 %v5641_v61, %v4852_v41 }
0x1714   : > { %v4858_v47 = vadd.f32 %v4853_v42, %v4778_v23 }
0x1716   : > { %v4860_v37 = vsel %vm1162_vm0, %v4858_v47, 0.0 }
0x1717   : > { %4861 = vadd.xlane.f32.xlu2 %v4860_v37 }
0x1719   : > { %v4855_v31 = vpop.f32.mrf.mxu1 }
0x171a   : > { %v4856_v8 = vadd.f32 %v5641_v61, %v4855_v31 }
0x171c   : > { %v4859_v58 = vadd.f32 %v4856_v8, %v4779_v32 }
0x171e   : > { %v4863_v28 = vsel %vm1162_vm0, %v4859_v58, 0.0 }
0x171f   : > { %4864 = vadd.xlane.f32.xlu0 %v4863_v28 }
0x178a   : > { %v4862_v6 = vpop.xlane.xlu2 %4861 }
0x178b   : > { %v4866_v33 = vmul.f32 %v4862_v6, %v6575_v24 }
0x178d   : > { %v4868_v46 = vsub.f32 %v4858_v47, %v4866_v33 }
0x178f   : > { %v4870_v21 = vmul.f32 %v4868_v46, %v4868_v46 }
0x1791   : > { %v4872_v44 = vsel %vm1162_vm0, %v4870_v21, 0.0 }
0x1792   : > { %v4865_v52 = vpop.xlane.xlu0 %4864  ;;  %4873 = vadd.xlane.f32.xlu1 %v4872_v44 }
0x1793   : > { %v4867_v22 = vmul.f32 %v4865_v52, %v6575_v24  ;;  %v5644_v52 = vld [vmem:[%s6140_s5 + $0x7] ss:$0 sm:$0xff] }
0x1795   : > { %v4869_v55 = vsub.f32 %v4859_v58, %v4867_v22 }
0x1797   : > { %v4871_v54 = vmul.f32 %v4869_v55, %v4869_v55 }
0x1799   : > { %v4875_v40 = vsel %vm1162_vm0, %v4871_v54, 0.0  ;;  %v5645_v54 = vld [vmem:[%s6146_s20 + $0x7] ss:$0 sm:$0xff] }
0x179a   : > { %4876 = vadd.xlane.f32.xlu2 %v4875_v40 }
0x1805   : > { %v4874_v59 = vpop.xlane.xlu1 %4873 }
0x1806   : > { %v4878_v60 = vmul.f32 %v4874_v59, %v6575_v24 }
0x1808   : > { %v4880_v62 = vadd.f32 1e-05, %v4878_v60 }
0x180a   : > { %5801 = vrsqrt.f32 %v4880_v62  ;;  %vm4888_vm6 = vweird.f32 %v4880_v62 }
0x180d   : > { %v4877_v63 = vpop.xlane.xlu2 %4876 }
0x180e   : > { %v4879_v43 = vmul.f32 %v4877_v63, %v6575_v24 }
0x1810   : > { %v5802_v4 = vpop.eup %5801  ;;  %v4881_v18 = vadd.f32 1e-05, %v4879_v43 }
0x1811   : > { %v4883_v25 = vmul.f32 %v5802_v4, %v4880_v62  ;;  %vm4889_vm7 = vweird.f32 %v5802_v4 }
0x1812   : > { %5803 = vrsqrt.f32 %v4881_v18  ;;  %vm4890_vm8 = vmor %vm4888_vm6, %vm4889_vm7  ;;  %vm4898_vm12 = vweird.f32 %v4881_v18 }
0x1813   : > { %v4884_v57 = vmul.f32 %v5802_v4, %v4883_v25 }
0x1815   : > { %v4885_v9 = vmul.f32 0.5, %v4884_v57  ;;  %v5646_v57 = vld [vmem:[%s836_s28] ss:$0 sm:$0xff] }
0x1817   : > { %v4886_v56 = vsub.f32 1.5, %v4885_v9 }
0x1818   : > { %v5804_v51 = vpop.eup %5803 }
0x1819   : > { %v4887_v48 = vmul.f32 %v5802_v4, %v4886_v56  ;;  %v4893_v38 = vmul.f32 %v5804_v51, %v4881_v18  ;;  %vm4899_vm9 = vweird.f32 %v5804_v51 }
0x181a   : > { %vm4900_vm13 = vmor %vm4898_vm12, %vm4899_vm9 }
0x181b   : > { %v4894_v5 = vmul.f32 %v5804_v51, %v4893_v38  ;;  %v4891_v7 = vsel %vm4890_vm8, %v5802_v4, %v4887_v48 }
0x181c   : > { %v4902_v11 = vmul.f32 %v4891_v7, %v4868_v46 }
0x181d   : > { %v4895_v19 = vmul.f32 0.5, %v4894_v5 }
0x181e   : > { %v4906_v0 = vmul.f32 %v5642_v45, %v4902_v11 }
0x181f   : > { %v4896_v20 = vsub.f32 1.5, %v4895_v19 }
0x1820   : > { %v4910_v15 = vadd.f32 %v5643_v17, %v4906_v0 }
0x1821   : > { %v4897_v1 = vmul.f32 %v5804_v51, %v4896_v20 }
0x1822   : > { %v4912_v10 = vsel %vm1162_vm0, %v4910_v15, 0.0 }
0x1823   : > { %4913 = vadd.xlane.f32.xlu0 %v4912_v10  ;;  %v4901_v14 = vsel %vm4900_vm13, %v5804_v51, %v4897_v1 }
0x1824   : > { %v4903_v49 = vmul.f32 %v4901_v14, %v4869_v55 }
0x1826   : > { %v4907_v2 = vmul.f32 %v5642_v45, %v4903_v49 }
0x1828   : > { %v4911_v23 = vadd.f32 %v5643_v17, %v4907_v2 }
0x182a   : > { %v4915_v26 = vsel %vm1162_vm0, %v4911_v23, 0.0 }
0x182b   : > { %4916 = vadd.xlane.f32.xlu1 %v4915_v26 }
0x1896   : > { %v4914_v27 = vpop.xlane.xlu0 %4913 }
0x1897   : > { %v4918_v29 = vmul.f32 %v4914_v27, %v6575_v24 }
0x1899   : > { %v4920_v13 = vsub.f32 %v4910_v15, %v4918_v29 }
0x189b   : > { %v4922_v32 = vmul.f32 %v4920_v13, %v4920_v13 }
0x189d   : > { %v4924_v34 = vsel %vm1162_vm0, %v4922_v32, 0.0 }
0x189e   : > { %4925 = vadd.xlane.f32.xlu2 %v4924_v34  ;;  %v4917_v35 = vpop.xlane.xlu1 %4916 }
0x189f   : > { %v4919_v3 = vmul.f32 %v4917_v35, %v6575_v24 }
0x18a1   : > { %v4921_v30 = vsub.f32 %v4911_v23, %v4919_v3 }
0x18a3   : > { %v4923_v50 = vmul.f32 %v4921_v30, %v4921_v30 }
0x18a5   : > { %v4927_v53 = vsel %vm1162_vm0, %v4923_v50, 0.0 }
0x18a6   : > { %4928 = vadd.xlane.f32.xlu0 %v4927_v53 }
0x1911   : > { %v4926_v61 = vpop.xlane.xlu2 %4925 }
0x1912   : > { %v4930_v41 = vmul.f32 %v4926_v61, %v6575_v24 }
0x1914   : > { %v4932_v42 = vadd.f32 1e-05, %v4930_v41 }
0x1916   : > { %5805 = vrsqrt.f32 %v4932_v42  ;;  %vm4940_vm15 = vweird.f32 %v4932_v42 }
0x1919   : > { %v4929_v47 = vpop.xlane.xlu0 %4928 }
0x191a   : > { %v4931_v37 = vmul.f32 %v4929_v47, %v6575_v24 }
0x191c   : > { %v5806_v31 = vpop.eup %5805  ;;  %v4933_v8 = vadd.f32 1e-05, %v4931_v37 }
0x191d   : > { %v4935_v58 = vmul.f32 %v5806_v31, %v4932_v42  ;;  %vm4941_vm14 = vweird.f32 %v5806_v31 }
0x191e   : > { %5807 = vrsqrt.f32 %v4933_v8  ;;  %vm4942_vm10 = vmor %vm4940_vm15, %vm4941_vm14  ;;  %vm4950_vm1 = vweird.f32 %v4933_v8 }
0x191f   : > { %v4936_v28 = vmul.f32 %v5806_v31, %v4935_v58 }
0x1921   : > { %v4937_v6 = vmul.f32 0.5, %v4936_v28 }
0x1923   : > { %v4938_v33 = vsub.f32 1.5, %v4937_v6 }
0x1924   : > { %v5808_v46 = vpop.eup %5807 }
0x1925   : > { %v4939_v21 = vmul.f32 %v5806_v31, %v4938_v33  ;;  %v4945_v44 = vmul.f32 %v5808_v46, %v4933_v8  ;;  %vm4951_vm11 = vweird.f32 %v5808_v46 }
0x1926   : > { %vm4952_vm2 = vmor %vm4950_vm1, %vm4951_vm11 }
0x1927   : > { %v4943_v22 = vsel %vm4942_vm10, %v5806_v31, %v4939_v21  ;;  %v4946_v55 = vmul.f32 %v5808_v46, %v4945_v44 }
0x1928   : > { %v4954_v24 = vmul.f32 %v4943_v22, %v4920_v13 }
0x1929   : > { %v4947_v40 = vmul.f32 0.5, %v4946_v55 }
0x192a   : > { %v4958_v59 = vmul.f32 %v5644_v52, %v4954_v24 }
0x192b   : > { %v4948_v60 = vsub.f32 1.5, %v4947_v40 }
0x192c   : > { %v4962_v62 = vadd.f32 %v5645_v54, %v4958_v59 }
0x192d   : > { %v4949_v63 = vmul.f32 %v5808_v46, %v4948_v60 }
0x192e   : > { %5459 = vmatmul.msk.f32.vlgmr.msrb.gmra.mxu2 %vm1162_vm0, %v4962_v62 }
0x192f   : > { %v4953_v43 = vsel %vm4952_vm2, %v5808_v46, %v4949_v63 }
0x1930   : > { %v4955_v4 = vmul.f32 %v4953_v43, %v4921_v30 }
0x1932   : > { %v4959_v18 = vmul.f32 %v5644_v52, %v4955_v4 }
0x1934   : > { %v4963_v25 = vadd.f32 %v5645_v54, %v4959_v18 }
0x1936   : > { %5460 = vmatmul.msk.f32.gmra.mxu2 %vm1162_vm0, %v4963_v25 }
0x19b1   : > { %v4995_v9 = vpop.f32.mrf.mxu2 }
0x19b2   : > { %v4996_v56 = vadd.f32 %v5646_v57, %v4995_v9 }
0x19b4   : > { %5001 = vst.msk [vmem:[%s6161_s22] sm:$0xff] %vm1291_vm5, %v4996_v56 }
0x19b9   : > { %v4998_v51 = vpop.f32.mrf.mxu2 }
0x19ba   : > { %v4999_v48 = vadd.f32 %v5646_v57, %v4998_v51 }
0x19bc   : > { %5002 = vst.msk [vmem:[%s6161_s22 + $0x8] sm:$0xff] %vm1291_vm5, %v4999_v48 }
0x19bd PF: > { %s7469_s2 = sld [smem:[#allocation9_spill]] }
0x19be   : > { %s7470_s21 = sld [smem:[#allocation7_spill]] }
0x19bf   : > { %s7471_s1 = sld [smem:[#allocation8_spill]] }
0x19c0   : > { %s7472_s22 = sld [smem:[#allocation10_spill]] }
0x19c3   : > { %p30_p5 = scmp.ge.s32.totalorder %s7469_s2, 4  }
0x19c5   :  { %32 = sbr.rel (!%p30_p5) target bundleno = 27 (0x1b), region = 198 }
0x19ca   :  { %5024 = vsyncpa [#allocation5], 1 }
0x19cb   :  { %5026 = vsyncpa [#allocation5 + $0x1], 1 }

</bundles_post_ra>
